<compile_context>
chip_gen: v5e
topology: v5e:2x2
jax: 0.10.0
libtpu: 0.0.40
codegen_flags: <defaults>
</compile_context>

<pallas_src>
import functools

import jax
import jax.numpy as jnp
from jax.experimental import pallas as pl
from jax.experimental.pallas import tpu as pltpu


def _round_up(v, m):
    return (v + m - 1) // m * m


def _pad2d(a, rows, cols):
    return jnp.pad(a, ((0, rows - a.shape[0]), (0, cols - a.shape[1])))


# --------------------------------------------------------------------------------
# Tiled matmul kernels (bf16 MXU inputs, f32 accumulation, lane-dense outputs)
# --------------------------------------------------------------------------------
def _mm_kernel_single_k(x_ref, w_ref, b_ref, o_ref, *, relu):
    # Whole contraction in one tile: no accumulator scratch, no init/finalize.
    r = jnp.dot(x_ref[...], w_ref[...], preferred_element_type=jnp.float32)
    r = r + b_ref[...]                                   # bias per output row, (tm, 1)
    if relu:
        r = jnp.maximum(r, 0.0)
    o_ref[...] = r.astype(o_ref.dtype)


def _mm_kernel_tiled_k(x_ref, w_ref, b_ref, o_ref, acc_ref, *, relu):
    k = pl.program_id(2)

    @pl.when(k == 0)
    def _():
        acc_ref[...] = jnp.zeros_like(acc_ref)

    acc_ref[...] += jnp.dot(x_ref[...], w_ref[...],
                            preferred_element_type=jnp.float32)

    @pl.when(k == pl.num_programs(2) - 1)
    def _():
        r = acc_ref[...] + b_ref[...]
        if relu:
            r = jnp.maximum(r, 0.0)
        o_ref[...] = r.astype(o_ref.dtype)


def pallas_matmul(x, w, b=None, relu=False, out_dtype=jnp.float32):
    """out[M, N] = act(x @ w + b[:, None]);  x: (M, K), w: (K, N), b: (M,).

    Callers put the big flattened-spatial axis on N so output stores are
    lane-dense. Operands are cast to bf16 for the MXU; accumulation is f32.
    """
    M, K = x.shape
    K2, N = w.shape
    assert K == K2
    bcol = (jnp.zeros((M, 1), jnp.float32) if b is None
            else b.reshape(M, 1).astype(jnp.float32))

    tm = min(256, _round_up(M, 16))            # bf16 sublane packing (16, 128)
    tn = min(1024, _round_up(N, 128))          # wide lane-dense spatial tile
    Mp = _round_up(M, tm)
    Np = _round_up(N, tn)
    Kp = _round_up(K, 16)

    bp = _pad2d(bcol, Mp, 1)

    if Kp <= 1024:
        # Single contraction tile: the (tm, K) / (K, tn) blocks trivially fit VMEM.
        xp = _pad2d(x.astype(jnp.bfloat16), Mp, Kp)
        wp = _pad2d(w.astype(jnp.bfloat16), Kp, Np)
        out = pl.pallas_call(
            functools.partial(_mm_kernel_single_k, relu=relu),
            out_shape=jax.ShapeDtypeStruct((Mp, Np), out_dtype),
            grid=(Mp // tm, Np // tn),
            in_specs=[
                pl.BlockSpec((tm, Kp), lambda i, j: (i, 0)),
                pl.BlockSpec((Kp, tn), lambda i, j: (0, j)),
                pl.BlockSpec((tm, 1), lambda i, j: (i, 0)),
            ],
            out_specs=pl.BlockSpec((tm, tn), lambda i, j: (i, j)),
            compiler_params=pltpu.CompilerParams(
                dimension_semantics=("parallel", "parallel")),
        )(xp, wp, bp)
    else:
        # Fallback for large K (not hit by this network): MXU-depth aligned tiles.
        tk = 512
        Kp = _round_up(K, tk)
        xp = _pad2d(x.astype(jnp.bfloat16), Mp, Kp)
        wp = _pad2d(w.astype(jnp.bfloat16), Kp, Np)
        out = pl.pallas_call(
            functools.partial(_mm_kernel_tiled_k, relu=relu),
            out_shape=jax.ShapeDtypeStruct((Mp, Np), out_dtype),
            grid=(Mp // tm, Np // tn, Kp // tk),
            in_specs=[
                pl.BlockSpec((tm, tk), lambda i, j, k: (i, k)),
                pl.BlockSpec((tk, tn), lambda i, j, k: (k, j)),
                pl.BlockSpec((tm, 1), lambda i, j, k: (i, 0)),
            ],
            out_specs=pl.BlockSpec((tm, tn), lambda i, j, k: (i, j)),
            scratch_shapes=[pltpu.VMEM((tm, tn), jnp.float32)],
            compiler_params=pltpu.CompilerParams(
                dimension_semantics=("parallel", "parallel", "arbitrary")),
        )(xp, wp, bp)
    return out[:M, :N]


# --------------------------------------------------------------------------------
# Global average pooling kernel (grid-tiled over the C*B sublane axis)
# --------------------------------------------------------------------------------
def _gap_kernel(x_ref, o_ref, *, inv_hw):
    o_ref[...] = jnp.sum(x_ref[...].astype(jnp.float32), axis=-1,
                         keepdims=True) * inv_hw


def global_avg_pool(x):
    """x: (C, B, H, W) -> (C, B, 1, 1) f32."""
    C, B, H, W = x.shape
    R, HW = C * B, H * W
    tr = min(256, _round_up(R, 8))
    Rp = _round_up(R, tr)
    flat = x.reshape(R, HW)
    if Rp != R:
        flat = jnp.pad(flat, ((0, Rp - R), (0, 0)))
    out = pl.pallas_call(
        functools.partial(_gap_kernel, inv_hw=1.0 / float(HW)),
        out_shape=jax.ShapeDtypeStruct((Rp, 1), jnp.float32),
        grid=(Rp // tr,),
        in_specs=[pl.BlockSpec((tr, HW), lambda i: (i, 0))],
        out_specs=pl.BlockSpec((tr, 1), lambda i: (i, 0)),
        compiler_params=pltpu.CompilerParams(dimension_semantics=("parallel",)),
    )(flat)
    return out[:R].reshape(C, B, 1, 1)


# --------------------------------------------------------------------------------
# Bilinear upsample: two lane-dense matmul passes (no per-channel loop,
# no untiled (bt, Ho, Wo) VMEM block)
# --------------------------------------------------------------------------------
def _bilinear_matrix(n_in, n_out):
    """align_corners=True bilinear interpolation matrix (n_out, n_in).
    TODO(synk): smp mixes align_corners conventions; align_corners=True used here."""
    if n_in == 1:
        return jnp.ones((n_out, 1), jnp.float32)
    pos = jnp.arange(n_out, dtype=jnp.float32) * (n_in - 1) / max(n_out - 1, 1)
    lo = jnp.floor(pos).astype(jnp.int32)
    hi = jnp.minimum(lo + 1, n_in - 1)
    frac = pos - lo.astype(jnp.float32)
    m = jnp.zeros((n_out, n_in), jnp.float32)
    m = m.at[jnp.arange(n_out), lo].add(1.0 - frac)
    m = m.at[jnp.arange(n_out), hi].add(frac)
    return m


def bilinear_upsample(x, Ho, Wo, out_dtype=jnp.bfloat16):
    """x: (C, B, H, W) -> (C, B, Ho, Wo), bilinear align_corners=True.

    Row pass:    t[ho, c, b, w]  = sum_h uh[ho, h] * x[c, b, h, w]
    Column pass: o[wo, c, b, ho] = sum_w uw[wo, w] * t[ho, c, b, w]
    Both passes are lane-dense matmuls (flattened c*b*spatial on the N axis);
    the transposes between them are wrapper-side layout plumbing.
    """
    C, B, H, W = x.shape
    uh = _bilinear_matrix(H, Ho)                              # (Ho, H)
    uw = _bilinear_matrix(W, Wo)                              # (Wo, W)

    x1 = jnp.transpose(x, (2, 0, 1, 3)).reshape(H, C * B * W)
    t = pallas_matmul(uh, x1, out_dtype=out_dtype)            # (Ho, C*B*W)
    t2 = (t.reshape(Ho, C, B, W)
           .transpose(3, 1, 2, 0)
           .reshape(W, C * B * Ho))
    o = pallas_matmul(uw, t2, out_dtype=out_dtype)            # (Wo, C*B*Ho)
    return o.reshape(Wo, C, B, Ho).transpose(1, 2, 3, 0)      # (C, B, Ho, Wo)


# --------------------------------------------------------------------------------
# CE / Dice / Focal loss kernel (classes on sublanes, pixels on lanes)
# --------------------------------------------------------------------------------
def _loss_kernel(logits_ref, labels_ref, out_ref,
                 ce_acc, focal_acc, nvalid_acc, inter_acc, card_acc,
                 *, num_classes, ignore_index):
    step = pl.program_id(0)

    @pl.when(step == 0)
    def _():
        ce_acc[...] = jnp.zeros_like(ce_acc)
        focal_acc[...] = jnp.zeros_like(focal_acc)
        nvalid_acc[...] = jnp.zeros_like(nvalid_acc)
        inter_acc[...] = jnp.zeros_like(inter_acc)
        card_acc[...] = jnp.zeros_like(card_acc)

    logits = logits_ref[...]                                  # (Cp, tM) f32
    labels = labels_ref[...]                                  # (1, tM)  i32
    class_ids = jax.lax.broadcasted_iota(jnp.int32, logits.shape, 0)
    row_valid = class_ids < num_classes
    valid = jnp.logical_and(labels != ignore_index, labels < num_classes)
    validf = valid.astype(jnp.float32)                        # (1, tM)
    onehot = (class_ids == labels).astype(jnp.float32) * validf   # (Cp, tM)

    lg = jnp.where(row_valid, logits, -1e30)
    m = jnp.max(lg, axis=0, keepdims=True)                    # (1, tM)
    z = lg - m
    ez = jnp.exp(z)
    denom = jnp.sum(ez, axis=0, keepdims=True)
    probs = ez / denom                                        # exact (feeds dice/focal)
    logp = z - jnp.log(denom)

    pt = jnp.sum(probs * onehot, axis=0, keepdims=True)       # (1, tM)
    logpt = jnp.sum(logp * onehot, axis=0, keepdims=True)     # (1, tM)

    ce_acc[...] += jnp.sum(-logpt * validf, axis=1, keepdims=True)
    one_m_pt = 1.0 - pt
    focal_acc[...] += jnp.sum(one_m_pt * one_m_pt * (-logpt) * validf,
                              axis=1, keepdims=True)
    nvalid_acc[...] += jnp.sum(validf, axis=1, keepdims=True)

    pv = probs * validf
    inter_acc[...] += jnp.sum(pv * onehot, axis=1, keepdims=True)   # (Cp, 1)
    card_acc[...] += jnp.sum(pv + onehot, axis=1, keepdims=True)    # (Cp, 1)

    @pl.when(step == pl.num_programs(0) - 1)
    def _():
        nvalid = jnp.maximum(nvalid_acc[...], 1.0)            # (1, 1)
        ce = ce_acc[...] / nvalid
        focal = focal_acc[...] / nvalid
        eps = 1e-7
        dice_score = (2.0 * inter_acc[...] + eps) / (card_acc[...] + eps)   # (Cp, 1)
        rows = jax.lax.broadcasted_iota(jnp.int32, dice_score.shape, 0) < num_classes
        dice = jnp.sum(jnp.where(rows, 1.0 - dice_score, 0.0),
                       axis=0, keepdims=True) / num_classes   # (1, 1)
        total = 0.5 * ce + 0.3 * dice + 0.2 * focal
        out_ref[0] = total[0, 0]
        out_ref[1] = ce[0, 0]
        out_ref[2] = dice[0, 0]
        out_ref[3] = focal[0, 0]


def compute_losses(logits_cm, labels, ignore_index=255):
    """logits_cm: (C, B, H, W) f32 channel-major; labels: (B, H, W) int."""
    # TODO(synk): at training resolutions, fusing the final 4x upsample with this
    # kernel would avoid one full-resolution f32 HBM round trip.
    C, B, H, W = logits_cm.shape
    M = B * H * W
    Cp = _round_up(C, 8)
    tM = 2048
    Mp = _round_up(M, tM)

    lg = logits_cm.reshape(C, M).astype(jnp.float32)
    lg = jnp.pad(lg, ((0, Cp - C), (0, Mp - M)))
    lab = labels.reshape(1, M).astype(jnp.int32)
    lab = jnp.pad(lab, ((0, 0), (0, Mp - M)), constant_values=ignore_index)

    out = pl.pallas_call(
        functools.partial(_loss_kernel, num_classes=C, ignore_index=ignore_index),
        out_shape=jax.ShapeDtypeStruct((4,), jnp.float32),
        grid=(Mp // tM,),
        in_specs=[
            pl.BlockSpec((Cp, tM), lambda i: (0, i)),
            pl.BlockSpec((1, tM), lambda i: (0, i)),
        ],
        out_specs=pl.BlockSpec(memory_space=pltpu.MemorySpace.SMEM),
        scratch_shapes=[
            pltpu.VMEM((1, 1), jnp.float32),    # CE numerator
            pltpu.VMEM((1, 1), jnp.float32),    # focal numerator
            pltpu.VMEM((1, 1), jnp.float32),    # valid-pixel count
            pltpu.VMEM((Cp, 1), jnp.float32),   # dice intersection per class
            pltpu.VMEM((Cp, 1), jnp.float32),   # dice cardinality per class
        ],
        compiler_params=pltpu.CompilerParams(dimension_semantics=("arbitrary",)),
    )(lg, lab)
    return {"loss": out[0], "ce_loss": out[1], "dice_loss": out[2], "focal_loss": out[3]}


# --------------------------------------------------------------------------------
# Convolution on channel-major activations via the lane-dense matmul
# --------------------------------------------------------------------------------
def conv2d(x, w, b, stride=1, dilation=1, relu=False, out_dtype=jnp.bfloat16):
    """x: (Cin, B, H, W), w: (Cout, Cin, kh, kw) -> (Cout, B, Ho, Wo).

    Padding = dilation*(k-1)//2 (PyTorch 'same'-style). The im2col patch tensor
    is built directly in bf16 so the kh*kw-expanded tensor is written once in bf16.
    """
    Cout, Cin, kh, kw = w.shape
    C, B, H, W = x.shape
    ph = dilation * (kh - 1) // 2
    pw = dilation * (kw - 1) // 2
    Ho = (H + 2 * ph - dilation * (kh - 1) - 1) // stride + 1
    Wo = (W + 2 * pw - dilation * (kw - 1) - 1) // stride + 1

    if kh == 1 and kw == 1 and stride == 1:
        patchesT = x.reshape(Cin, B * H * W).astype(jnp.bfloat16)   # zero-copy 1x1
    else:
        # TODO(synk): stride-2 shifted windows are not expressible via BlockSpec
        # index maps; folding taps into the K grid axis would need manual DMA.
        xb = x.astype(jnp.bfloat16)          # cast BEFORE the kh*kw expansion
        xp = jnp.pad(xb, ((0, 0), (0, 0), (ph, ph), (pw, pw)))
        cols = []
        for i in range(kh):
            for j in range(kw):
                hs, ws = i * dilation, j * dilation
                cols.append(xp[:, :, hs:hs + stride * (Ho - 1) + 1:stride,
                                     ws:ws + stride * (Wo - 1) + 1:stride])
        taps = jnp.stack(cols, axis=1)                        # (Cin, kh*kw, B, Ho, Wo)
        patchesT = taps.reshape(Cin * kh * kw, B * Ho * Wo)

    wmat = w.reshape(Cout, Cin * kh * kw)
    out = pallas_matmul(wmat, patchesT, b, relu=relu, out_dtype=out_dtype)
    return out.reshape(Cout, B, Ho, Wo)


# --------------------------------------------------------------------------------
# Parameters (deterministic synthetic init) and forward pass
# --------------------------------------------------------------------------------
def _conv_params(key, cout, cin, kh, kw):
    fan_in = cin * kh * kw
    w = jax.random.normal(key, (cout, cin, kh, kw), jnp.float32) / jnp.sqrt(float(fan_in))
    b = jnp.zeros((cout,), jnp.float32)
    return w, b


def init_params(key, num_classes, in_channels=3):
    keys = jax.random.split(key, 14)
    p = {}
    p["stem"] = _conv_params(keys[0], 16, in_channels, 3, 3)     # /2
    p["layer1"] = _conv_params(keys[1], 24, 16, 3, 3)            # /4 (low-level skip)
    p["layer2"] = _conv_params(keys[2], 32, 24, 3, 3)            # /8
    p["layer3"] = _conv_params(keys[3], 64, 32, 3, 3)            # /16 (ASPP input)
    p["aspp0"] = _conv_params(keys[4], 32, 64, 1, 1)             # 1x1 branch
    p["aspp1"] = _conv_params(keys[5], 32, 64, 3, 3)             # dilated branches
    p["aspp2"] = _conv_params(keys[6], 32, 64, 3, 3)
    p["aspp3"] = _conv_params(keys[7], 32, 64, 3, 3)
    p["aspp_pool"] = _conv_params(keys[8], 32, 64, 1, 1)         # image-pooling branch
    p["aspp_proj"] = _conv_params(keys[9], 32, 5 * 32, 1, 1)
    p["low_proj"] = _conv_params(keys[10], 12, 24, 1, 1)
    p["dec1"] = _conv_params(keys[11], 32, 32 + 12, 3, 3)
    # TODO(synk): smp's decoder uses depthwise-separable 3x3 convs; plain 3x3 used here.
    p["dec2"] = _conv_params(keys[12], 32, 32, 3, 3)
    p["head"] = _conv_params(keys[13], num_classes, 32, 1, 1)
    return p


def deeplabv3plus_forward(params, pixel_values, labels=None, ignore_index=255):
    """Mirror of DeepLabV3PlusSemantic.forward: returns {'logits', [losses]}."""
    # Channel-major internal layout: (C, B, H, W); bf16 intermediate activations.
    x = pixel_values.transpose(1, 0, 2, 3)
    x = conv2d(x, *params["stem"], stride=2, relu=True)
    low = conv2d(x, *params["layer1"], stride=2, relu=True)
    x = conv2d(low, *params["layer2"], stride=2, relu=True)
    x = conv2d(x, *params["layer3"], stride=2, relu=True)

    # ASPP: four conv branches + image pooling folded into the projection.
    b0 = conv2d(x, *params["aspp0"], relu=True)
    b1 = conv2d(x, *params["aspp1"], dilation=2, relu=True)
    b2 = conv2d(x, *params["aspp2"], dilation=3, relu=True)
    b3 = conv2d(x, *params["aspp3"], dilation=4, relu=True)
    pooled = global_avg_pool(x)                                  # (64, B, 1, 1)
    b4 = conv2d(pooled, *params["aspp_pool"], relu=True)         # (32, B, 1, 1)

    w_proj, bias_proj = params["aspp_proj"]
    w_proj = w_proj.reshape(w_proj.shape[0], -1)                 # (32, 160)
    branches = jnp.concatenate([b0, b1, b2, b3], axis=0)         # (128, B, h, w)
    Cb, Bn, h16, w16 = branches.shape
    pre = pallas_matmul(w_proj[:, :Cb], branches.reshape(Cb, Bn * h16 * w16),
                        relu=False, out_dtype=jnp.float32)       # (32, B*h*w)
    # Image-pool branch is spatially constant -> fold it in as a per-batch bias.
    beff = (jnp.dot(w_proj[:, Cb:].astype(jnp.float32),
                    b4.reshape(-1, Bn).astype(jnp.float32))
            + bias_proj[:, None])                                # (32, B)
    aspp = jnp.maximum(pre.reshape(-1, Bn, h16, w16) + beff[:, :, None, None], 0.0)
    aspp = aspp.astype(jnp.bfloat16)

    # Decoder with low-level skip
    up = bilinear_upsample(aspp, low.shape[2], low.shape[3])     # bf16
    lowp = conv2d(low, *params["low_proj"], relu=True)
    d = jnp.concatenate([up, lowp], axis=0)
    d = conv2d(d, *params["dec1"], relu=True)
    d = conv2d(d, *params["dec2"], relu=True)

    # Segmentation head + 4x upsample to input resolution (f32 logits for the loss)
    logits16 = conv2d(d, *params["head"], relu=False, out_dtype=jnp.float32)
    logits_cm = bilinear_upsample(logits16, pixel_values.shape[2],
                                  pixel_values.shape[3], out_dtype=jnp.float32)

    outputs = {"logits": logits_cm.transpose(1, 0, 2, 3)}        # back to NCHW
    if labels is not None:
        outputs.update(compute_losses(logits_cm, labels, ignore_index=ignore_index))
    return outputs


# --------------------------------------------------------------------------------
if __name__ == "__main__":
    num_classes = 5
    B, Cin, H, W = 2, 3, 32, 32

    key = jax.random.PRNGKey(0)
    k_img, k_lab, k_ign, k_par = jax.random.split(key, 4)

    pixel_values = jax.random.normal(k_img, (B, Cin, H, W), jnp.float32)
    labels = jax.random.randint(k_lab, (B, H, W), 0, num_classes, dtype=jnp.int32)
    # sprinkle some ignore_index pixels
    ignore_mask = jax.random.bernoulli(k_ign, 0.1, (B, H, W))
    labels = jnp.where(ignore_mask, 255, labels)

    params = init_params(k_par, num_classes, in_channels=Cin)

    fwd = jax.jit(deeplabv3plus_forward)
    outputs = fwd(params, pixel_values, labels)
    outputs = jax.block_until_ready(outputs)

    logits = outputs["logits"]
    assert logits.shape == (B, num_classes, H, W)
    assert bool(jnp.isfinite(logits).all())
    for k in ("loss", "ce_loss", "dice_loss", "focal_loss"):
        assert bool(jnp.isfinite(outputs[k]))

    print("KERNEL_OK")
</pallas_src>

<mosaic_0001>
module attributes {stable_mosaic.version = 11 : i64} {
  func.func @_mm_kernel_single_k(%arg0: i32, %arg1: i32, %arg2: memref<16x32xbf16, #tpu.memory_space<vmem>>, %arg3: memref<32x512xbf16, #tpu.memory_space<vmem>>, %arg4: memref<16x1xf32, #tpu.memory_space<vmem>>, %arg5: memref<16x512xbf16, #tpu.memory_space<vmem>>) attributes {dimension_semantics = [#tpu.dimension_semantics<parallel>, #tpu.dimension_semantics<parallel>], iteration_bounds = array<i64: 1, 1>, scalar_prefetch = 0 : i64, scratch_operands = 0 : i64, tpu.core_type = #tpu.core_type<tc>, window_params = [{transform_indices = @transform_0, window_bounds = array<i64: 16, 32>}, {transform_indices = @transform_1, window_bounds = array<i64: 32, 512>}, {transform_indices = @transform_2, window_bounds = array<i64: 16, 1>}, {transform_indices = @transform_3, window_bounds = array<i64: 16, 512>}]} {
    %c0 = arith.constant 0 : index
    %c0_0 = arith.constant 0 : index
    %0 = vector.load %arg2[%c0, %c0_0] : memref<16x32xbf16, #tpu.memory_space<vmem>>, vector<16x32xbf16>
    %c0_1 = arith.constant 0 : index
    %c0_2 = arith.constant 0 : index
    %1 = vector.load %arg3[%c0_1, %c0_2] : memref<32x512xbf16, #tpu.memory_space<vmem>>, vector<32x512xbf16>
    %cst = arith.constant dense<0.000000e+00> : vector<16x512xf32>
    %2 = tpu.matmul %0, %1, %cst {dimension_numbers = #tpu.dot_dimension_numbers<[1], [0], [0], [1], [0, 0, 1, 1], [], []>} : vector<16x32xbf16>, vector<32x512xbf16>, vector<16x512xf32> -> vector<16x512xf32>
    %c0_3 = arith.constant 0 : index
    %c0_4 = arith.constant 0 : index
    %3 = vector.load %arg4[%c0_3, %c0_4] : memref<16x1xf32, #tpu.memory_space<vmem>>, vector<16x1xf32>
    %4 = vector.broadcast %3 : vector<16x1xf32> to vector<16x512xf32>
    %5 = arith.addf %2, %4 : vector<16x512xf32>
    %cst_5 = arith.constant 0.000000e+00 : f32
    %6 = vector.broadcast %cst_5 : f32 to vector<16x512xf32>
    %7 = arith.maximumf %5, %6 : vector<16x512xf32>
    %8 = arith.truncf %7 : vector<16x512xf32> to vector<16x512xbf16>
    %c0_6 = arith.constant 0 : index
    %c0_7 = arith.constant 0 : index
    %9 = vector.load %arg5[%c0_6, %c0_7] : memref<16x512xbf16, #tpu.memory_space<vmem>>, vector<16x512xbf16>
    tpu.vector_store %arg5[%c0_6, %c0_7], %8 {strides = array<i32>} : memref<16x512xbf16, #tpu.memory_space<vmem>>, vector<16x512xbf16>,
    return
  }
  func.func @transform_0(%arg0: i32, %arg1: i32) -> (i32, i32) {
    %c0_i32 = arith.constant 0 : i32
    %c0_i32_0 = arith.constant 0 : i32
    return %arg0, %c0_i32 : i32, i32
  }
  func.func @transform_1(%arg0: i32, %arg1: i32) -> (i32, i32) {
    %c0_i32 = arith.constant 0 : i32
    %c0_i32_0 = arith.constant 0 : i32
    return %c0_i32, %arg1 : i32, i32
  }
  func.func @transform_2(%arg0: i32, %arg1: i32) -> (i32, i32) {
    %c0_i32 = arith.constant 0 : i32
    %c0_i32_0 = arith.constant 0 : i32
    return %arg0, %c0_i32 : i32, i32
  }
  func.func @transform_3(%arg0: i32, %arg1: i32) -> (i32, i32) {
    %c0_i32 = arith.constant 0 : i32
    return %arg0, %arg1 : i32, i32
  }
}

module attributes {stable_mosaic.version = 11 : i64} {
  func.func @_mm_kernel_single_k(%arg0: i32, %arg1: i32, %arg2: memref<32x144xbf16, #tpu.memory_space<vmem>>, %arg3: memref<144x128xbf16, #tpu.memory_space<vmem>>, %arg4: memref<32x1xf32, #tpu.memory_space<vmem>>, %arg5: memref<32x128xbf16, #tpu.memory_space<vmem>>) attributes {dimension_semantics = [#tpu.dimension_semantics<parallel>, #tpu.dimension_semantics<parallel>], iteration_bounds = array<i64: 1, 1>, scalar_prefetch = 0 : i64, scratch_operands = 0 : i64, tpu.core_type = #tpu.core_type<tc>, window_params = [{transform_indices = @transform_0, window_bounds = array<i64: 32, 144>}, {transform_indices = @transform_1, window_bounds = array<i64: 144, 128>}, {transform_indices = @transform_2, window_bounds = array<i64: 32, 1>}, {transform_indices = @transform_3, window_bounds = array<i64: 32, 128>}]} {
    %c0 = arith.constant 0 : index
    %c0_0 = arith.constant 0 : index
    %0 = vector.load %arg2[%c0, %c0_0] : memref<32x144xbf16, #tpu.memory_space<vmem>>, vector<32x144xbf16>
    %c0_1 = arith.constant 0 : index
    %c0_2 = arith.constant 0 : index
    %1 = vector.load %arg3[%c0_1, %c0_2] : memref<144x128xbf16, #tpu.memory_space<vmem>>, vector<144x128xbf16>
    %cst = arith.constant dense<0.000000e+00> : vector<32x128xf32>
    %2 = tpu.matmul %0, %1, %cst {dimension_numbers = #tpu.dot_dimension_numbers<[1], [0], [0], [1], [0, 0, 1, 1], [], []>} : vector<32x144xbf16>, vector<144x128xbf16>, vector<32x128xf32> -> vector<32x128xf32>
    %c0_3 = arith.constant 0 : index
    %c0_4 = arith.constant 0 : index
    %3 = vector.load %arg4[%c0_3, %c0_4] : memref<32x1xf32, #tpu.memory_space<vmem>>, vector<32x1xf32>
    %4 = vector.broadcast %3 : vector<32x1xf32> to vector<32x128xf32>
    %5 = arith.addf %2, %4 : vector<32x128xf32>
    %cst_5 = arith.constant 0.000000e+00 : f32
    %6 = vector.broadcast %cst_5 : f32 to vector<32x128xf32>
    %7 = arith.maximumf %5, %6 : vector<32x128xf32>
    %8 = arith.truncf %7 : vector<32x128xf32> to vector<32x128xbf16>
    %c0_6 = arith.constant 0 : index
    %c0_7 = arith.constant 0 : index
    %9 = vector.load %arg5[%c0_6, %c0_7] : memref<32x128xbf16, #tpu.memory_space<vmem>>, vector<32x128xbf16>
    tpu.vector_store %arg5[%c0_6, %c0_7], %8 {strides = array<i32>} : memref<32x128xbf16, #tpu.memory_space<vmem>>, vector<32x128xbf16>,
    return
  }
  func.func @transform_0(%arg0: i32, %arg1: i32) -> (i32, i32) {
    %c0_i32 = arith.constant 0 : i32
    %c0_i32_0 = arith.constant 0 : i32
    return %arg0, %c0_i32 : i32, i32
  }
  func.func @transform_1(%arg0: i32, %arg1: i32) -> (i32, i32) {
    %c0_i32 = arith.constant 0 : i32
    %c0_i32_0 = arith.constant 0 : i32
    return %c0_i32, %arg1 : i32, i32
  }
  func.func @transform_2(%arg0: i32, %arg1: i32) -> (i32, i32) {
    %c0_i32 = arith.constant 0 : i32
    %c0_i32_0 = arith.constant 0 : i32
    return %arg0, %c0_i32 : i32, i32
  }
  func.func @transform_3(%arg0: i32, %arg1: i32) -> (i32, i32) {
    %c0_i32 = arith.constant 0 : i32
    return %arg0, %arg1 : i32, i32
  }
}

module attributes {stable_mosaic.version = 11 : i64} {
  func.func @_mm_kernel_single_k(%arg0: i32, %arg1: i32, %arg2: memref<32x224xbf16, #tpu.memory_space<vmem>>, %arg3: memref<224x128xbf16, #tpu.memory_space<vmem>>, %arg4: memref<32x1xf32, #tpu.memory_space<vmem>>, %arg5: memref<32x128xbf16, #tpu.memory_space<vmem>>) attributes {dimension_semantics = [#tpu.dimension_semantics<parallel>, #tpu.dimension_semantics<parallel>], iteration_bounds = array<i64: 1, 1>, scalar_prefetch = 0 : i64, scratch_operands = 0 : i64, tpu.core_type = #tpu.core_type<tc>, window_params = [{transform_indices = @transform_0, window_bounds = array<i64: 32, 224>}, {transform_indices = @transform_1, window_bounds = array<i64: 224, 128>}, {transform_indices = @transform_2, window_bounds = array<i64: 32, 1>}, {transform_indices = @transform_3, window_bounds = array<i64: 32, 128>}]} {
    %c0 = arith.constant 0 : index
    %c0_0 = arith.constant 0 : index
    %0 = vector.load %arg2[%c0, %c0_0] : memref<32x224xbf16, #tpu.memory_space<vmem>>, vector<32x224xbf16>
    %c0_1 = arith.constant 0 : index
    %c0_2 = arith.constant 0 : index
    %1 = vector.load %arg3[%c0_1, %c0_2] : memref<224x128xbf16, #tpu.memory_space<vmem>>, vector<224x128xbf16>
    %cst = arith.constant dense<0.000000e+00> : vector<32x128xf32>
    %2 = tpu.matmul %0, %1, %cst {dimension_numbers = #tpu.dot_dimension_numbers<[1], [0], [0], [1], [0, 0, 1, 1], [], []>} : vector<32x224xbf16>, vector<224x128xbf16>, vector<32x128xf32> -> vector<32x128xf32>
    %c0_3 = arith.constant 0 : index
    %c0_4 = arith.constant 0 : index
    %3 = vector.load %arg4[%c0_3, %c0_4] : memref<32x1xf32, #tpu.memory_space<vmem>>, vector<32x1xf32>
    %4 = vector.broadcast %3 : vector<32x1xf32> to vector<32x128xf32>
    %5 = arith.addf %2, %4 : vector<32x128xf32>
    %cst_5 = arith.constant 0.000000e+00 : f32
    %6 = vector.broadcast %cst_5 : f32 to vector<32x128xf32>
    %7 = arith.maximumf %5, %6 : vector<32x128xf32>
    %8 = arith.truncf %7 : vector<32x128xf32> to vector<32x128xbf16>
    %c0_6 = arith.constant 0 : index
    %c0_7 = arith.constant 0 : index
    %9 = vector.load %arg5[%c0_6, %c0_7] : memref<32x128xbf16, #tpu.memory_space<vmem>>, vector<32x128xbf16>
    tpu.vector_store %arg5[%c0_6, %c0_7], %8 {strides = array<i32>} : memref<32x128xbf16, #tpu.memory_space<vmem>>, vector<32x128xbf16>,
    return
  }
  func.func @transform_0(%arg0: i32, %arg1: i32) -> (i32, i32) {
    %c0_i32 = arith.constant 0 : i32
    %c0_i32_0 = arith.constant 0 : i32
    return %arg0, %c0_i32 : i32, i32
  }
  func.func @transform_1(%arg0: i32, %arg1: i32) -> (i32, i32) {
    %c0_i32 = arith.constant 0 : i32
    %c0_i32_0 = arith.constant 0 : i32
    return %c0_i32, %arg1 : i32, i32
  }
  func.func @transform_2(%arg0: i32, %arg1: i32) -> (i32, i32) {
    %c0_i32 = arith.constant 0 : i32
    %c0_i32_0 = arith.constant 0 : i32
    return %arg0, %c0_i32 : i32, i32
  }
  func.func @transform_3(%arg0: i32, %arg1: i32) -> (i32, i32) {
    %c0_i32 = arith.constant 0 : i32
    return %arg0, %arg1 : i32, i32
  }
}

module attributes {stable_mosaic.version = 11 : i64} {
  func.func @_mm_kernel_single_k(%arg0: i32, %arg1: i32, %arg2: memref<64x288xbf16, #tpu.memory_space<vmem>>, %arg3: memref<288x128xbf16, #tpu.memory_space<vmem>>, %arg4: memref<64x1xf32, #tpu.memory_space<vmem>>, %arg5: memref<64x128xbf16, #tpu.memory_space<vmem>>) attributes {dimension_semantics = [#tpu.dimension_semantics<parallel>, #tpu.dimension_semantics<parallel>], iteration_bounds = array<i64: 1, 1>, scalar_prefetch = 0 : i64, scratch_operands = 0 : i64, tpu.core_type = #tpu.core_type<tc>, window_params = [{transform_indices = @transform_0, window_bounds = array<i64: 64, 288>}, {transform_indices = @transform_1, window_bounds = array<i64: 288, 128>}, {transform_indices = @transform_2, window_bounds = array<i64: 64, 1>}, {transform_indices = @transform_3, window_bounds = array<i64: 64, 128>}]} {
    %c0 = arith.constant 0 : index
    %c0_0 = arith.constant 0 : index
    %0 = vector.load %arg2[%c0, %c0_0] : memref<64x288xbf16, #tpu.memory_space<vmem>>, vector<64x288xbf16>
    %c0_1 = arith.constant 0 : index
    %c0_2 = arith.constant 0 : index
    %1 = vector.load %arg3[%c0_1, %c0_2] : memref<288x128xbf16, #tpu.memory_space<vmem>>, vector<288x128xbf16>
    %cst = arith.constant dense<0.000000e+00> : vector<64x128xf32>
    %2 = tpu.matmul %0, %1, %cst {dimension_numbers = #tpu.dot_dimension_numbers<[1], [0], [0], [1], [0, 0, 1, 1], [], []>} : vector<64x288xbf16>, vector<288x128xbf16>, vector<64x128xf32> -> vector<64x128xf32>
    %c0_3 = arith.constant 0 : index
    %c0_4 = arith.constant 0 : index
    %3 = vector.load %arg4[%c0_3, %c0_4] : memref<64x1xf32, #tpu.memory_space<vmem>>, vector<64x1xf32>
    %4 = vector.broadcast %3 : vector<64x1xf32> to vector<64x128xf32>
    %5 = arith.addf %2, %4 : vector<64x128xf32>
    %cst_5 = arith.constant 0.000000e+00 : f32
    %6 = vector.broadcast %cst_5 : f32 to vector<64x128xf32>
    %7 = arith.maximumf %5, %6 : vector<64x128xf32>
    %8 = arith.truncf %7 : vector<64x128xf32> to vector<64x128xbf16>
    %c0_6 = arith.constant 0 : index
    %c0_7 = arith.constant 0 : index
    %9 = vector.load %arg5[%c0_6, %c0_7] : memref<64x128xbf16, #tpu.memory_space<vmem>>, vector<64x128xbf16>
    tpu.vector_store %arg5[%c0_6, %c0_7], %8 {strides = array<i32>} : memref<64x128xbf16, #tpu.memory_space<vmem>>, vector<64x128xbf16>,
    return
  }
  func.func @transform_0(%arg0: i32, %arg1: i32) -> (i32, i32) {
    %c0_i32 = arith.constant 0 : i32
    %c0_i32_0 = arith.constant 0 : i32
    return %arg0, %c0_i32 : i32, i32
  }
  func.func @transform_1(%arg0: i32, %arg1: i32) -> (i32, i32) {
    %c0_i32 = arith.constant 0 : i32
    %c0_i32_0 = arith.constant 0 : i32
    return %c0_i32, %arg1 : i32, i32
  }
  func.func @transform_2(%arg0: i32, %arg1: i32) -> (i32, i32) {
    %c0_i32 = arith.constant 0 : i32
    %c0_i32_0 = arith.constant 0 : i32
    return %arg0, %c0_i32 : i32, i32
  }
  func.func @transform_3(%arg0: i32, %arg1: i32) -> (i32, i32) {
    %c0_i32 = arith.constant 0 : i32
    return %arg0, %arg1 : i32, i32
  }
}

module attributes {stable_mosaic.version = 11 : i64} {
  func.func @_mm_kernel_single_k(%arg0: i32, %arg1: i32, %arg2: memref<32x576xbf16, #tpu.memory_space<vmem>>, %arg3: memref<576x128xbf16, #tpu.memory_space<vmem>>, %arg4: memref<32x1xf32, #tpu.memory_space<vmem>>, %arg5: memref<32x128xbf16, #tpu.memory_space<vmem>>) attributes {dimension_semantics = [#tpu.dimension_semantics<parallel>, #tpu.dimension_semantics<parallel>], iteration_bounds = array<i64: 1, 1>, scalar_prefetch = 0 : i64, scratch_operands = 0 : i64, tpu.core_type = #tpu.core_type<tc>, window_params = [{transform_indices = @transform_0, window_bounds = array<i64: 32, 576>}, {transform_indices = @transform_1, window_bounds = array<i64: 576, 128>}, {transform_indices = @transform_2, window_bounds = array<i64: 32, 1>}, {transform_indices = @transform_3, window_bounds = array<i64: 32, 128>}]} {
    %c0 = arith.constant 0 : index
    %c0_0 = arith.constant 0 : index
    %0 = vector.load %arg2[%c0, %c0_0] : memref<32x576xbf16, #tpu.memory_space<vmem>>, vector<32x576xbf16>
    %c0_1 = arith.constant 0 : index
    %c0_2 = arith.constant 0 : index
    %1 = vector.load %arg3[%c0_1, %c0_2] : memref<576x128xbf16, #tpu.memory_space<vmem>>, vector<576x128xbf16>
    %cst = arith.constant dense<0.000000e+00> : vector<32x128xf32>
    %2 = tpu.matmul %0, %1, %cst {dimension_numbers = #tpu.dot_dimension_numbers<[1], [0], [0], [1], [0, 0, 1, 1], [], []>} : vector<32x576xbf16>, vector<576x128xbf16>, vector<32x128xf32> -> vector<32x128xf32>
    %c0_3 = arith.constant 0 : index
    %c0_4 = arith.constant 0 : index
    %3 = vector.load %arg4[%c0_3, %c0_4] : memref<32x1xf32, #tpu.memory_space<vmem>>, vector<32x1xf32>
    %4 = vector.broadcast %3 : vector<32x1xf32> to vector<32x128xf32>
    %5 = arith.addf %2, %4 : vector<32x128xf32>
    %cst_5 = arith.constant 0.000000e+00 : f32
    %6 = vector.broadcast %cst_5 : f32 to vector<32x128xf32>
    %7 = arith.maximumf %5, %6 : vector<32x128xf32>
    %8 = arith.truncf %7 : vector<32x128xf32> to vector<32x128xbf16>
    %c0_6 = arith.constant 0 : index
    %c0_7 = arith.constant 0 : index
    %9 = vector.load %arg5[%c0_6, %c0_7] : memref<32x128xbf16, #tpu.memory_space<vmem>>, vector<32x128xbf16>
    tpu.vector_store %arg5[%c0_6, %c0_7], %8 {strides = array<i32>} : memref<32x128xbf16, #tpu.memory_space<vmem>>, vector<32x128xbf16>,
    return
  }
  func.func @transform_0(%arg0: i32, %arg1: i32) -> (i32, i32) {
    %c0_i32 = arith.constant 0 : i32
    %c0_i32_0 = arith.constant 0 : i32
    return %arg0, %c0_i32 : i32, i32
  }
  func.func @transform_1(%arg0: i32, %arg1: i32) -> (i32, i32) {
    %c0_i32 = arith.constant 0 : i32
    %c0_i32_0 = arith.constant 0 : i32
    return %c0_i32, %arg1 : i32, i32
  }
  func.func @transform_2(%arg0: i32, %arg1: i32) -> (i32, i32) {
    %c0_i32 = arith.constant 0 : i32
    %c0_i32_0 = arith.constant 0 : i32
    return %arg0, %c0_i32 : i32, i32
  }
  func.func @transform_3(%arg0: i32, %arg1: i32) -> (i32, i32) {
    %c0_i32 = arith.constant 0 : i32
    return %arg0, %arg1 : i32, i32
  }
}

module attributes {stable_mosaic.version = 11 : i64} {
  func.func @_mm_kernel_single_k(%arg0: i32, %arg1: i32, %arg2: memref<32x64xbf16, #tpu.memory_space<vmem>>, %arg3: memref<64x128xbf16, #tpu.memory_space<vmem>>, %arg4: memref<32x1xf32, #tpu.memory_space<vmem>>, %arg5: memref<32x128xbf16, #tpu.memory_space<vmem>>) attributes {dimension_semantics = [#tpu.dimension_semantics<parallel>, #tpu.dimension_semantics<parallel>], iteration_bounds = array<i64: 1, 1>, scalar_prefetch = 0 : i64, scratch_operands = 0 : i64, tpu.core_type = #tpu.core_type<tc>, window_params = [{transform_indices = @transform_0, window_bounds = array<i64: 32, 64>}, {transform_indices = @transform_1, window_bounds = array<i64: 64, 128>}, {transform_indices = @transform_2, window_bounds = array<i64: 32, 1>}, {transform_indices = @transform_3, window_bounds = array<i64: 32, 128>}]} {
    %c0 = arith.constant 0 : index
    %c0_0 = arith.constant 0 : index
    %0 = vector.load %arg2[%c0, %c0_0] : memref<32x64xbf16, #tpu.memory_space<vmem>>, vector<32x64xbf16>
    %c0_1 = arith.constant 0 : index
    %c0_2 = arith.constant 0 : index
    %1 = vector.load %arg3[%c0_1, %c0_2] : memref<64x128xbf16, #tpu.memory_space<vmem>>, vector<64x128xbf16>
    %cst = arith.constant dense<0.000000e+00> : vector<32x128xf32>
    %2 = tpu.matmul %0, %1, %cst {dimension_numbers = #tpu.dot_dimension_numbers<[1], [0], [0], [1], [0, 0, 1, 1], [], []>} : vector<32x64xbf16>, vector<64x128xbf16>, vector<32x128xf32> -> vector<32x128xf32>
    %c0_3 = arith.constant 0 : index
    %c0_4 = arith.constant 0 : index
    %3 = vector.load %arg4[%c0_3, %c0_4] : memref<32x1xf32, #tpu.memory_space<vmem>>, vector<32x1xf32>
    %4 = vector.broadcast %3 : vector<32x1xf32> to vector<32x128xf32>
    %5 = arith.addf %2, %4 : vector<32x128xf32>
    %cst_5 = arith.constant 0.000000e+00 : f32
    %6 = vector.broadcast %cst_5 : f32 to vector<32x128xf32>
    %7 = arith.maximumf %5, %6 : vector<32x128xf32>
    %8 = arith.truncf %7 : vector<32x128xf32> to vector<32x128xbf16>
    %c0_6 = arith.constant 0 : index
    %c0_7 = arith.constant 0 : index
    %9 = vector.load %arg5[%c0_6, %c0_7] : memref<32x128xbf16, #tpu.memory_space<vmem>>, vector<32x128xbf16>
    tpu.vector_store %arg5[%c0_6, %c0_7], %8 {strides = array<i32>} : memref<32x128xbf16, #tpu.memory_space<vmem>>, vector<32x128xbf16>,
    return
  }
  func.func @transform_0(%arg0: i32, %arg1: i32) -> (i32, i32) {
    %c0_i32 = arith.constant 0 : i32
    %c0_i32_0 = arith.constant 0 : i32
    return %arg0, %c0_i32 : i32, i32
  }
  func.func @transform_1(%arg0: i32, %arg1: i32) -> (i32, i32) {
    %c0_i32 = arith.constant 0 : i32
    %c0_i32_0 = arith.constant 0 : i32
    return %c0_i32, %arg1 : i32, i32
  }
  func.func @transform_2(%arg0: i32, %arg1: i32) -> (i32, i32) {
    %c0_i32 = arith.constant 0 : i32
    %c0_i32_0 = arith.constant 0 : i32
    return %arg0, %c0_i32 : i32, i32
  }
  func.func @transform_3(%arg0: i32, %arg1: i32) -> (i32, i32) {
    %c0_i32 = arith.constant 0 : i32
    return %arg0, %arg1 : i32, i32
  }
}

module attributes {stable_mosaic.version = 11 : i64} {
  func.func @_mm_kernel_single_k(%arg0: i32, %arg1: i32, %arg2: memref<32x128xbf16, #tpu.memory_space<vmem>>, %arg3: memref<128x128xbf16, #tpu.memory_space<vmem>>, %arg4: memref<32x1xf32, #tpu.memory_space<vmem>>, %arg5: memref<32x128xf32, #tpu.memory_space<vmem>>) attributes {dimension_semantics = [#tpu.dimension_semantics<parallel>, #tpu.dimension_semantics<parallel>], iteration_bounds = array<i64: 1, 1>, scalar_prefetch = 0 : i64, scratch_operands = 0 : i64, tpu.core_type = #tpu.core_type<tc>, window_params = [{transform_indices = @transform_0, window_bounds = array<i64: 32, 128>}, {transform_indices = @transform_1, window_bounds = array<i64: 128, 128>}, {transform_indices = @transform_2, window_bounds = array<i64: 32, 1>}, {transform_indices = @transform_3, window_bounds = array<i64: 32, 128>}]} {
    %c0 = arith.constant 0 : index
    %c0_0 = arith.constant 0 : index
    %0 = vector.load %arg2[%c0, %c0_0] : memref<32x128xbf16, #tpu.memory_space<vmem>>, vector<32x128xbf16>
    %c0_1 = arith.constant 0 : index
    %c0_2 = arith.constant 0 : index
    %1 = vector.load %arg3[%c0_1, %c0_2] : memref<128x128xbf16, #tpu.memory_space<vmem>>, vector<128x128xbf16>
    %cst = arith.constant dense<0.000000e+00> : vector<32x128xf32>
    %2 = tpu.matmul %0, %1, %cst {dimension_numbers = #tpu.dot_dimension_numbers<[1], [0], [0], [1], [0, 0, 1, 1], [], []>} : vector<32x128xbf16>, vector<128x128xbf16>, vector<32x128xf32> -> vector<32x128xf32>
    %c0_3 = arith.constant 0 : index
    %c0_4 = arith.constant 0 : index
    %3 = vector.load %arg4[%c0_3, %c0_4] : memref<32x1xf32, #tpu.memory_space<vmem>>, vector<32x1xf32>
    %4 = vector.broadcast %3 : vector<32x1xf32> to vector<32x128xf32>
    %5 = arith.addf %2, %4 : vector<32x128xf32>
    %c0_5 = arith.constant 0 : index
    %c0_6 = arith.constant 0 : index
    %6 = vector.load %arg5[%c0_5, %c0_6] : memref<32x128xf32, #tpu.memory_space<vmem>>, vector<32x128xf32>
    tpu.vector_store %arg5[%c0_5, %c0_6], %5 {strides = array<i32>} : memref<32x128xf32, #tpu.memory_space<vmem>>, vector<32x128xf32>,
    return
  }
  func.func @transform_0(%arg0: i32, %arg1: i32) -> (i32, i32) {
    %c0_i32 = arith.constant 0 : i32
    %c0_i32_0 = arith.constant 0 : i32
    return %arg0, %c0_i32 : i32, i32
  }
  func.func @transform_1(%arg0: i32, %arg1: i32) -> (i32, i32) {
    %c0_i32 = arith.constant 0 : i32
    %c0_i32_0 = arith.constant 0 : i32
    return %c0_i32, %arg1 : i32, i32
  }
  func.func @transform_2(%arg0: i32, %arg1: i32) -> (i32, i32) {
    %c0_i32 = arith.constant 0 : i32
    %c0_i32_0 = arith.constant 0 : i32
    return %arg0, %c0_i32 : i32, i32
  }
  func.func @transform_3(%arg0: i32, %arg1: i32) -> (i32, i32) {
    %c0_i32 = arith.constant 0 : i32
    return %arg0, %arg1 : i32, i32
  }
}

module attributes {stable_mosaic.version = 11 : i64} {
  func.func @_gap_kernel(%arg0: i32, %arg1: memref<128x4xbf16, #tpu.memory_space<vmem>>, %arg2: memref<128x1xf32, #tpu.memory_space<vmem>>) attributes {dimension_semantics = [#tpu.dimension_semantics<parallel>], iteration_bounds = array<i64: 1>, scalar_prefetch = 0 : i64, scratch_operands = 0 : i64, tpu.core_type = #tpu.core_type<tc>, window_params = [{transform_indices = @transform_0, window_bounds = array<i64: 128, 4>}, {transform_indices = @transform_1, window_bounds = array<i64: 128, 1>}]} {
    %c0 = arith.constant 0 : index
    %c0_0 = arith.constant 0 : index
    %0 = vector.load %arg1[%c0, %c0_0] : memref<128x4xbf16, #tpu.memory_space<vmem>>, vector<128x4xbf16>
    %1 = arith.extf %0 : vector<128x4xbf16> to vector<128x4xf32>
    %cst = arith.constant dense<0.000000e+00> : vector<128xf32>
    %2 = vector.multi_reduction <add>, %1, %cst [1] : vector<128x4xf32> to vector<128xf32>
    %3 = vector.shape_cast %2 : vector<128xf32> to vector<128x1xf32>
    %cst_1 = arith.constant 2.500000e-01 : f32
    %4 = vector.broadcast %cst_1 : f32 to vector<128x1xf32>
    %5 = arith.mulf %3, %4 : vector<128x1xf32>
    %c0_2 = arith.constant 0 : index
    %c0_3 = arith.constant 0 : index
    %6 = vector.load %arg2[%c0_2, %c0_3] : memref<128x1xf32, #tpu.memory_space<vmem>>, vector<128x1xf32>
    tpu.vector_store %arg2[%c0_2, %c0_3], %5 {strides = array<i32>} : memref<128x1xf32, #tpu.memory_space<vmem>>, vector<128x1xf32>,
    return
  }
  func.func @transform_0(%arg0: i32) -> (i32, i32) {
    %c0_i32 = arith.constant 0 : i32
    %c0_i32_0 = arith.constant 0 : i32
    return %arg0, %c0_i32 : i32, i32
  }
  func.func @transform_1(%arg0: i32) -> (i32, i32) {
    %c0_i32 = arith.constant 0 : i32
    %c0_i32_0 = arith.constant 0 : i32
    return %arg0, %c0_i32 : i32, i32
  }
}

module attributes {stable_mosaic.version = 11 : i64} {
  func.func @_mm_kernel_single_k(%arg0: i32, %arg1: i32, %arg2: memref<16x16xbf16, #tpu.memory_space<vmem>>, %arg3: memref<16x128xbf16, #tpu.memory_space<vmem>>, %arg4: memref<16x1xf32, #tpu.memory_space<vmem>>, %arg5: memref<16x128xbf16, #tpu.memory_space<vmem>>) attributes {dimension_semantics = [#tpu.dimension_semantics<parallel>, #tpu.dimension_semantics<parallel>], iteration_bounds = array<i64: 1, 1>, scalar_prefetch = 0 : i64, scratch_operands = 0 : i64, tpu.core_type = #tpu.core_type<tc>, window_params = [{transform_indices = @transform_0, window_bounds = array<i64: 16, 16>}, {transform_indices = @transform_1, window_bounds = array<i64: 16, 128>}, {transform_indices = @transform_2, window_bounds = array<i64: 16, 1>}, {transform_indices = @transform_3, window_bounds = array<i64: 16, 128>}]} {
    %c0 = arith.constant 0 : index
    %c0_0 = arith.constant 0 : index
    %0 = vector.load %arg2[%c0, %c0_0] : memref<16x16xbf16, #tpu.memory_space<vmem>>, vector<16x16xbf16>
    %c0_1 = arith.constant 0 : index
    %c0_2 = arith.constant 0 : index
    %1 = vector.load %arg3[%c0_1, %c0_2] : memref<16x128xbf16, #tpu.memory_space<vmem>>, vector<16x128xbf16>
    %cst = arith.constant dense<0.000000e+00> : vector<16x128xf32>
    %2 = tpu.matmul %0, %1, %cst {dimension_numbers = #tpu.dot_dimension_numbers<[1], [0], [0], [1], [0, 0, 1, 1], [], []>} : vector<16x16xbf16>, vector<16x128xbf16>, vector<16x128xf32> -> vector<16x128xf32>
    %c0_3 = arith.constant 0 : index
    %c0_4 = arith.constant 0 : index
    %3 = vector.load %arg4[%c0_3, %c0_4] : memref<16x1xf32, #tpu.memory_space<vmem>>, vector<16x1xf32>
    %4 = vector.broadcast %3 : vector<16x1xf32> to vector<16x128xf32>
    %5 = arith.addf %2, %4 : vector<16x128xf32>
    %6 = arith.truncf %5 : vector<16x128xf32> to vector<16x128xbf16>
    %c0_5 = arith.constant 0 : index
    %c0_6 = arith.constant 0 : index
    %7 = vector.load %arg5[%c0_5, %c0_6] : memref<16x128xbf16, #tpu.memory_space<vmem>>, vector<16x128xbf16>
    tpu.vector_store %arg5[%c0_5, %c0_6], %6 {strides = array<i32>} : memref<16x128xbf16, #tpu.memory_space<vmem>>, vector<16x128xbf16>,
    return
  }
  func.func @transform_0(%arg0: i32, %arg1: i32) -> (i32, i32) {
    %c0_i32 = arith.constant 0 : i32
    %c0_i32_0 = arith.constant 0 : i32
    return %arg0, %c0_i32 : i32, i32
  }
  func.func @transform_1(%arg0: i32, %arg1: i32) -> (i32, i32) {
    %c0_i32 = arith.constant 0 : i32
    %c0_i32_0 = arith.constant 0 : i32
    return %c0_i32, %arg1 : i32, i32
  }
  func.func @transform_2(%arg0: i32, %arg1: i32) -> (i32, i32) {
    %c0_i32 = arith.constant 0 : i32
    %c0_i32_0 = arith.constant 0 : i32
    return %arg0, %c0_i32 : i32, i32
  }
  func.func @transform_3(%arg0: i32, %arg1: i32) -> (i32, i32) {
    %c0_i32 = arith.constant 0 : i32
    return %arg0, %arg1 : i32, i32
  }
}

module attributes {stable_mosaic.version = 11 : i64} {
  func.func @_mm_kernel_single_k(%arg0: i32, %arg1: i32, %arg2: memref<16x16xbf16, #tpu.memory_space<vmem>>, %arg3: memref<16x512xbf16, #tpu.memory_space<vmem>>, %arg4: memref<16x1xf32, #tpu.memory_space<vmem>>, %arg5: memref<16x512xbf16, #tpu.memory_space<vmem>>) attributes {dimension_semantics = [#tpu.dimension_semantics<parallel>, #tpu.dimension_semantics<parallel>], iteration_bounds = array<i64: 1, 1>, scalar_prefetch = 0 : i64, scratch_operands = 0 : i64, tpu.core_type = #tpu.core_type<tc>, window_params = [{transform_indices = @transform_0, window_bounds = array<i64: 16, 16>}, {transform_indices = @transform_1, window_bounds = array<i64: 16, 512>}, {transform_indices = @transform_2, window_bounds = array<i64: 16, 1>}, {transform_indices = @transform_3, window_bounds = array<i64: 16, 512>}]} {
    %c0 = arith.constant 0 : index
    %c0_0 = arith.constant 0 : index
    %0 = vector.load %arg2[%c0, %c0_0] : memref<16x16xbf16, #tpu.memory_space<vmem>>, vector<16x16xbf16>
    %c0_1 = arith.constant 0 : index
    %c0_2 = arith.constant 0 : index
    %1 = vector.load %arg3[%c0_1, %c0_2] : memref<16x512xbf16, #tpu.memory_space<vmem>>, vector<16x512xbf16>
    %cst = arith.constant dense<0.000000e+00> : vector<16x512xf32>
    %2 = tpu.matmul %0, %1, %cst {dimension_numbers = #tpu.dot_dimension_numbers<[1], [0], [0], [1], [0, 0, 1, 1], [], []>} : vector<16x16xbf16>, vector<16x512xbf16>, vector<16x512xf32> -> vector<16x512xf32>
    %c0_3 = arith.constant 0 : index
    %c0_4 = arith.constant 0 : index
    %3 = vector.load %arg4[%c0_3, %c0_4] : memref<16x1xf32, #tpu.memory_space<vmem>>, vector<16x1xf32>
    %4 = vector.broadcast %3 : vector<16x1xf32> to vector<16x512xf32>
    %5 = arith.addf %2, %4 : vector<16x512xf32>
    %6 = arith.truncf %5 : vector<16x512xf32> to vector<16x512xbf16>
    %c0_5 = arith.constant 0 : index
    %c0_6 = arith.constant 0 : index
    %7 = vector.load %arg5[%c0_5, %c0_6] : memref<16x512xbf16, #tpu.memory_space<vmem>>, vector<16x512xbf16>
    tpu.vector_store %arg5[%c0_5, %c0_6], %6 {strides = array<i32>} : memref<16x512xbf16, #tpu.memory_space<vmem>>, vector<16x512xbf16>,
    return
  }
  func.func @transform_0(%arg0: i32, %arg1: i32) -> (i32, i32) {
    %c0_i32 = arith.constant 0 : i32
    %c0_i32_0 = arith.constant 0 : i32
    return %arg0, %c0_i32 : i32, i32
  }
  func.func @transform_1(%arg0: i32, %arg1: i32) -> (i32, i32) {
    %c0_i32 = arith.constant 0 : i32
    %c0_i32_0 = arith.constant 0 : i32
    return %c0_i32, %arg1 : i32, i32
  }
  func.func @transform_2(%arg0: i32, %arg1: i32) -> (i32, i32) {
    %c0_i32 = arith.constant 0 : i32
    %c0_i32_0 = arith.constant 0 : i32
    return %arg0, %c0_i32 : i32, i32
  }
  func.func @transform_3(%arg0: i32, %arg1: i32) -> (i32, i32) {
    %c0_i32 = arith.constant 0 : i32
    return %arg0, %arg1 : i32, i32
  }
}

module attributes {stable_mosaic.version = 11 : i64} {
  func.func @_mm_kernel_single_k(%arg0: i32, %arg1: i32, %arg2: memref<16x32xbf16, #tpu.memory_space<vmem>>, %arg3: memref<32x128xbf16, #tpu.memory_space<vmem>>, %arg4: memref<16x1xf32, #tpu.memory_space<vmem>>, %arg5: memref<16x128xbf16, #tpu.memory_space<vmem>>) attributes {dimension_semantics = [#tpu.dimension_semantics<parallel>, #tpu.dimension_semantics<parallel>], iteration_bounds = array<i64: 1, 1>, scalar_prefetch = 0 : i64, scratch_operands = 0 : i64, tpu.core_type = #tpu.core_type<tc>, window_params = [{transform_indices = @transform_0, window_bounds = array<i64: 16, 32>}, {transform_indices = @transform_1, window_bounds = array<i64: 32, 128>}, {transform_indices = @transform_2, window_bounds = array<i64: 16, 1>}, {transform_indices = @transform_3, window_bounds = array<i64: 16, 128>}]} {
    %c0 = arith.constant 0 : index
    %c0_0 = arith.constant 0 : index
    %0 = vector.load %arg2[%c0, %c0_0] : memref<16x32xbf16, #tpu.memory_space<vmem>>, vector<16x32xbf16>
    %c0_1 = arith.constant 0 : index
    %c0_2 = arith.constant 0 : index
    %1 = vector.load %arg3[%c0_1, %c0_2] : memref<32x128xbf16, #tpu.memory_space<vmem>>, vector<32x128xbf16>
    %cst = arith.constant dense<0.000000e+00> : vector<16x128xf32>
    %2 = tpu.matmul %0, %1, %cst {dimension_numbers = #tpu.dot_dimension_numbers<[1], [0], [0], [1], [0, 0, 1, 1], [], []>} : vector<16x32xbf16>, vector<32x128xbf16>, vector<16x128xf32> -> vector<16x128xf32>
    %c0_3 = arith.constant 0 : index
    %c0_4 = arith.constant 0 : index
    %3 = vector.load %arg4[%c0_3, %c0_4] : memref<16x1xf32, #tpu.memory_space<vmem>>, vector<16x1xf32>
    %4 = vector.broadcast %3 : vector<16x1xf32> to vector<16x128xf32>
    %5 = arith.addf %2, %4 : vector<16x128xf32>
    %cst_5 = arith.constant 0.000000e+00 : f32
    %6 = vector.broadcast %cst_5 : f32 to vector<16x128xf32>
    %7 = arith.maximumf %5, %6 : vector<16x128xf32>
    %8 = arith.truncf %7 : vector<16x128xf32> to vector<16x128xbf16>
    %c0_6 = arith.constant 0 : index
    %c0_7 = arith.constant 0 : index
    %9 = vector.load %arg5[%c0_6, %c0_7] : memref<16x128xbf16, #tpu.memory_space<vmem>>, vector<16x128xbf16>
    tpu.vector_store %arg5[%c0_6, %c0_7], %8 {strides = array<i32>} : memref<16x128xbf16, #tpu.memory_space<vmem>>, vector<16x128xbf16>,
    return
  }
  func.func @transform_0(%arg0: i32, %arg1: i32) -> (i32, i32) {
    %c0_i32 = arith.constant 0 : i32
    %c0_i32_0 = arith.constant 0 : i32
    return %arg0, %c0_i32 : i32, i32
  }
  func.func @transform_1(%arg0: i32, %arg1: i32) -> (i32, i32) {
    %c0_i32 = arith.constant 0 : i32
    %c0_i32_0 = arith.constant 0 : i32
    return %c0_i32, %arg1 : i32, i32
  }
  func.func @transform_2(%arg0: i32, %arg1: i32) -> (i32, i32) {
    %c0_i32 = arith.constant 0 : i32
    %c0_i32_0 = arith.constant 0 : i32
    return %arg0, %c0_i32 : i32, i32
  }
  func.func @transform_3(%arg0: i32, %arg1: i32) -> (i32, i32) {
    %c0_i32 = arith.constant 0 : i32
    return %arg0, %arg1 : i32, i32
  }
}

module attributes {stable_mosaic.version = 11 : i64} {
  func.func @_mm_kernel_single_k(%arg0: i32, %arg1: i32, %arg2: memref<32x400xbf16, #tpu.memory_space<vmem>>, %arg3: memref<400x128xbf16, #tpu.memory_space<vmem>>, %arg4: memref<32x1xf32, #tpu.memory_space<vmem>>, %arg5: memref<32x128xbf16, #tpu.memory_space<vmem>>) attributes {dimension_semantics = [#tpu.dimension_semantics<parallel>, #tpu.dimension_semantics<parallel>], iteration_bounds = array<i64: 1, 1>, scalar_prefetch = 0 : i64, scratch_operands = 0 : i64, tpu.core_type = #tpu.core_type<tc>, window_params = [{transform_indices = @transform_0, window_bounds = array<i64: 32, 400>}, {transform_indices = @transform_1, window_bounds = array<i64: 400, 128>}, {transform_indices = @transform_2, window_bounds = array<i64: 32, 1>}, {transform_indices = @transform_3, window_bounds = array<i64: 32, 128>}]} {
    %c0 = arith.constant 0 : index
    %c0_0 = arith.constant 0 : index
    %0 = vector.load %arg2[%c0, %c0_0] : memref<32x400xbf16, #tpu.memory_space<vmem>>, vector<32x400xbf16>
    %c0_1 = arith.constant 0 : index
    %c0_2 = arith.constant 0 : index
    %1 = vector.load %arg3[%c0_1, %c0_2] : memref<400x128xbf16, #tpu.memory_space<vmem>>, vector<400x128xbf16>
    %cst = arith.constant dense<0.000000e+00> : vector<32x128xf32>
    %2 = tpu.matmul %0, %1, %cst {dimension_numbers = #tpu.dot_dimension_numbers<[1], [0], [0], [1], [0, 0, 1, 1], [], []>} : vector<32x400xbf16>, vector<400x128xbf16>, vector<32x128xf32> -> vector<32x128xf32>
    %c0_3 = arith.constant 0 : index
    %c0_4 = arith.constant 0 : index
    %3 = vector.load %arg4[%c0_3, %c0_4] : memref<32x1xf32, #tpu.memory_space<vmem>>, vector<32x1xf32>
    %4 = vector.broadcast %3 : vector<32x1xf32> to vector<32x128xf32>
    %5 = arith.addf %2, %4 : vector<32x128xf32>
    %cst_5 = arith.constant 0.000000e+00 : f32
    %6 = vector.broadcast %cst_5 : f32 to vector<32x128xf32>
    %7 = arith.maximumf %5, %6 : vector<32x128xf32>
    %8 = arith.truncf %7 : vector<32x128xf32> to vector<32x128xbf16>
    %c0_6 = arith.constant 0 : index
    %c0_7 = arith.constant 0 : index
    %9 = vector.load %arg5[%c0_6, %c0_7] : memref<32x128xbf16, #tpu.memory_space<vmem>>, vector<32x128xbf16>
    tpu.vector_store %arg5[%c0_6, %c0_7], %8 {strides = array<i32>} : memref<32x128xbf16, #tpu.memory_space<vmem>>, vector<32x128xbf16>,
    return
  }
  func.func @transform_0(%arg0: i32, %arg1: i32) -> (i32, i32) {
    %c0_i32 = arith.constant 0 : i32
    %c0_i32_0 = arith.constant 0 : i32
    return %arg0, %c0_i32 : i32, i32
  }
  func.func @transform_1(%arg0: i32, %arg1: i32) -> (i32, i32) {
    %c0_i32 = arith.constant 0 : i32
    %c0_i32_0 = arith.constant 0 : i32
    return %c0_i32, %arg1 : i32, i32
  }
  func.func @transform_2(%arg0: i32, %arg1: i32) -> (i32, i32) {
    %c0_i32 = arith.constant 0 : i32
    %c0_i32_0 = arith.constant 0 : i32
    return %arg0, %c0_i32 : i32, i32
  }
  func.func @transform_3(%arg0: i32, %arg1: i32) -> (i32, i32) {
    %c0_i32 = arith.constant 0 : i32
    return %arg0, %arg1 : i32, i32
  }
}

module attributes {stable_mosaic.version = 11 : i64} {
  func.func @_mm_kernel_single_k(%arg0: i32, %arg1: i32, %arg2: memref<32x288xbf16, #tpu.memory_space<vmem>>, %arg3: memref<288x128xbf16, #tpu.memory_space<vmem>>, %arg4: memref<32x1xf32, #tpu.memory_space<vmem>>, %arg5: memref<32x128xbf16, #tpu.memory_space<vmem>>) attributes {dimension_semantics = [#tpu.dimension_semantics<parallel>, #tpu.dimension_semantics<parallel>], iteration_bounds = array<i64: 1, 1>, scalar_prefetch = 0 : i64, scratch_operands = 0 : i64, tpu.core_type = #tpu.core_type<tc>, window_params = [{transform_indices = @transform_0, window_bounds = array<i64: 32, 288>}, {transform_indices = @transform_1, window_bounds = array<i64: 288, 128>}, {transform_indices = @transform_2, window_bounds = array<i64: 32, 1>}, {transform_indices = @transform_3, window_bounds = array<i64: 32, 128>}]} {
    %c0 = arith.constant 0 : index
    %c0_0 = arith.constant 0 : index
    %0 = vector.load %arg2[%c0, %c0_0] : memref<32x288xbf16, #tpu.memory_space<vmem>>, vector<32x288xbf16>
    %c0_1 = arith.constant 0 : index
    %c0_2 = arith.constant 0 : index
    %1 = vector.load %arg3[%c0_1, %c0_2] : memref<288x128xbf16, #tpu.memory_space<vmem>>, vector<288x128xbf16>
    %cst = arith.constant dense<0.000000e+00> : vector<32x128xf32>
    %2 = tpu.matmul %0, %1, %cst {dimension_numbers = #tpu.dot_dimension_numbers<[1], [0], [0], [1], [0, 0, 1, 1], [], []>} : vector<32x288xbf16>, vector<288x128xbf16>, vector<32x128xf32> -> vector<32x128xf32>
    %c0_3 = arith.constant 0 : index
    %c0_4 = arith.constant 0 : index
    %3 = vector.load %arg4[%c0_3, %c0_4] : memref<32x1xf32, #tpu.memory_space<vmem>>, vector<32x1xf32>
    %4 = vector.broadcast %3 : vector<32x1xf32> to vector<32x128xf32>
    %5 = arith.addf %2, %4 : vector<32x128xf32>
    %cst_5 = arith.constant 0.000000e+00 : f32
    %6 = vector.broadcast %cst_5 : f32 to vector<32x128xf32>
    %7 = arith.maximumf %5, %6 : vector<32x128xf32>
    %8 = arith.truncf %7 : vector<32x128xf32> to vector<32x128xbf16>
    %c0_6 = arith.constant 0 : index
    %c0_7 = arith.constant 0 : index
    %9 = vector.load %arg5[%c0_6, %c0_7] : memref<32x128xbf16, #tpu.memory_space<vmem>>, vector<32x128xbf16>
    tpu.vector_store %arg5[%c0_6, %c0_7], %8 {strides = array<i32>} : memref<32x128xbf16, #tpu.memory_space<vmem>>, vector<32x128xbf16>,
    return
  }
  func.func @transform_0(%arg0: i32, %arg1: i32) -> (i32, i32) {
    %c0_i32 = arith.constant 0 : i32
    %c0_i32_0 = arith.constant 0 : i32
    return %arg0, %c0_i32 : i32, i32
  }
  func.func @transform_1(%arg0: i32, %arg1: i32) -> (i32, i32) {
    %c0_i32 = arith.constant 0 : i32
    %c0_i32_0 = arith.constant 0 : i32
    return %c0_i32, %arg1 : i32, i32
  }
  func.func @transform_2(%arg0: i32, %arg1: i32) -> (i32, i32) {
    %c0_i32 = arith.constant 0 : i32
    %c0_i32_0 = arith.constant 0 : i32
    return %arg0, %c0_i32 : i32, i32
  }
  func.func @transform_3(%arg0: i32, %arg1: i32) -> (i32, i32) {
    %c0_i32 = arith.constant 0 : i32
    return %arg0, %arg1 : i32, i32
  }
}

module attributes {stable_mosaic.version = 11 : i64} {
  func.func @_mm_kernel_single_k(%arg0: i32, %arg1: i32, %arg2: memref<16x32xbf16, #tpu.memory_space<vmem>>, %arg3: memref<32x128xbf16, #tpu.memory_space<vmem>>, %arg4: memref<16x1xf32, #tpu.memory_space<vmem>>, %arg5: memref<16x128xf32, #tpu.memory_space<vmem>>) attributes {dimension_semantics = [#tpu.dimension_semantics<parallel>, #tpu.dimension_semantics<parallel>], iteration_bounds = array<i64: 1, 1>, scalar_prefetch = 0 : i64, scratch_operands = 0 : i64, tpu.core_type = #tpu.core_type<tc>, window_params = [{transform_indices = @transform_0, window_bounds = array<i64: 16, 32>}, {transform_indices = @transform_1, window_bounds = array<i64: 32, 128>}, {transform_indices = @transform_2, window_bounds = array<i64: 16, 1>}, {transform_indices = @transform_3, window_bounds = array<i64: 16, 128>}]} {
    %c0 = arith.constant 0 : index
    %c0_0 = arith.constant 0 : index
    %0 = vector.load %arg2[%c0, %c0_0] : memref<16x32xbf16, #tpu.memory_space<vmem>>, vector<16x32xbf16>
    %c0_1 = arith.constant 0 : index
    %c0_2 = arith.constant 0 : index
    %1 = vector.load %arg3[%c0_1, %c0_2] : memref<32x128xbf16, #tpu.memory_space<vmem>>, vector<32x128xbf16>
    %cst = arith.constant dense<0.000000e+00> : vector<16x128xf32>
    %2 = tpu.matmul %0, %1, %cst {dimension_numbers = #tpu.dot_dimension_numbers<[1], [0], [0], [1], [0, 0, 1, 1], [], []>} : vector<16x32xbf16>, vector<32x128xbf16>, vector<16x128xf32> -> vector<16x128xf32>
    %c0_3 = arith.constant 0 : index
    %c0_4 = arith.constant 0 : index
    %3 = vector.load %arg4[%c0_3, %c0_4] : memref<16x1xf32, #tpu.memory_space<vmem>>, vector<16x1xf32>
    %4 = vector.broadcast %3 : vector<16x1xf32> to vector<16x128xf32>
    %5 = arith.addf %2, %4 : vector<16x128xf32>
    %c0_5 = arith.constant 0 : index
    %c0_6 = arith.constant 0 : index
    %6 = vector.load %arg5[%c0_5, %c0_6] : memref<16x128xf32, #tpu.memory_space<vmem>>, vector<16x128xf32>
    tpu.vector_store %arg5[%c0_5, %c0_6], %5 {strides = array<i32>} : memref<16x128xf32, #tpu.memory_space<vmem>>, vector<16x128xf32>,
    return
  }
  func.func @transform_0(%arg0: i32, %arg1: i32) -> (i32, i32) {
    %c0_i32 = arith.constant 0 : i32
    %c0_i32_0 = arith.constant 0 : i32
    return %arg0, %c0_i32 : i32, i32
  }
  func.func @transform_1(%arg0: i32, %arg1: i32) -> (i32, i32) {
    %c0_i32 = arith.constant 0 : i32
    %c0_i32_0 = arith.constant 0 : i32
    return %c0_i32, %arg1 : i32, i32
  }
  func.func @transform_2(%arg0: i32, %arg1: i32) -> (i32, i32) {
    %c0_i32 = arith.constant 0 : i32
    %c0_i32_0 = arith.constant 0 : i32
    return %arg0, %c0_i32 : i32, i32
  }
  func.func @transform_3(%arg0: i32, %arg1: i32) -> (i32, i32) {
    %c0_i32 = arith.constant 0 : i32
    return %arg0, %arg1 : i32, i32
  }
}

module attributes {stable_mosaic.version = 11 : i64} {
  func.func @_mm_kernel_single_k(%arg0: i32, %arg1: i32, %arg2: memref<32x16xbf16, #tpu.memory_space<vmem>>, %arg3: memref<16x128xbf16, #tpu.memory_space<vmem>>, %arg4: memref<32x1xf32, #tpu.memory_space<vmem>>, %arg5: memref<32x128xf32, #tpu.memory_space<vmem>>) attributes {dimension_semantics = [#tpu.dimension_semantics<parallel>, #tpu.dimension_semantics<parallel>], iteration_bounds = array<i64: 1, 1>, scalar_prefetch = 0 : i64, scratch_operands = 0 : i64, tpu.core_type = #tpu.core_type<tc>, window_params = [{transform_indices = @transform_0, window_bounds = array<i64: 32, 16>}, {transform_indices = @transform_1, window_bounds = array<i64: 16, 128>}, {transform_indices = @transform_2, window_bounds = array<i64: 32, 1>}, {transform_indices = @transform_3, window_bounds = array<i64: 32, 128>}]} {
    %c0 = arith.constant 0 : index
    %c0_0 = arith.constant 0 : index
    %0 = vector.load %arg2[%c0, %c0_0] : memref<32x16xbf16, #tpu.memory_space<vmem>>, vector<32x16xbf16>
    %c0_1 = arith.constant 0 : index
    %c0_2 = arith.constant 0 : index
    %1 = vector.load %arg3[%c0_1, %c0_2] : memref<16x128xbf16, #tpu.memory_space<vmem>>, vector<16x128xbf16>
    %cst = arith.constant dense<0.000000e+00> : vector<32x128xf32>
    %2 = tpu.matmul %0, %1, %cst {dimension_numbers = #tpu.dot_dimension_numbers<[1], [0], [0], [1], [0, 0, 1, 1], [], []>} : vector<32x16xbf16>, vector<16x128xbf16>, vector<32x128xf32> -> vector<32x128xf32>
    %c0_3 = arith.constant 0 : index
    %c0_4 = arith.constant 0 : index
    %3 = vector.load %arg4[%c0_3, %c0_4] : memref<32x1xf32, #tpu.memory_space<vmem>>, vector<32x1xf32>
    %4 = vector.broadcast %3 : vector<32x1xf32> to vector<32x128xf32>
    %5 = arith.addf %2, %4 : vector<32x128xf32>
    %c0_5 = arith.constant 0 : index
    %c0_6 = arith.constant 0 : index
    %6 = vector.load %arg5[%c0_5, %c0_6] : memref<32x128xf32, #tpu.memory_space<vmem>>, vector<32x128xf32>
    tpu.vector_store %arg5[%c0_5, %c0_6], %5 {strides = array<i32>} : memref<32x128xf32, #tpu.memory_space<vmem>>, vector<32x128xf32>,
    return
  }
  func.func @transform_0(%arg0: i32, %arg1: i32) -> (i32, i32) {
    %c0_i32 = arith.constant 0 : i32
    %c0_i32_0 = arith.constant 0 : i32
    return %arg0, %c0_i32 : i32, i32
  }
  func.func @transform_1(%arg0: i32, %arg1: i32) -> (i32, i32) {
    %c0_i32 = arith.constant 0 : i32
    %c0_i32_0 = arith.constant 0 : i32
    return %c0_i32, %arg1 : i32, i32
  }
  func.func @transform_2(%arg0: i32, %arg1: i32) -> (i32, i32) {
    %c0_i32 = arith.constant 0 : i32
    %c0_i32_0 = arith.constant 0 : i32
    return %arg0, %c0_i32 : i32, i32
  }
  func.func @transform_3(%arg0: i32, %arg1: i32) -> (i32, i32) {
    %c0_i32 = arith.constant 0 : i32
    return %arg0, %arg1 : i32, i32
  }
}

module attributes {stable_mosaic.version = 11 : i64} {
  func.func @_mm_kernel_single_k(%arg0: i32, %arg1: i32, %arg2: memref<32x16xbf16, #tpu.memory_space<vmem>>, %arg3: memref<16x384xbf16, #tpu.memory_space<vmem>>, %arg4: memref<32x1xf32, #tpu.memory_space<vmem>>, %arg5: memref<32x384xf32, #tpu.memory_space<vmem>>) attributes {dimension_semantics = [#tpu.dimension_semantics<parallel>, #tpu.dimension_semantics<parallel>], iteration_bounds = array<i64: 1, 1>, scalar_prefetch = 0 : i64, scratch_operands = 0 : i64, tpu.core_type = #tpu.core_type<tc>, window_params = [{transform_indices = @transform_0, window_bounds = array<i64: 32, 16>}, {transform_indices = @transform_1, window_bounds = array<i64: 16, 384>}, {transform_indices = @transform_2, window_bounds = array<i64: 32, 1>}, {transform_indices = @transform_3, window_bounds = array<i64: 32, 384>}]} {
    %c0 = arith.constant 0 : index
    %c0_0 = arith.constant 0 : index
    %0 = vector.load %arg2[%c0, %c0_0] : memref<32x16xbf16, #tpu.memory_space<vmem>>, vector<32x16xbf16>
    %c0_1 = arith.constant 0 : index
    %c0_2 = arith.constant 0 : index
    %1 = vector.load %arg3[%c0_1, %c0_2] : memref<16x384xbf16, #tpu.memory_space<vmem>>, vector<16x384xbf16>
    %cst = arith.constant dense<0.000000e+00> : vector<32x384xf32>
    %2 = tpu.matmul %0, %1, %cst {dimension_numbers = #tpu.dot_dimension_numbers<[1], [0], [0], [1], [0, 0, 1, 1], [], []>} : vector<32x16xbf16>, vector<16x384xbf16>, vector<32x384xf32> -> vector<32x384xf32>
    %c0_3 = arith.constant 0 : index
    %c0_4 = arith.constant 0 : index
    %3 = vector.load %arg4[%c0_3, %c0_4] : memref<32x1xf32, #tpu.memory_space<vmem>>, vector<32x1xf32>
    %4 = vector.broadcast %3 : vector<32x1xf32> to vector<32x384xf32>
    %5 = arith.addf %2, %4 : vector<32x384xf32>
    %c0_5 = arith.constant 0 : index
    %c0_6 = arith.constant 0 : index
    %6 = vector.load %arg5[%c0_5, %c0_6] : memref<32x384xf32, #tpu.memory_space<vmem>>, vector<32x384xf32>
    tpu.vector_store %arg5[%c0_5, %c0_6], %5 {strides = array<i32>} : memref<32x384xf32, #tpu.memory_space<vmem>>, vector<32x384xf32>,
    return
  }
  func.func @transform_0(%arg0: i32, %arg1: i32) -> (i32, i32) {
    %c0_i32 = arith.constant 0 : i32
    %c0_i32_0 = arith.constant 0 : i32
    return %arg0, %c0_i32 : i32, i32
  }
  func.func @transform_1(%arg0: i32, %arg1: i32) -> (i32, i32) {
    %c0_i32 = arith.constant 0 : i32
    %c0_i32_0 = arith.constant 0 : i32
    return %c0_i32, %arg1 : i32, i32
  }
  func.func @transform_2(%arg0: i32, %arg1: i32) -> (i32, i32) {
    %c0_i32 = arith.constant 0 : i32
    %c0_i32_0 = arith.constant 0 : i32
    return %arg0, %c0_i32 : i32, i32
  }
  func.func @transform_3(%arg0: i32, %arg1: i32) -> (i32, i32) {
    %c0_i32 = arith.constant 0 : i32
    return %arg0, %arg1 : i32, i32
  }
}

module attributes {stable_mosaic.version = 11 : i64} {
  func.func @_loss_kernel(%arg0: i32, %arg1: memref<8x2048xf32, #tpu.memory_space<vmem>>, %arg2: memref<1x2048xi32, #tpu.memory_space<vmem>>, %arg3: memref<4xf32, #tpu.memory_space<smem>>, %arg4: memref<1x1xf32, #tpu.memory_space<vmem>>, %arg5: memref<1x1xf32, #tpu.memory_space<vmem>>, %arg6: memref<1x1xf32, #tpu.memory_space<vmem>>, %arg7: memref<8x1xf32, #tpu.memory_space<vmem>>, %arg8: memref<8x1xf32, #tpu.memory_space<vmem>>) attributes {dimension_semantics = [#tpu.dimension_semantics<arbitrary>], iteration_bounds = array<i64: 1>, scalar_prefetch = 0 : i64, scratch_operands = 5 : i64, tpu.core_type = #tpu.core_type<tc>, window_params = [{transform_indices = @transform_0, window_bounds = array<i64: 8, 2048>}, {transform_indices = @transform_1, window_bounds = array<i64: 1, 2048>}, {transform_indices = @transform_2, window_bounds = array<i64: 4>}]} {
    %c0_i32 = arith.constant 0 : i32
    %0 = arith.cmpi eq, %arg0, %c0_i32 : i32
    %1 = arith.extui %0 : i1 to i32
    %c0_i32_0 = arith.constant 0 : i32
    %2 = arith.cmpi ne, %1, %c0_i32_0 : i32
    scf.if %2 {
      %cst_39 = arith.constant 0.000000e+00 : f32
      %83 = vector.broadcast %cst_39 : f32 to vector<1x1xf32>
      %c0_40 = arith.constant 0 : index
      %c0_41 = arith.constant 0 : index
      %84 = vector.load %arg4[%c0_40, %c0_41] : memref<1x1xf32, #tpu.memory_space<vmem>>, vector<1x1xf32>
      tpu.vector_store %arg4[%c0_40, %c0_41], %83 {strides = array<i32>} : memref<1x1xf32, #tpu.memory_space<vmem>>, vector<1x1xf32>,
      %cst_42 = arith.constant 0.000000e+00 : f32
      %85 = vector.broadcast %cst_42 : f32 to vector<1x1xf32>
      %c0_43 = arith.constant 0 : index
      %c0_44 = arith.constant 0 : index
      %86 = vector.load %arg5[%c0_43, %c0_44] : memref<1x1xf32, #tpu.memory_space<vmem>>, vector<1x1xf32>
      tpu.vector_store %arg5[%c0_43, %c0_44], %85 {strides = array<i32>} : memref<1x1xf32, #tpu.memory_space<vmem>>, vector<1x1xf32>,
      %cst_45 = arith.constant 0.000000e+00 : f32
      %87 = vector.broadcast %cst_45 : f32 to vector<1x1xf32>
      %c0_46 = arith.constant 0 : index
      %c0_47 = arith.constant 0 : index
      %88 = vector.load %arg6[%c0_46, %c0_47] : memref<1x1xf32, #tpu.memory_space<vmem>>, vector<1x1xf32>
      tpu.vector_store %arg6[%c0_46, %c0_47], %87 {strides = array<i32>} : memref<1x1xf32, #tpu.memory_space<vmem>>, vector<1x1xf32>,
      %cst_48 = arith.constant 0.000000e+00 : f32
      %89 = vector.broadcast %cst_48 : f32 to vector<8x1xf32>
      %c0_49 = arith.constant 0 : index
      %c0_50 = arith.constant 0 : index
      %90 = vector.load %arg7[%c0_49, %c0_50] : memref<8x1xf32, #tpu.memory_space<vmem>>, vector<8x1xf32>
      tpu.vector_store %arg7[%c0_49, %c0_50], %89 {strides = array<i32>} : memref<8x1xf32, #tpu.memory_space<vmem>>, vector<8x1xf32>,
      %cst_51 = arith.constant 0.000000e+00 : f32
      %91 = vector.broadcast %cst_51 : f32 to vector<8x1xf32>
      %c0_52 = arith.constant 0 : index
      %c0_53 = arith.constant 0 : index
      %92 = vector.load %arg8[%c0_52, %c0_53] : memref<8x1xf32, #tpu.memory_space<vmem>>, vector<8x1xf32>
      tpu.vector_store %arg8[%c0_52, %c0_53], %91 {strides = array<i32>} : memref<8x1xf32, #tpu.memory_space<vmem>>, vector<8x1xf32>,
    } else {
    }
    %c0 = arith.constant 0 : index
    %c0_1 = arith.constant 0 : index
    %3 = vector.load %arg1[%c0, %c0_1] : memref<8x2048xf32, #tpu.memory_space<vmem>>, vector<8x2048xf32>
    %c0_2 = arith.constant 0 : index
    %c0_3 = arith.constant 0 : index
    %4 = vector.load %arg2[%c0_2, %c0_3] : memref<1x2048xi32, #tpu.memory_space<vmem>>, vector<1x2048xi32>
    %5 = tpu.iota {dimensions = array<i32: 0>} : vector<8x2048xi32>
    %c5_i32 = arith.constant 5 : i32
    %6 = vector.broadcast %c5_i32 : i32 to vector<8x2048xi32>
    %7 = arith.cmpi slt, %5, %6 : vector<8x2048xi32>
    %c255_i32 = arith.constant 255 : i32
    %8 = vector.broadcast %c255_i32 : i32 to vector<1x2048xi32>
    %9 = arith.cmpi ne, %4, %8 : vector<1x2048xi32>
    %c5_i32_4 = arith.constant 5 : i32
    %10 = vector.broadcast %c5_i32_4 : i32 to vector<1x2048xi32>
    %11 = arith.cmpi slt, %4, %10 : vector<1x2048xi32>
    %12 = arith.andi %9, %11 : vector<1x2048xi1>
    %13 = arith.extui %12 : vector<1x2048xi1> to vector<1x2048xi32>
    %14 = arith.sitofp %13 : vector<1x2048xi32> to vector<1x2048xf32>
    %15 = vector.broadcast %4 : vector<1x2048xi32> to vector<8x2048xi32>
    %16 = arith.cmpi eq, %5, %15 : vector<8x2048xi32>
    %17 = arith.extui %16 : vector<8x2048xi1> to vector<8x2048xi32>
    %18 = arith.sitofp %17 : vector<8x2048xi32> to vector<8x2048xf32>
    %19 = vector.broadcast %14 : vector<1x2048xf32> to vector<8x2048xf32>
    %20 = arith.mulf %18, %19 : vector<8x2048xf32>
    %cst = arith.constant -1.000000e+30 : f32
    %21 = vector.broadcast %cst : f32 to vector<8x2048xf32>
    %22 = arith.select %7, %3, %21 : vector<8x2048xi1>, vector<8x2048xf32>
    %cst_5 = arith.constant dense<0xFF800000> : vector<2048xf32>
    %23 = vector.multi_reduction <maximumf>, %22, %cst_5 [0] : vector<8x2048xf32> to vector<2048xf32>
    %24 = vector.shape_cast %23 : vector<2048xf32> to vector<1x2048xf32>
    %25 = vector.broadcast %24 : vector<1x2048xf32> to vector<8x2048xf32>
    %26 = arith.subf %22, %25 : vector<8x2048xf32>
    %27 = math.exp %26 : vector<8x2048xf32>
    %cst_6 = arith.constant dense<0.000000e+00> : vector<2048xf32>
    %28 = vector.multi_reduction <add>, %27, %cst_6 [0] : vector<8x2048xf32> to vector<2048xf32>
    %29 = vector.shape_cast %28 : vector<2048xf32> to vector<1x2048xf32>
    %30 = vector.broadcast %29 : vector<1x2048xf32> to vector<8x2048xf32>
    %31 = arith.divf %27, %30 : vector<8x2048xf32>
    %32 = math.log %29 : vector<1x2048xf32>
    %33 = vector.broadcast %32 : vector<1x2048xf32> to vector<8x2048xf32>
    %34 = arith.subf %26, %33 : vector<8x2048xf32>
    %35 = arith.mulf %31, %20 : vector<8x2048xf32>
    %cst_7 = arith.constant dense<0.000000e+00> : vector<2048xf32>
    %36 = vector.multi_reduction <add>, %35, %cst_7 [0] : vector<8x2048xf32> to vector<2048xf32>
    %37 = vector.shape_cast %36 : vector<2048xf32> to vector<1x2048xf32>
    %38 = arith.mulf %34, %20 : vector<8x2048xf32>
    %cst_8 = arith.constant dense<0.000000e+00> : vector<2048xf32>
    %39 = vector.multi_reduction <add>, %38, %cst_8 [0] : vector<8x2048xf32> to vector<2048xf32>
    %40 = vector.shape_cast %39 : vector<2048xf32> to vector<1x2048xf32>
    %c0_9 = arith.constant 0 : index
    %c0_10 = arith.constant 0 : index
    %41 = vector.load %arg4[%c0_9, %c0_10] : memref<1x1xf32, #tpu.memory_space<vmem>>, vector<1x1xf32>
    %cst_11 = arith.constant 0.000000e+00 : f32
    %42 = vector.broadcast %cst_11 : f32 to vector<1x2048xf32>
    %43 = arith.subf %42, %40 : vector<1x2048xf32>
    %44 = arith.mulf %43, %14 : vector<1x2048xf32>
    %cst_12 = arith.constant dense<0.000000e+00> : vector<1xf32>
    %45 = vector.multi_reduction <add>, %44, %cst_12 [1] : vector<1x2048xf32> to vector<1xf32>
    %46 = vector.shape_cast %45 : vector<1xf32> to vector<1x1xf32>
    %47 = arith.addf %41, %46 : vector<1x1xf32>
    %c0_13 = arith.constant 0 : index
    %c0_14 = arith.constant 0 : index
    %48 = vector.load %arg4[%c0_13, %c0_14] : memref<1x1xf32, #tpu.memory_space<vmem>>, vector<1x1xf32>
    tpu.vector_store %arg4[%c0_13, %c0_14], %47 {strides = array<i32>} : memref<1x1xf32, #tpu.memory_space<vmem>>, vector<1x1xf32>,
    %cst_15 = arith.constant 1.000000e+00 : f32
    %49 = vector.broadcast %cst_15 : f32 to vector<1x2048xf32>
    %50 = arith.subf %49, %37 : vector<1x2048xf32>
    %c0_16 = arith.constant 0 : index
    %c0_17 = arith.constant 0 : index
    %51 = vector.load %arg5[%c0_16, %c0_17] : memref<1x1xf32, #tpu.memory_space<vmem>>, vector<1x1xf32>
    %52 = arith.mulf %50, %50 : vector<1x2048xf32>
    %cst_18 = arith.constant 0.000000e+00 : f32
    %53 = vector.broadcast %cst_18 : f32 to vector<1x2048xf32>
    %54 = arith.subf %53, %40 : vector<1x2048xf32>
    %55 = arith.mulf %52, %54 : vector<1x2048xf32>
    %56 = arith.mulf %55, %14 : vector<1x2048xf32>
    %cst_19 = arith.constant dense<0.000000e+00> : vector<1xf32>
    %57 = vector.multi_reduction <add>, %56, %cst_19 [1] : vector<1x2048xf32> to vector<1xf32>
    %58 = vector.shape_cast %57 : vector<1xf32> to vector<1x1xf32>
    %59 = arith.addf %51, %58 : vector<1x1xf32>
    %c0_20 = arith.constant 0 : index
    %c0_21 = arith.constant 0 : index
    %60 = vector.load %arg5[%c0_20, %c0_21] : memref<1x1xf32, #tpu.memory_space<vmem>>, vector<1x1xf32>
    tpu.vector_store %arg5[%c0_20, %c0_21], %59 {strides = array<i32>} : memref<1x1xf32, #tpu.memory_space<vmem>>, vector<1x1xf32>,
    %c0_22 = arith.constant 0 : index
    %c0_23 = arith.constant 0 : index
    %61 = vector.load %arg6[%c0_22, %c0_23] : memref<1x1xf32, #tpu.memory_space<vmem>>, vector<1x1xf32>
    %cst_24 = arith.constant dense<0.000000e+00> : vector<1xf32>
    %62 = vector.multi_reduction <add>, %14, %cst_24 [1] : vector<1x2048xf32> to vector<1xf32>
    %63 = vector.shape_cast %62 : vector<1xf32> to vector<1x1xf32>
    %64 = arith.addf %61, %63 : vector<1x1xf32>
    %c0_25 = arith.constant 0 : index
    %c0_26 = arith.constant 0 : index
    %65 = vector.load %arg6[%c0_25, %c0_26] : memref<1x1xf32, #tpu.memory_space<vmem>>, vector<1x1xf32>
    tpu.vector_store %arg6[%c0_25, %c0_26], %64 {strides = array<i32>} : memref<1x1xf32, #tpu.memory_space<vmem>>, vector<1x1xf32>,
    %66 = vector.broadcast %14 : vector<1x2048xf32> to vector<8x2048xf32>
    %67 = arith.mulf %31, %66 : vector<8x2048xf32>
    %c0_27 = arith.constant 0 : index
    %c0_28 = arith.constant 0 : index
    %68 = vector.load %arg7[%c0_27, %c0_28] : memref<8x1xf32, #tpu.memory_space<vmem>>, vector<8x1xf32>
    %69 = arith.mulf %67, %20 : vector<8x2048xf32>
    %cst_29 = arith.constant dense<0.000000e+00> : vector<8xf32>
    %70 = vector.multi_reduction <add>, %69, %cst_29 [1] : vector<8x2048xf32> to vector<8xf32>
    %71 = vector.shape_cast %70 : vector<8xf32> to vector<8x1xf32>
    %72 = arith.addf %68, %71 : vector<8x1xf32>
    %c0_30 = arith.constant 0 : index
    %c0_31 = arith.constant 0 : index
    %73 = vector.load %arg7[%c0_30, %c0_31] : memref<8x1xf32, #tpu.memory_space<vmem>>, vector<8x1xf32>
    tpu.vector_store %arg7[%c0_30, %c0_31], %72 {strides = array<i32>} : memref<8x1xf32, #tpu.memory_space<vmem>>, vector<8x1xf32>,
    %c0_32 = arith.constant 0 : index
    %c0_33 = arith.constant 0 : index
    %74 = vector.load %arg8[%c0_32, %c0_33] : memref<8x1xf32, #tpu.memory_space<vmem>>, vector<8x1xf32>
    %75 = arith.addf %67, %20 : vector<8x2048xf32>
    %cst_34 = arith.constant dense<0.000000e+00> : vector<8xf32>
    %76 = vector.multi_reduction <add>, %75, %cst_34 [1] : vector<8x2048xf32> to vector<8xf32>
    %77 = vector.shape_cast %76 : vector<8xf32> to vector<8x1xf32>
    %78 = arith.addf %74, %77 : vector<8x1xf32>
    %c0_35 = arith.constant 0 : index
    %c0_36 = arith.constant 0 : index
    %79 = vector.load %arg8[%c0_35, %c0_36] : memref<8x1xf32, #tpu.memory_space<vmem>>, vector<8x1xf32>
    tpu.vector_store %arg8[%c0_35, %c0_36], %78 {strides = array<i32>} : memref<8x1xf32, #tpu.memory_space<vmem>>, vector<8x1xf32>,
    %c0_i32_37 = arith.constant 0 : i32
    %80 = arith.cmpi eq, %arg0, %c0_i32_37 : i32
    %81 = arith.extui %80 : i1 to i32
    %c0_i32_38 = arith.constant 0 : i32
    %82 = arith.cmpi ne, %81, %c0_i32_38 : i32
    scf.if %82 {
      %c0_39 = arith.constant 0 : index
      %c0_40 = arith.constant 0 : index
      %83 = vector.load %arg6[%c0_39, %c0_40] : memref<1x1xf32, #tpu.memory_space<vmem>>, vector<1x1xf32>
      %cst_41 = arith.constant 1.000000e+00 : f32
      %84 = vector.broadcast %cst_41 : f32 to vector<1x1xf32>
      %85 = arith.maximumf %83, %84 : vector<1x1xf32>
      %c0_42 = arith.constant 0 : index
      %c0_43 = arith.constant 0 : index
      %86 = vector.load %arg4[%c0_42, %c0_43] : memref<1x1xf32, #tpu.memory_space<vmem>>, vector<1x1xf32>
      %87 = arith.divf %86, %85 : vector<1x1xf32>
      %c0_44 = arith.constant 0 : index
      %c0_45 = arith.constant 0 : index
      %88 = vector.load %arg5[%c0_44, %c0_45] : memref<1x1xf32, #tpu.memory_space<vmem>>, vector<1x1xf32>
      %89 = arith.divf %88, %85 : vector<1x1xf32>
      %c0_46 = arith.constant 0 : index
      %c0_47 = arith.constant 0 : index
      %90 = vector.load %arg7[%c0_46, %c0_47] : memref<8x1xf32, #tpu.memory_space<vmem>>, vector<8x1xf32>
      %cst_48 = arith.constant 2.000000e+00 : f32
      %91 = vector.broadcast %cst_48 : f32 to vector<8x1xf32>
      %92 = arith.mulf %91, %90 : vector<8x1xf32>
      %cst_49 = arith.constant 1.000000e-07 : f32
      %93 = vector.broadcast %cst_49 : f32 to vector<8x1xf32>
      %94 = arith.addf %92, %93 : vector<8x1xf32>
      %c0_50 = arith.constant 0 : index
      %c0_51 = arith.constant 0 : index
      %95 = vector.load %arg8[%c0_50, %c0_51] : memref<8x1xf32, #tpu.memory_space<vmem>>, vector<8x1xf32>
      %cst_52 = arith.constant 1.000000e-07 : f32
      %96 = vector.broadcast %cst_52 : f32 to vector<8x1xf32>
      %97 = arith.addf %95, %96 : vector<8x1xf32>
      %98 = arith.divf %94, %97 : vector<8x1xf32>
      %99 = tpu.iota {dimensions = array<i32: 0>} : vector<8x1xi32>
      %c5_i32_53 = arith.constant 5 : i32
      %100 = vector.broadcast %c5_i32_53 : i32 to vector<8x1xi32>
      %101 = arith.cmpi slt, %99, %100 : vector<8x1xi32>
      %cst_54 = arith.constant 1.000000e+00 : f32
      %102 = vector.broadcast %cst_54 : f32 to vector<8x1xf32>
      %103 = arith.subf %102, %98 : vector<8x1xf32>
      %cst_55 = arith.constant 0.000000e+00 : f32
      %104 = vector.broadcast %cst_55 : f32 to vector<8x1xf32>
      %105 = arith.select %101, %103, %104 : vector<8x1xi1>, vector<8x1xf32>
      %cst_56 = arith.constant dense<0.000000e+00> : vector<1xf32>
      %106 = vector.multi_reduction <add>, %105, %cst_56 [0] : vector<8x1xf32> to vector<1xf32>
      %107 = vector.shape_cast %106 : vector<1xf32> to vector<1x1xf32>
      %cst_57 = arith.constant 5.000000e+00 : f32
      %108 = vector.broadcast %cst_57 : f32 to vector<1x1xf32>
      %109 = arith.divf %107, %108 : vector<1x1xf32>
      %cst_58 = arith.constant 5.000000e-01 : f32
      %110 = vector.broadcast %cst_58 : f32 to vector<1x1xf32>
      %111 = arith.mulf %110, %87 : vector<1x1xf32>
      %cst_59 = arith.constant 3.000000e-01 : f32
      %112 = vector.broadcast %cst_59 : f32 to vector<1x1xf32>
      %113 = arith.mulf %112, %109 : vector<1x1xf32>
      %114 = arith.addf %111, %113 : vector<1x1xf32>
      %cst_60 = arith.constant 2.000000e-01 : f32
      %115 = vector.broadcast %cst_60 : f32 to vector<1x1xf32>
      %116 = arith.mulf %115, %89 : vector<1x1xf32>
      %117 = arith.addf %114, %116 : vector<1x1xf32>
      %118 = vector.extract %117[0, 0] : f32 from vector<1x1xf32>
      %c0_61 = arith.constant 0 : index
      %119 = memref.load %arg3[%c0_61] : memref<4xf32, #tpu.memory_space<smem>>
      memref.store %118, %arg3[%c0_61] : memref<4xf32, #tpu.memory_space<smem>>
      %120 = vector.extract %87[0, 0] : f32 from vector<1x1xf32>
      %c1 = arith.constant 1 : index
      %121 = memref.load %arg3[%c1] : memref<4xf32, #tpu.memory_space<smem>>
      memref.store %120, %arg3[%c1] : memref<4xf32, #tpu.memory_space<smem>>
      %122 = vector.extract %109[0, 0] : f32 from vector<1x1xf32>
      %c2 = arith.constant 2 : index
      %123 = memref.load %arg3[%c2] : memref<4xf32, #tpu.memory_space<smem>>
      memref.store %122, %arg3[%c2] : memref<4xf32, #tpu.memory_space<smem>>
      %124 = vector.extract %89[0, 0] : f32 from vector<1x1xf32>
      %c3 = arith.constant 3 : index
      %125 = memref.load %arg3[%c3] : memref<4xf32, #tpu.memory_space<smem>>
      memref.store %124, %arg3[%c3] : memref<4xf32, #tpu.memory_space<smem>>
    } else {
    }
    return
  }
  func.func @transform_0(%arg0: i32) -> (i32, i32) {
    %c0_i32 = arith.constant 0 : i32
    %c0_i32_0 = arith.constant 0 : i32
    return %c0_i32, %arg0 : i32, i32
  }
  func.func @transform_1(%arg0: i32) -> (i32, i32) {
    %c0_i32 = arith.constant 0 : i32
    %c0_i32_0 = arith.constant 0 : i32
    return %c0_i32, %arg0 : i32, i32
  }
  func.func @transform_2(%arg0: i32) -> i32 {
    %c0_i32 = arith.constant 0 : i32
    %c0_i32_0 = arith.constant 0 : i32
    return %c0_i32 : i32
  }
}

</mosaic_0001>

<bundles_post_ra>
// kernel: deeplabv3plus_forward.20
= control target key start
LH: loop header
LB: loop body
LE: loop exit
PB: predicated region body
PF: predicated region fallthrough
CT: control target
= control target key end

     0   :  { %v213_v3 = vmov 0   ;;  %vm82_vm0 = vcmask 261120   ;;  %s303_s1 = inlined_call_operand.vmem [shape: bf16[32,512], index: 1, kind: input, shape index: {}]   ;;  %s304_s2 = inlined_call_operand.vmem [shape: f32[16,1], index: 2, kind: input, shape index: {}]   ;;  %s305_s0 = inlined_call_operand.vmem [shape: bf16[16,32], index: 0, kind: input, shape index: {}]   ;;  %s306_s3 = inlined_call_operand.vmem [shape: bf16[16,512], index: 3, kind: output, shape index: {}]  }
   0x1   :  { %v184_v0 = vld [vmem:[%s303_s1 + $0x20] sm:$0xf]  ;;  %v209_v1 = vld [vmem:[%s303_s1 + $0x2c] sm:$0xf0]  ;;  %v207_v2 = vld [vmem:[%s303_s1 + $0x24] sm:$0xf]  ;;  %212 = vset.pattern.permute.xlu0 %v213_v3 }
   0x2   :  { %v185_v4 = vor.u32 %v209_v1, %v184_v0  ;;  %v186_v5 = vld [vmem:[%s303_s1 + $0x30] sm:$0xf0]  ;;  %v192_v6 = vld [vmem:[%s303_s1 + $0x28] sm:$0xf]  ;;  %v210_v7 = vld [vmem:[%s303_s1 + $0x34] sm:$0xf0] }
   0x3   :  { %v189_v8 = vor.u32 %v207_v2, %v186_v5  ;;  %v193_v9 = vor.u32 %v210_v7, %v192_v6  ;;  %v208_v10 = vld [vmem:[%s303_s1 + $0x2c] sm:$0xf]  ;;  %v194_v11 = vld [vmem:[%s303_s1 + $0x38] sm:$0xf0]  ;;  %v168_v12 = vld [vmem:[%s303_s1] sm:$0xf] }
   0x4   :  { %92 = vmatpush.bf16.msra.mxu0 %v185_v4  ;;  %v197_v13 = vor.u32 %v208_v10, %v194_v11  ;;  %v205_v14 = vld [vmem:[%s303_s1 + $0xc] sm:$0xf0]  ;;  %v203_v15 = vld [vmem:[%s303_s1 + $0x4] sm:$0xf]  ;;  %v170_v16 = vld [vmem:[%s303_s1 + $0x10] sm:$0xf0] }
   0x5   :  { %106 = vmatpush.bf16.msra.mxu1 %v189_v8  ;;  %120 = vmatpush.bf16.msra.mxu2 %v193_v9  ;;  %v169_v17 = vor.u32 %v205_v14, %v168_v12  ;;  %v173_v18 = vor.u32 %v203_v15, %v170_v16  ;;  %v176_v19 = vld [vmem:[%s303_s1 + $0x8] sm:$0xf]  ;;  %v206_v20 = vld [vmem:[%s303_s1 + $0x14] sm:$0xf0]  ;;  %v204_v21 = vld [vmem:[%s303_s1 + $0xc] sm:$0xf] }
   0x6   :  { %134 = vmatpush.bf16.msra.mxu3 %v197_v13  ;;  %v177_v22 = vor.u32 %v206_v20, %v176_v19  ;;  %v178_v23 = vld [vmem:[%s303_s1 + $0x18] sm:$0xf0]  ;;  %v25_v24 = vld [vmem:[%s304_s2] sm:$0xff]  ;;  %v26_v27 = vld [vmem:[%s304_s2 + $0x8] sm:$0xff] }
   0x7   :  { %v181_v25 = vor.u32 %v204_v21, %v178_v23  ;;  %v202_v26 = vld [vmem:[%s305_s0] sm:$0xff]  ;;  %29 = vperm.xlu0 %212, %v25_v24  }
   0x8   :  { %93 = vmatpush.bf16.msra.mxu0 %v169_v17 }
   0x9   :  { %107 = vmatpush.bf16.msra.mxu1 %v173_v18  ;;  %121 = vmatpush.bf16.msra.mxu2 %v177_v22 }
   0xa   :  { %135 = vmatpush.bf16.msra.mxu3 %v181_v25 }
   0xb   :  { %198 = vmatmul.msk.bf16.vlgmr.msra.gmra.mxu0 %vm82_vm0, %v202_v26 }
   0xc   :  { %199 = vmatmul.msk.bf16.vlgmr.msra.gmra.mxu1 %vm82_vm0, %v202_v26  ;;  %200 = vmatmul.msk.bf16.vlgmr.msra.gmra.mxu2 %vm82_vm0, %v202_v26 }
   0xd   :  { %201 = vmatmul.msk.bf16.vlgmr.msra.gmra.mxu3 %vm82_vm0, %v202_v26 }
   0xf   :  { %34 = vperm.xlu0 %212, %v26_v27  }
  0x79   :  { %v30_v28 = vpop.permute.xlu0 %29 }
  0x81   :  { %v35_v36 = vpop.permute.xlu0 %34 }
  0x88   :  { %v95_v29 = vpop.f32.mrf.mxu0 }
  0x89   :  { %v96_v30 = vadd.f32 %v95_v29, %v30_v28  ;;  %v109_v31 = vpop.f32.mrf.mxu1 }
  0x8a   :  { %v110_v32 = vadd.f32 %v109_v31, %v30_v28 }
  0x8b   :  { %v142_v33 = vmax.f32 %v96_v30, 0.0 }
  0x8c   :  { %v143_v34 = vmax.f32 %v110_v32, 0.0 }
  0x8e   :  { %v150_v35 = vpack.c.bf16 %v143_v34, %v142_v33 }
  0x8f   :  { %v123_v37 = vpop.f32.mrf.mxu2 }
  0x90   :  { %154 = vst [vmem:[%s306_s3] sm:$0xff] %v150_v35  ;;  %v124_v38 = vadd.f32 %v123_v37, %v30_v28  ;;  %v137_v39 = vpop.f32.mrf.mxu3  ;;  %v97_v40 = vpop.f32.mrf.mxu0 }
  0x91   :  { %v138_v41 = vadd.f32 %v137_v39, %v30_v28  ;;  %v98_v42 = vadd.f32 %v97_v40, %v35_v36  ;;  %v111_v43 = vpop.f32.mrf.mxu1 }
  0x92   :  { %v144_v44 = vmax.f32 %v124_v38, 0.0  ;;  %v112_v45 = vadd.f32 %v111_v43, %v35_v36 }
  0x93   :  { %v145_v46 = vmax.f32 %v138_v41, 0.0  ;;  %v146_v47 = vmax.f32 %v98_v42, 0.0 }
  0x94   :  { %v147_v48 = vmax.f32 %v112_v45, 0.0 }
  0x95   :  { %v151_v49 = vpack.c.bf16 %v145_v46, %v144_v44 }
  0x96   :  { %v152_v50 = vpack.c.bf16 %v147_v48, %v146_v47 }
  0x97   :  { %155 = vst [vmem:[%s306_s3 + $0x8] sm:$0xff] %v151_v49  ;;  %v125_v51 = vpop.f32.mrf.mxu2 }
  0x98   :  { %156 = vst [vmem:[%s306_s3 + $0x10] sm:$0xff] %v152_v50  ;;  %v126_v52 = vadd.f32 %v125_v51, %v35_v36  ;;  %v139_v53 = vpop.f32.mrf.mxu3 }
  0x99   :  { %v140_v54 = vadd.f32 %v139_v53, %v35_v36 }
  0x9a   :  { %v148_v55 = vmax.f32 %v126_v52, 0.0 }
  0x9b   :  { %v149_v56 = vmax.f32 %v140_v54, 0.0 }
  0x9d   :  { %v153_v57 = vpack.c.bf16 %v149_v56, %v148_v55 }
  0x9f   :  { %157 = vst [vmem:[%s306_s3 + $0x18] sm:$0xff] %v153_v57 }

// kernel: deeplabv3plus_forward.21
= control target key start
LH: loop header
LB: loop body
LE: loop exit
PB: predicated region body
PF: predicated region fallthrough
CT: control target
= control target key end

     0   :  { %v283_v6 = vmov 0   ;;  %vm133_vm0 = vcmask 130048   ;;  %s375_s1 = inlined_call_operand.vmem [shape: bf16[144,128], index: 1, kind: input, shape index: {}]   ;;  %s376_s0 = inlined_call_operand.vmem [shape: bf16[32,144], index: 0, kind: input, shape index: {}]   ;;  %s377_s2 = inlined_call_operand.vmem [shape: f32[32,1], index: 2, kind: input, shape index: {}]   ;;  %s378_s3 = inlined_call_operand.vmem [shape: bf16[32,128], index: 3, kind: output, shape index: {}]  }
   0x1   :  { %v259_v0 = vld [vmem:[%s375_s1 + $0x38] sm:$0xff]  ;;  %v260_v1 = vld [vmem:[%s375_s1 + $0x40] sm:$0xff]  ;;  %v258_v3 = vld [vmem:[%s375_s1 + $0x30] sm:$0xff]  ;;  %282 = vset.pattern.permute.xlu1 %v283_v6  ;;  %281 = vset.pattern.permute.xlu0 %v283_v6 }
   0x2   :  { %v248_v2 = vld [vmem:[%s376_s0 + $0x4] sm:$0xf]  ;;  %140 = vmatpush.bf16.msra.mxu0 %v259_v0  ;;  %272 = vmatpush.bf16.msra.mxu2 %v259_v0  ;;  %v198_v4 = vld [vmem:[%s376_s0 + $0x8] sm:$0xf0]  ;;  %v39_v7 = vld [vmem:[%s377_s2 + $0x10] sm:$0xff] }
   0x3   :  { %166 = vmatpush.bf16.msra.mxu1 %v260_v1  ;;  %v201_v5 = vor.u32 %v248_v2, %v198_v4  ;;  %v257_v8 = vld [vmem:[%s375_s1 + $0x28] sm:$0xff]  ;;  %v37_v9 = vld [vmem:[%s377_s2] sm:$0xff]  ;;  %53 = vperm.xlu1 %282, %v39_v7   ;;  %v40_v11 = vld [vmem:[%s377_s2 + $0x18] sm:$0xff] }
   0x4   :  { %43 = vperm.xlu0 %281, %v37_v9   ;;  %v256_v10 = vld [vmem:[%s375_s1 + $0x20] sm:$0xff]  ;;  %v38_v12 = vld [vmem:[%s377_s2 + $0x8] sm:$0xff]  ;;  %v255_v13 = vld [vmem:[%s375_s1 + $0x18] sm:$0xff] }
   0x5   :  { %v250_v14 = vld [vmem:[%s376_s0 + $0x14] sm:$0xf]  ;;  %v206_v15 = vld [vmem:[%s376_s0 + $0x18] sm:$0xf0]  ;;  %v253_v18 = vld [vmem:[%s375_s1 + $0x8] sm:$0xff] }
   0x6   :  { %141 = vmatpush.bf16.msra.mxu0 %v258_v3  ;;  %273 = vmatpush.bf16.msra.mxu2 %v258_v3  ;;  %v254_v16 = vld [vmem:[%s375_s1 + $0x10] sm:$0xff]  ;;  %v209_v17 = vor.u32 %v250_v14, %v206_v15  ;;  %v252_v19 = vld [vmem:[%s375_s1] sm:$0xff]  ;;  %v249_v21 = vld [vmem:[%s376_s0 + $0x4] sm:$0xf0] }
   0x7   :  { %246 = vmatmul.msk.bf16.vlgmr.msra.gmra.mxu1 %vm133_vm0, %v201_v5  ;;  %v196_v20 = vld [vmem:[%s376_s0] sm:$0xf]  ;;  %v204_v22 = vld [vmem:[%s376_s0 + $0x10] sm:$0xf]  ;;  %v251_v23 = vld [vmem:[%s376_s0 + $0x14] sm:$0xf0] }
   0x8   :  { %v197_v24 = vor.u32 %v249_v21, %v196_v20  ;;  %v205_v25 = vor.u32 %v251_v23, %v204_v22 }
   0xa   :  { %142 = vmatpush.bf16.msra.mxu0 %v257_v8  ;;  %274 = vmatpush.bf16.msra.mxu2 %v257_v8 }
   0xb   :  { %58 = vperm.xlu1 %282, %v40_v11  }
   0xc   :  { %48 = vperm.xlu0 %281, %v38_v12  }
   0xe   :  { %143 = vmatpush.bf16.msra.mxu0 %v256_v10  ;;  %275 = vmatpush.bf16.msra.mxu2 %v256_v10 }
  0x12   :  { %144 = vmatpush.bf16.msra.mxu0 %v255_v13  ;;  %276 = vmatpush.bf16.msra.mxu2 %v255_v13 }
  0x16   :  { %145 = vmatpush.bf16.msra.mxu0 %v254_v16  ;;  %277 = vmatpush.bf16.msra.mxu2 %v254_v16 }
  0x17   :  { %247 = vmatmul.msk.bf16.gmra.mxu1 %vm133_vm0, %v209_v17 }
  0x1a   :  { %146 = vmatpush.bf16.msra.mxu0 %v253_v18  ;;  %278 = vmatpush.bf16.msra.mxu2 %v253_v18 }
  0x1e   :  { %147 = vmatpush.bf16.msra.mxu0 %v252_v19  ;;  %279 = vmatpush.bf16.msra.mxu2 %v252_v19 }
  0x21   :  { %148 = vmatmul.bf16.vlgmr.msra.gmra.mxu0 %v197_v24  ;;  %153 = vmatmul.bf16.vlgmr.msra.gmra.mxu2 %v205_v25 }
  0x75   :  { %v54_v30 = vpop.permute.xlu1 %53 }
  0x76   :  { %v44_v28 = vpop.permute.xlu0 %43 }
  0x7d   :  { %v59_v42 = vpop.permute.xlu1 %58 }
  0x7e   :  { %v49_v34 = vpop.permute.xlu0 %48 }
  0x84   :  { %v168_v26 = vpop.f32.mrf.mxu1 }
  0x8c   :  { %v170_v27 = vpop.f32.mrf.mxu1 }
  0x94   :  { %v173_v32 = vpop.f32.mrf.mxu1 }
  0x9c   :  { %v175_v47 = vpop.f32.mrf.mxu1 }
  0x9e   :  { %v149_v29 = vpop.f32.mrf.mxu0 }
  0x9f   :  { %v150_v31 = vadd.f32 %v149_v29, %v44_v28 }
  0xa1   :  { %v169_v36 = vadd.f32 %v168_v26, %v150_v31 }
  0xa3   :  { %v178_v40 = vmax.f32 %v169_v36, 0.0 }
  0xa4   :  { %v154_v33 = vpop.f32.mrf.mxu2 }
  0xa5   :  { %v155_v38 = vadd.f32 %v154_v33, %v54_v30 }
  0xa6   :  { %v151_v35 = vpop.f32.mrf.mxu0 }
  0xa7   :  { %v152_v37 = vadd.f32 %v151_v35, %v49_v34  ;;  %v174_v44 = vadd.f32 %v173_v32, %v155_v38 }
  0xa9   :  { %v171_v39 = vadd.f32 %v170_v27, %v152_v37  ;;  %v180_v49 = vmax.f32 %v174_v44, 0.0 }
  0xab   :  { %v179_v41 = vmax.f32 %v171_v39, 0.0 }
  0xac   :  { %v156_v43 = vpop.f32.mrf.mxu2 }
  0xad   :  { %v264_v45 = vpack.c.bf16 %v179_v41, %v178_v40  ;;  %v157_v46 = vadd.f32 %v156_v43, %v59_v42 }
  0xaf   :  { %265 = vst [vmem:[%s378_s3] sm:$0xff] %v264_v45   ;;  %v176_v48 = vadd.f32 %v175_v47, %v157_v46 }
  0xb1   :  { %v181_v50 = vmax.f32 %v176_v48, 0.0 }
  0xb3   :  { %v269_v51 = vpack.c.bf16 %v181_v50, %v180_v49 }
  0xb5   :  { %271 = vst [vmem:[%s378_s3 + $0x8] sm:$0xff] %v269_v51  }

// kernel: deeplabv3plus_forward.22
= control target key start
LH: loop header
LB: loop body
LE: loop exit
PB: predicated region body
PF: predicated region fallthrough
CT: control target
= control target key end

     0   :  { %v354_v4 = vmov 0   ;;  %vm173_vm0 = vcmask 785408   ;;  %s459_s1 = inlined_call_operand.vmem [shape: bf16[224,128], index: 1, kind: input, shape index: {}]   ;;  %s460_s2 = inlined_call_operand.vmem [shape: f32[32,1], index: 2, kind: input, shape index: {}]   ;;  %s461_s0 = inlined_call_operand.vmem [shape: bf16[32,224], index: 0, kind: input, shape index: {}]   ;;  %s462_s3 = inlined_call_operand.vmem [shape: bf16[32,128], index: 3, kind: output, shape index: {}]  }
   0x1   :  { %v319_v0 = vld [vmem:[%s459_s1 + $0x38] sm:$0xff]  ;;  %v325_v1 = vld [vmem:[%s459_s1 + $0x68] sm:$0xff]  ;;  %v318_v2 = vld [vmem:[%s459_s1 + $0x30] sm:$0xff]  ;;  %353 = vset.pattern.permute.xlu1 %v354_v4  ;;  %352 = vset.pattern.permute.xlu0 %v354_v4 }
   0x2   :  { %180 = vmatpush.bf16.msra.mxu0 %v319_v0  ;;  %337 = vmatpush.bf16.msra.mxu2 %v319_v0  ;;  %v324_v3 = vld [vmem:[%s459_s1 + $0x60] sm:$0xff]  ;;  %v317_v5 = vld [vmem:[%s459_s1 + $0x28] sm:$0xff]  ;;  %v323_v6 = vld [vmem:[%s459_s1 + $0x58] sm:$0xff] }
   0x3   :  { %345 = vmatpush.bf16.msra.mxu3 %v325_v1  ;;  %201 = vmatpush.bf16.msra.mxu1 %v325_v1  ;;  %v49_v7 = vld [vmem:[%s460_s2 + $0x10] sm:$0xff]  ;;  %v47_v8 = vld [vmem:[%s460_s2] sm:$0xff]  ;;  %v50_v11 = vld [vmem:[%s460_s2 + $0x18] sm:$0xff] }
   0x4   :  { %63 = vperm.xlu1 %353, %v49_v7   ;;  %53 = vperm.xlu0 %352, %v47_v8   ;;  %v316_v9 = vld [vmem:[%s459_s1 + $0x20] sm:$0xff]  ;;  %v322_v10 = vld [vmem:[%s459_s1 + $0x50] sm:$0xff]  ;;  %v48_v12 = vld [vmem:[%s460_s2 + $0x8] sm:$0xff] }
   0x5   :  { %v315_v13 = vld [vmem:[%s459_s1 + $0x18] sm:$0xff]  ;;  %v321_v14 = vld [vmem:[%s459_s1 + $0x48] sm:$0xff]  ;;  %v314_v15 = vld [vmem:[%s459_s1 + $0x10] sm:$0xff] }
   0x6   :  { %181 = vmatpush.bf16.msra.mxu0 %v318_v2  ;;  %338 = vmatpush.bf16.msra.mxu2 %v318_v2  ;;  %v320_v16 = vld [vmem:[%s459_s1 + $0x40] sm:$0xff]  ;;  %v310_v17 = vld [vmem:[%s461_s0 + $0x14] sm:$0xf]  ;;  %v246_v18 = vld [vmem:[%s461_s0 + $0x18] sm:$0xf0] }
   0x7   :  { %346 = vmatpush.bf16.msra.mxu3 %v324_v3  ;;  %202 = vmatpush.bf16.msra.mxu1 %v324_v3  ;;  %v308_v19 = vld [vmem:[%s461_s0 + $0x4] sm:$0xf]  ;;  %v238_v20 = vld [vmem:[%s461_s0 + $0x8] sm:$0xf0]  ;;  %v249_v22 = vor.u32 %v310_v17, %v246_v18  ;;  %v236_v25 = vld [vmem:[%s461_s0] sm:$0xf] }
   0x8   :  { %v313_v21 = vld [vmem:[%s459_s1 + $0x8] sm:$0xff]  ;;  %v241_v23 = vor.u32 %v308_v19, %v238_v20  ;;  %v312_v24 = vld [vmem:[%s459_s1] sm:$0xff]  ;;  %v244_v27 = vld [vmem:[%s461_s0 + $0x10] sm:$0xf] }
   0x9   :  { %v309_v26 = vld [vmem:[%s461_s0 + $0x4] sm:$0xf0]  ;;  %v311_v28 = vld [vmem:[%s461_s0 + $0x14] sm:$0xf0] }
   0xa   :  { %182 = vmatpush.bf16.msra.mxu0 %v317_v5  ;;  %339 = vmatpush.bf16.msra.mxu2 %v317_v5  ;;  %v237_v29 = vor.u32 %v309_v26, %v236_v25  ;;  %v245_v30 = vor.u32 %v311_v28, %v244_v27 }
   0xb   :  { %347 = vmatpush.bf16.msra.mxu3 %v323_v6  ;;  %203 = vmatpush.bf16.msra.mxu1 %v323_v6 }
   0xc   :  { %68 = vperm.xlu1 %353, %v50_v11   ;;  %58 = vperm.xlu0 %352, %v48_v12  }
   0xe   :  { %183 = vmatpush.bf16.msra.mxu0 %v316_v9  ;;  %340 = vmatpush.bf16.msra.mxu2 %v316_v9 }
   0xf   :  { %348 = vmatpush.bf16.msra.mxu3 %v322_v10  ;;  %204 = vmatpush.bf16.msra.mxu1 %v322_v10 }
  0x12   :  { %184 = vmatpush.bf16.msra.mxu0 %v315_v13  ;;  %341 = vmatpush.bf16.msra.mxu2 %v315_v13 }
  0x13   :  { %349 = vmatpush.bf16.msra.mxu3 %v321_v14  ;;  %205 = vmatpush.bf16.msra.mxu1 %v321_v14 }
  0x16   :  { %185 = vmatpush.bf16.msra.mxu0 %v314_v15  ;;  %342 = vmatpush.bf16.msra.mxu2 %v314_v15 }
  0x17   :  { %350 = vmatpush.bf16.msra.mxu3 %v320_v16  ;;  %206 = vmatpush.bf16.msra.mxu1 %v320_v16 }
  0x1a   :  { %186 = vmatpush.bf16.msra.mxu0 %v313_v21  ;;  %343 = vmatpush.bf16.msra.mxu2 %v313_v21 }
  0x1b   :  { %307 = vmatmul.msk.bf16.vlgmr.msra.gmra.mxu3 %vm173_vm0, %v249_v22  ;;  %306 = vmatmul.msk.bf16.vlgmr.msra.gmra.mxu1 %vm173_vm0, %v241_v23 }
  0x1e   :  { %187 = vmatpush.bf16.msra.mxu0 %v312_v24  ;;  %344 = vmatpush.bf16.msra.mxu2 %v312_v24 }
  0x21   :  { %188 = vmatmul.bf16.vlgmr.msra.gmra.mxu0 %v237_v29  ;;  %193 = vmatmul.bf16.vlgmr.msra.gmra.mxu2 %v245_v30 }
  0x76   :  { %v54_v31 = vpop.permute.xlu0 %53  ;;  %v64_v34 = vpop.permute.xlu1 %63 }
  0x7e   :  { %v59_v38 = vpop.permute.xlu0 %58  ;;  %v69_v47 = vpop.permute.xlu1 %68 }
  0x98   :  { %v208_v33 = vpop.f32.mrf.mxu1 }
  0x9e   :  { %v189_v32 = vpop.f32.mrf.mxu0  ;;  %v213_v36 = vpop.f32.mrf.mxu3 }
  0x9f   :  { %v190_v35 = vadd.f32 %v189_v32, %v54_v31 }
  0xa0   :  { %v210_v42 = vpop.f32.mrf.mxu1 }
  0xa1   :  { %v209_v40 = vadd.f32 %v208_v33, %v190_v35 }
  0xa3   :  { %v218_v45 = vmax.f32 %v209_v40, 0.0 }
  0xa4   :  { %v194_v37 = vpop.f32.mrf.mxu2 }
  0xa5   :  { %v195_v43 = vadd.f32 %v194_v37, %v64_v34 }
  0xa6   :  { %v191_v39 = vpop.f32.mrf.mxu0  ;;  %v215_v52 = vpop.f32.mrf.mxu3 }
  0xa7   :  { %v192_v41 = vadd.f32 %v191_v39, %v59_v38  ;;  %v214_v49 = vadd.f32 %v213_v36, %v195_v43 }
  0xa9   :  { %v211_v44 = vadd.f32 %v210_v42, %v192_v41  ;;  %v220_v54 = vmax.f32 %v214_v49, 0.0 }
  0xab   :  { %v219_v46 = vmax.f32 %v211_v44, 0.0 }
  0xac   :  { %v196_v48 = vpop.f32.mrf.mxu2 }
  0xad   :  { %v329_v50 = vpack.c.bf16 %v219_v46, %v218_v45  ;;  %v197_v51 = vadd.f32 %v196_v48, %v69_v47 }
  0xaf   :  { %330 = vst [vmem:[%s462_s3] sm:$0xff] %v329_v50   ;;  %v216_v53 = vadd.f32 %v215_v52, %v197_v51 }
  0xb1   :  { %v221_v55 = vmax.f32 %v216_v53, 0.0 }
  0xb3   :  { %v334_v56 = vpack.c.bf16 %v221_v55, %v220_v54 }
  0xb5   :  { %336 = vst [vmem:[%s462_s3 + $0x8] sm:$0xff] %v334_v56  }

// kernel: deeplabv3plus_forward.23
= control target key start
LH: loop header
LB: loop body
LE: loop exit
PB: predicated region body
PF: predicated region fallthrough
CT: control target
= control target key end

     0   :  { %vm283_vm0 = vcmask 261120   ;;  %v608_v15 = vmov 0   ;;  %s815_s1 = inlined_call_operand.vmem [shape: bf16[288,128], index: 1, kind: input, shape index: {}]   ;;  %s816_s0 = inlined_call_operand.vmem [shape: bf16[64,288], index: 0, kind: input, shape index: {}]   ;;  %s817_s2 = inlined_call_operand.vmem [shape: f32[64,1], index: 2, kind: input, shape index: {}]   ;;  %s818_s3 = inlined_call_operand.vmem [shape: bf16[64,128], index: 3, kind: output, shape index: {}]  }
   0x1   :  { %v554_v0 = vld [vmem:[%s815_s1 + $0x38] sm:$0xff]  ;;  %v564_v2 = vld [vmem:[%s815_s1 + $0x88] sm:$0xff]  ;;  %v553_v3 = vld [vmem:[%s815_s1 + $0x30] sm:$0xff]  ;;  %606 = vset.pattern.permute.xlu1 %v608_v15  ;;  %605 = vset.pattern.permute.xlu0 %v608_v15 }
   0x2   :  { %v635_v1 = vld [vmem:[%s815_s1 + $0x78] sm:$0xff]  ;;  %296 = vmatpush.bf16.msra.mxu0 %v554_v0  ;;  %588 = vmatpush.bf16.msra.mxu3 %v554_v0  ;;  %v647_v4 = vld [vmem:[%s815_s1 + $0x70] sm:$0xff]  ;;  %v563_v5 = vld [vmem:[%s815_s1 + $0x80] sm:$0xff] }
   0x3   :  { %596 = vmatpush.bf16.msra.mxu1 %v635_v1  ;;  %360 = vmatpush.bf16.msra.mxu2 %v564_v2  ;;  %v421_v6 = vld [vmem:[%s816_s0 + $0x8] sm:$0xf]  ;;  %v537_v7 = vld [vmem:[%s816_s0 + $0x10] sm:$0xf0]  ;;  %v551_v11 = vld [vmem:[%s815_s1 + $0x20] sm:$0xff] }
   0x4   :  { %v552_v8 = vld [vmem:[%s815_s1 + $0x28] sm:$0xff]  ;;  %v422_v10 = vor.u32 %v537_v7, %v421_v6  ;;  %v675_v12 = vld [vmem:[%s815_s1 + $0x60] sm:$0xff]  ;;  %v550_v13 = vld [vmem:[%s815_s1 + $0x18] sm:$0xff]  ;;  %607 = vset.pattern.permute.xlu2 %v608_v15 }
   0x5   :  { %v665_v9 = vld [vmem:[%s815_s1 + $0x68] sm:$0xff]  ;;  %v684_v14 = vld [vmem:[%s815_s1 + $0x58] sm:$0xff]  ;;  %v549_v16 = vld [vmem:[%s815_s1 + $0x10] sm:$0xff] }
   0x6   :  { %297 = vmatpush.bf16.msra.mxu0 %v553_v3  ;;  %589 = vmatpush.bf16.msra.mxu3 %v553_v3  ;;  %v69_v17 = vld [vmem:[%s817_s2 + $0x10] sm:$0xff]  ;;  %v433_v19 = vld [vmem:[%s816_s0 + $0x20] sm:$0xf]  ;;  %v540_v20 = vld [vmem:[%s816_s0 + $0x28] sm:$0xf0] }
   0x7   :  { %597 = vmatpush.bf16.msra.mxu1 %v647_v4  ;;  %361 = vmatpush.bf16.msra.mxu2 %v563_v5  ;;  %v557_v18 = vld [vmem:[%s815_s1 + $0x50] sm:$0xff]  ;;  %v548_v21 = vld [vmem:[%s815_s1 + $0x8] sm:$0xff]  ;;  %v434_v23 = vor.u32 %v540_v20, %v433_v19  ;;  %v67_v24 = vld [vmem:[%s817_s2] sm:$0xff] }
   0x8   :  { %87 = vperm.xlu1 %606, %v69_v17   ;;  %v556_v22 = vld [vmem:[%s815_s1 + $0x48] sm:$0xff]  ;;  %77 = vperm.xlu0 %605, %v67_v24   ;;  %v547_v25 = vld [vmem:[%s815_s1] sm:$0xff]  ;;  %v425_v26 = vld [vmem:[%s816_s0 + $0x18] sm:$0xf] }
   0x9   :  { %v70_v27 = vld [vmem:[%s817_s2 + $0x18] sm:$0xff]  ;;  %v539_v28 = vld [vmem:[%s816_s0 + $0x20] sm:$0xf0]  ;;  %v413_v29 = vld [vmem:[%s816_s0] sm:$0xf] }
   0xa   :  { %298 = vmatpush.bf16.msra.mxu0 %v552_v8  ;;  %590 = vmatpush.bf16.msra.mxu3 %v552_v8  ;;  %v536_v30 = vld [vmem:[%s816_s0 + $0x8] sm:$0xf0]  ;;  %v555_v31 = vld [vmem:[%s815_s1 + $0x40] sm:$0xff]  ;;  %v538_v32 = vld [vmem:[%s816_s0 + $0x1c] sm:$0xf]  ;;  %v426_v34 = vor.u32 %v539_v28, %v425_v26 }
   0xb   :  { %598 = vmatpush.bf16.msra.mxu1 %v665_v9  ;;  %531 = vmatmul.msk.bf16.vlgmr.msra.gmra.mxu2 %vm283_vm0, %v422_v10  ;;  %v427_v33 = vld [vmem:[%s816_s0 + $0x24] sm:$0xf0]  ;;  %v414_v35 = vor.u32 %v536_v30, %v413_v29  ;;  %v74_v38 = vld [vmem:[%s817_s2 + $0x38] sm:$0xff]  ;;  %v71_v39 = vld [vmem:[%s817_s2 + $0x20] sm:$0xff] }
   0xc   :  { %v430_v36 = vor.u32 %v538_v32, %v427_v33  ;;  %v68_v37 = vld [vmem:[%s817_s2 + $0x8] sm:$0xff]  ;;  %v445_v40 = vld [vmem:[%s816_s0 + $0x38] sm:$0xf]  ;;  %v543_v41 = vld [vmem:[%s816_s0 + $0x40] sm:$0xf0]  ;;  %97 = vperm.xlu2 %607, %v71_v39  }
   0xd   :  { %v446_v42 = vor.u32 %v543_v41, %v445_v40  ;;  %v73_v43 = vld [vmem:[%s817_s2 + $0x30] sm:$0xff]  ;;  %v72_v44 = vld [vmem:[%s817_s2 + $0x28] sm:$0xff]  ;;  %v542_v46 = vld [vmem:[%s816_s0 + $0x38] sm:$0xf0] }
   0xe   :  { %299 = vmatpush.bf16.msra.mxu0 %v551_v11  ;;  %591 = vmatpush.bf16.msra.mxu3 %v551_v11  ;;  %v437_v45 = vld [vmem:[%s816_s0 + $0x30] sm:$0xf]  ;;  %v541_v47 = vld [vmem:[%s816_s0 + $0x34] sm:$0xf]  ;;  %v439_v48 = vld [vmem:[%s816_s0 + $0x3c] sm:$0xf0] }
   0xf   :  { %599 = vmatpush.bf16.msra.mxu1 %v675_v12  ;;  %v438_v49 = vor.u32 %v542_v46, %v437_v45  ;;  %v442_v50 = vor.u32 %v541_v47, %v439_v48  ;;  %v457_v51 = vld [vmem:[%s816_s0 + $0x50] sm:$0xf]  ;;  %v546_v52 = vld [vmem:[%s816_s0 + $0x58] sm:$0xf0]  ;;  %v535_v54 = vld [vmem:[%s816_s0 + $0x4] sm:$0xf] }
  0x10   :  { %92 = vperm.xlu1 %606, %v70_v27   ;;  %82 = vperm.xlu0 %605, %v68_v37   ;;  %v458_v53 = vor.u32 %v546_v52, %v457_v51  ;;  %v415_v55 = vld [vmem:[%s816_s0 + $0xc] sm:$0xf0]  ;;  %v449_v57 = vld [vmem:[%s816_s0 + $0x48] sm:$0xf]  ;;  %v545_v58 = vld [vmem:[%s816_s0 + $0x50] sm:$0xf0] }
  0x11   :  { %v418_v56 = vor.u32 %v535_v54, %v415_v55  ;;  %v544_v59 = vld [vmem:[%s816_s0 + $0x4c] sm:$0xf]  ;;  %v451_v60 = vld [vmem:[%s816_s0 + $0x54] sm:$0xf0]  ;;  %v450_v61 = vor.u32 %v545_v58, %v449_v57 }
  0x12   :  { %300 = vmatpush.bf16.msra.mxu0 %v550_v13  ;;  %592 = vmatpush.bf16.msra.mxu3 %v550_v13  ;;  %v454_v62 = vor.u32 %v544_v59, %v451_v60 }
  0x13   :  { %600 = vmatpush.bf16.msra.mxu1 %v684_v14 }
  0x14   :  { %102 = vperm.xlu2 %607, %v72_v44  }
  0x16   :  { %301 = vmatpush.bf16.msra.mxu0 %v549_v16  ;;  %593 = vmatpush.bf16.msra.mxu3 %v549_v16 }
  0x17   :  { %601 = vmatpush.bf16.msra.mxu1 %v557_v18 }
  0x18   :  { %112 = vperm.xlu1 %606, %v74_v38   ;;  %107 = vperm.xlu0 %605, %v73_v43  }
  0x1a   :  { %302 = vmatpush.bf16.msra.mxu0 %v548_v21  ;;  %594 = vmatpush.bf16.msra.mxu3 %v548_v21 }
  0x1b   :  { %602 = vmatpush.bf16.msra.mxu1 %v556_v22  ;;  %532 = vmatmul.msk.bf16.gmra.mxu2 %vm283_vm0, %v434_v23 }
  0x1e   :  { %303 = vmatpush.bf16.msra.mxu0 %v547_v25  ;;  %595 = vmatpush.bf16.msra.mxu3 %v547_v25 }
  0x1f   :  { %603 = vmatpush.bf16.msra.mxu1 %v555_v31 }
  0x21   :  { %309 = vmatmul.bf16.vlgmr.msra.gmra.mxu3 %v426_v34  ;;  %304 = vmatmul.bf16.vlgmr.msra.gmra.mxu0 %v414_v35 }
  0x22   :  { %325 = vmatpush.bf16.msrb.mxu0 %v635_v1  ;;  %338 = vmatmul.bf16.vlgmr.msra.gmra.mxu1 %v430_v36 }
  0x26   :  { %326 = vmatpush.bf16.msrb.mxu0 %v647_v4 }
  0x2a   :  { %327 = vmatpush.bf16.msrb.mxu0 %v665_v9 }
  0x2b   :  { %533 = vmatmul.msk.bf16.gmra.mxu2 %vm283_vm0, %v446_v42 }
  0x2e   :  { %328 = vmatpush.bf16.msrb.mxu0 %v675_v12 }
  0x31   :  { %314 = vmatmul.bf16.gmra.mxu3 %v438_v49 }
  0x32   :  { %329 = vmatpush.bf16.msrb.mxu0 %v684_v14  ;;  %343 = vmatmul.bf16.gmra.mxu1 %v442_v50 }
  0x36   :  { %330 = vmatpush.bf16.msrb.mxu0 %v557_v18 }
  0x3a   :  { %331 = vmatpush.bf16.msrb.mxu0 %v556_v22 }
  0x3b   :  { %534 = vmatmul.msk.bf16.gmra.mxu2 %vm283_vm0, %v458_v53 }
  0x3e   :  { %332 = vmatpush.bf16.msrb.mxu0 %v555_v31 }
  0x41   :  { %333 = vmatmul.bf16.vlgmr.msrb.gmra.mxu0 %v418_v56  ;;  %319 = vmatmul.bf16.gmra.mxu3 %v450_v61 }
  0x42   :  { %348 = vmatmul.bf16.gmra.mxu1 %v454_v62 }
  0x66   :  { %v98_v16 = vpop.permute.xlu2 %97 }
  0x6e   :  { %v103_v27 = vpop.permute.xlu2 %102 }
  0x7a   :  { %v88_v3 = vpop.permute.xlu1 %87  ;;  %v78_v17 = vpop.permute.xlu0 %77 }
  0x82   :  { %v93_v9 = vpop.permute.xlu1 %92  ;;  %v83_v28 = vpop.permute.xlu0 %82 }
  0x8a   :  { %v108_v48 = vpop.permute.xlu0 %107  ;;  %v113_v56 = vpop.permute.xlu1 %112 }
  0x8e   :  { %v363_v63 = vpop.f32.mrf.mxu2 }
  0x96   :  { %v365_v0 = vpop.f32.mrf.mxu2 }
  0x9e   :  { %v368_v1 = vpop.f32.mrf.mxu2  ;;  %v305_v7 = vpop.f32.mrf.mxu0 }
  0x9f   :  { %v339_v2 = vpop.f32.mrf.mxu1  ;;  %v306_v34 = vadd.f32 %v305_v7, %v78_v17 }
  0xa4   :  { %v310_v4 = vpop.f32.mrf.mxu3 }
  0xa5   :  { %v311_v5 = vadd.f32 %v310_v4, %v88_v3 }
  0xa6   :  { %v370_v8 = vpop.f32.mrf.mxu2  ;;  %v307_v19 = vpop.f32.mrf.mxu0 }
  0xa7   :  { %v341_v6 = vpop.f32.mrf.mxu1  ;;  %v340_v10 = vadd.f32 %v339_v2, %v311_v5  ;;  %v308_v39 = vadd.f32 %v307_v19, %v83_v28 }
  0xa9   :  { %v369_v13 = vadd.f32 %v368_v1, %v340_v10 }
  0xab   :  { %v385_v21 = vmax.f32 %v369_v13, 0.0 }
  0xac   :  { %v312_v11 = vpop.f32.mrf.mxu3 }
  0xad   :  { %v313_v12 = vadd.f32 %v312_v11, %v93_v9 }
  0xae   :  { %v373_v20 = vpop.f32.mrf.mxu2 }
  0xaf   :  { %v342_v14 = vadd.f32 %v341_v6, %v313_v12  ;;  %v344_v15 = vpop.f32.mrf.mxu1 }
  0xb1   :  { %v371_v18 = vadd.f32 %v370_v8, %v342_v14 }
  0xb3   :  { %v386_v22 = vmax.f32 %v371_v18, 0.0 }
  0xb4   :  { %v315_v23 = vpop.f32.mrf.mxu3 }
  0xb5   :  { %v573_v24 = vpack.c.bf16 %v386_v22, %v385_v21  ;;  %v316_v25 = vadd.f32 %v315_v23, %v98_v16 }
  0xb6   :  { %v375_v31 = vpop.f32.mrf.mxu2 }
  0xb7   :  { %585 = vst [vmem:[%s818_s3 + $0x8] sm:$0xff] %v573_v24   ;;  %v346_v26 = vpop.f32.mrf.mxu1  ;;  %v345_v29 = vadd.f32 %v344_v15, %v316_v25 }
  0xb9   :  { %v374_v35 = vadd.f32 %v373_v20, %v345_v29 }
  0xbb   :  { %v387_v40 = vmax.f32 %v374_v35, 0.0 }
  0xbc   :  { %v317_v32 = vpop.f32.mrf.mxu3 }
  0xbd   :  { %v318_v33 = vadd.f32 %v317_v32, %v103_v27 }
  0xbe   :  { %v334_v30 = vpop.f32.mrf.mxu0  ;;  %v378_v49 = vpop.f32.mrf.mxu2 }
  0xbf   :  { %v347_v36 = vadd.f32 %v346_v26, %v318_v33  ;;  %v335_v37 = vadd.f32 %v334_v30, %v306_v34  ;;  %v349_v44 = vpop.f32.mrf.mxu1 }
  0xc1   :  { %v376_v38 = vadd.f32 %v375_v31, %v347_v36  ;;  %v364_v43 = vadd.f32 %v363_v63, %v335_v37 }
  0xc3   :  { %v388_v41 = vmax.f32 %v376_v38, 0.0  ;;  %v383_v52 = vmax.f32 %v364_v43, 0.0 }
  0xc4   :  { %v320_v46 = vpop.f32.mrf.mxu3 }
  0xc5   :  { %v578_v47 = vpack.c.bf16 %v388_v41, %v387_v40  ;;  %v321_v51 = vadd.f32 %v320_v46, %v108_v48 }
  0xc6   :  { %v336_v42 = vpop.f32.mrf.mxu0  ;;  %v380_v62 = vpop.f32.mrf.mxu2 }
  0xc7   :  { %v337_v45 = vadd.f32 %v336_v42, %v308_v39  ;;  %586 = vst [vmem:[%s818_s3 + $0x10] sm:$0xff] %v578_v47   ;;  %v350_v55 = vadd.f32 %v349_v44, %v321_v51  ;;  %v351_v59 = vpop.f32.mrf.mxu1 }
  0xc9   :  { %v366_v50 = vadd.f32 %v365_v0, %v337_v45  ;;  %v379_v60 = vadd.f32 %v378_v49, %v350_v55 }
  0xcb   :  { %v384_v53 = vmax.f32 %v366_v50, 0.0  ;;  %v389_v0 = vmax.f32 %v379_v60, 0.0 }
  0xcc   :  { %v322_v57 = vpop.f32.mrf.mxu3 }
  0xcd   :  { %v568_v54 = vpack.c.bf16 %v384_v53, %v383_v52  ;;  %v323_v58 = vadd.f32 %v322_v57, %v113_v56 }
  0xcf   :  { %569 = vst [vmem:[%s818_s3] sm:$0xff] %v568_v54   ;;  %v352_v61 = vadd.f32 %v351_v59, %v323_v58 }
  0xd1   :  { %v381_v63 = vadd.f32 %v380_v62, %v352_v61 }
  0xd3   :  { %v390_v1 = vmax.f32 %v381_v63, 0.0 }
  0xd5   :  { %v583_v2 = vpack.c.bf16 %v390_v1, %v389_v0 }
  0xd7   :  { %587 = vst [vmem:[%s818_s3 + $0x18] sm:$0xff] %v583_v2  }

// kernel: deeplabv3plus_forward.26
= control target key start
LH: loop header
LB: loop body
LE: loop exit
PB: predicated region body
PF: predicated region fallthrough
CT: control target
= control target key end

     0   :  { %v757_v8 = vmov 0   ;;  %vm389_vm0 = vcmask 523264   ;;  %s964_s1 = inlined_call_operand.vmem [shape: bf16[576,128], index: 1, kind: input, shape index: {}]   ;;  %s965_s2 = inlined_call_operand.vmem [shape: f32[32,1], index: 2, kind: input, shape index: {}]   ;;  %s966_s0 = inlined_call_operand.vmem [shape: bf16[32,576], index: 0, kind: input, shape index: {}]   ;;  %s967_s3 = inlined_call_operand.vmem [shape: bf16[32,128], index: 3, kind: output, shape index: {}]  }
   0x1   :  { %v710_v0 = vld [vmem:[%s964_s1 + $0x38] sm:$0xff]  ;;  %v709_v4 = vld [vmem:[%s964_s1 + $0x30] sm:$0xff]  ;;  %755 = vset.pattern.permute.xlu0 %v757_v8  ;;  %756 = vset.pattern.permute.xlu1 %v757_v8  ;;  %v708_v9 = vld [vmem:[%s964_s1 + $0x28] sm:$0xff] }
   0x2   :  { %v718_v1 = vld [vmem:[%s964_s1 + $0x78] sm:$0xff]  ;;  %396 = vmatpush.bf16.msra.mxu0 %v710_v0  ;;  %v717_v5 = vld [vmem:[%s964_s1 + $0x70] sm:$0xff]  ;;  %v716_v10 = vld [vmem:[%s964_s1 + $0x68] sm:$0xff] }
   0x3   :  { %v726_v2 = vld [vmem:[%s964_s1 + $0xb8] sm:$0xff]  ;;  %415 = vmatpush.bf16.msra.mxu1 %v718_v1  ;;  %v725_v6 = vld [vmem:[%s964_s1 + $0xb0] sm:$0xff]  ;;  %v724_v11 = vld [vmem:[%s964_s1 + $0xa8] sm:$0xff] }
   0x4   :  { %v734_v3 = vld [vmem:[%s964_s1 + $0xf8] sm:$0xff]  ;;  %434 = vmatpush.bf16.msra.mxu2 %v726_v2  ;;  %v733_v7 = vld [vmem:[%s964_s1 + $0xf0] sm:$0xff]  ;;  %v732_v12 = vld [vmem:[%s964_s1 + $0xe8] sm:$0xff] }
   0x5   :  { %453 = vmatpush.bf16.msra.mxu3 %v734_v3  ;;  %v707_v13 = vld [vmem:[%s964_s1 + $0x20] sm:$0xff]  ;;  %v706_v17 = vld [vmem:[%s964_s1 + $0x18] sm:$0xff]  ;;  %v705_v22 = vld [vmem:[%s964_s1 + $0x10] sm:$0xff] }
   0x6   :  { %397 = vmatpush.bf16.msra.mxu0 %v709_v4  ;;  %v715_v14 = vld [vmem:[%s964_s1 + $0x60] sm:$0xff]  ;;  %v714_v18 = vld [vmem:[%s964_s1 + $0x58] sm:$0xff]  ;;  %v713_v23 = vld [vmem:[%s964_s1 + $0x50] sm:$0xff] }
   0x7   :  { %416 = vmatpush.bf16.msra.mxu1 %v717_v5  ;;  %v723_v15 = vld [vmem:[%s964_s1 + $0xa0] sm:$0xff]  ;;  %v722_v20 = vld [vmem:[%s964_s1 + $0x98] sm:$0xff]  ;;  %v721_v24 = vld [vmem:[%s964_s1 + $0x90] sm:$0xff] }
   0x8   :  { %435 = vmatpush.bf16.msra.mxu2 %v725_v6  ;;  %v731_v16 = vld [vmem:[%s964_s1 + $0xe0] sm:$0xff]  ;;  %v730_v21 = vld [vmem:[%s964_s1 + $0xd8] sm:$0xff]  ;;  %v729_v25 = vld [vmem:[%s964_s1 + $0xd0] sm:$0xff] }
   0x9   :  { %454 = vmatpush.bf16.msra.mxu3 %v733_v7  ;;  %v99_v19 = vld [vmem:[%s965_s2] sm:$0xff]  ;;  %v101_v26 = vld [vmem:[%s965_s2 + $0x10] sm:$0xff]  ;;  %v100_v27 = vld [vmem:[%s965_s2 + $0x8] sm:$0xff] }
   0xa   :  { %398 = vmatpush.bf16.msra.mxu0 %v708_v9  ;;  %105 = vperm.xlu0 %755, %v99_v19   ;;  %v704_v28 = vld [vmem:[%s964_s1 + $0x8] sm:$0xff]  ;;  %v703_v32 = vld [vmem:[%s964_s1] sm:$0xff]  ;;  %v695_v37 = vld [vmem:[%s966_s0 + $0x10] sm:$0xf0] }
   0xb   :  { %417 = vmatpush.bf16.msra.mxu1 %v716_v10  ;;  %115 = vperm.xlu1 %756, %v101_v26   ;;  %v712_v29 = vld [vmem:[%s964_s1 + $0x48] sm:$0xff]  ;;  %v711_v33 = vld [vmem:[%s964_s1 + $0x40] sm:$0xff]  ;;  %v511_v39 = vld [vmem:[%s966_s0 + $0x14] sm:$0xf0] }
   0xc   :  { %436 = vmatpush.bf16.msra.mxu2 %v724_v11  ;;  %v720_v30 = vld [vmem:[%s964_s1 + $0x88] sm:$0xff]  ;;  %v719_v34 = vld [vmem:[%s964_s1 + $0x80] sm:$0xff]  ;;  %v696_v41 = vld [vmem:[%s966_s0 + $0x18] sm:$0xf0] }
   0xd   :  { %455 = vmatpush.bf16.msra.mxu3 %v732_v12  ;;  %v728_v31 = vld [vmem:[%s964_s1 + $0xc8] sm:$0xff]  ;;  %v727_v35 = vld [vmem:[%s964_s1 + $0xc0] sm:$0xff]  ;;  %v738_v44 = vld [vmem:[%s964_s1 + $0x118] sm:$0xff] }
   0xe   :  { %399 = vmatpush.bf16.msra.mxu0 %v707_v13  ;;  %v509_v36 = vld [vmem:[%s966_s0] sm:$0xf]  ;;  %v693_v38 = vld [vmem:[%s966_s0 + $0x4] sm:$0xf]  ;;  %v517_v40 = vld [vmem:[%s966_s0 + $0x8] sm:$0xf] }
   0xf   :  { %418 = vmatpush.bf16.msra.mxu1 %v715_v14  ;;  %v694_v42 = vld [vmem:[%s966_s0 + $0xc] sm:$0xf]  ;;  %v519_v43 = vld [vmem:[%s966_s0 + $0x1c] sm:$0xf0]  ;;  %v510_v45 = vor.u32 %v695_v37, %v509_v36  ;;  %v514_v46 = vor.u32 %v693_v38, %v511_v39  ;;  %v518_v47 = vor.u32 %v696_v41, %v517_v40  ;;  %v737_v49 = vld [vmem:[%s964_s1 + $0x110] sm:$0xff] }
  0x10   :  { %437 = vmatpush.bf16.msra.mxu2 %v723_v15  ;;  %v522_v48 = vor.u32 %v694_v42, %v519_v43  ;;  %v102_v50 = vld [vmem:[%s965_s2 + $0x18] sm:$0xff]  ;;  %v736_v51 = vld [vmem:[%s964_s1 + $0x108] sm:$0xff]  ;;  %v735_v52 = vld [vmem:[%s964_s1 + $0x100] sm:$0xff] }
  0x11   :  { %456 = vmatpush.bf16.msra.mxu3 %v731_v16  ;;  %v529_v53 = vld [vmem:[%s966_s0 + $0x28] sm:$0xf]  ;;  %v700_v54 = vld [vmem:[%s966_s0 + $0x38] sm:$0xf0]  ;;  %v698_v55 = vld [vmem:[%s966_s0 + $0x2c] sm:$0xf] }
  0x12   :  { %400 = vmatpush.bf16.msra.mxu0 %v706_v17  ;;  %110 = vperm.xlu0 %755, %v100_v27   ;;  %v531_v56 = vld [vmem:[%s966_s0 + $0x3c] sm:$0xf0]  ;;  %v537_v57 = vld [vmem:[%s966_s0 + $0x30] sm:$0xf]  ;;  %v701_v58 = vld [vmem:[%s966_s0 + $0x40] sm:$0xf0]  ;;  %v530_v61 = vor.u32 %v700_v54, %v529_v53 }
  0x13   :  { %419 = vmatpush.bf16.msra.mxu1 %v714_v18  ;;  %120 = vperm.xlu1 %756, %v102_v50   ;;  %v699_v59 = vld [vmem:[%s966_s0 + $0x34] sm:$0xf]  ;;  %v539_v60 = vld [vmem:[%s966_s0 + $0x44] sm:$0xf0]  ;;  %v534_v62 = vor.u32 %v698_v55, %v531_v56  ;;  %v538_v63 = vor.u32 %v701_v58, %v537_v57  ;;  %v525_v1 = vld [vmem:[%s966_s0 + $0x10] sm:$0xf] }
  0x14   :  { %438 = vmatpush.bf16.msra.mxu2 %v722_v20  ;;  %v542_v0 = vor.u32 %v699_v59, %v539_v60  ;;  %v697_v2 = vld [vmem:[%s966_s0 + $0x20] sm:$0xf0]  ;;  %v545_v3 = vld [vmem:[%s966_s0 + $0x38] sm:$0xf]  ;;  %v702_v4 = vld [vmem:[%s966_s0 + $0x48] sm:$0xf0] }
  0x15   :  { %457 = vmatpush.bf16.msra.mxu3 %v730_v21  ;;  %v526_v5 = vor.u32 %v697_v2, %v525_v1  ;;  %v546_v6 = vor.u32 %v702_v4, %v545_v3 }
  0x16   :  { %401 = vmatpush.bf16.msra.mxu0 %v705_v22 }
  0x17   :  { %420 = vmatpush.bf16.msra.mxu1 %v713_v23 }
  0x18   :  { %439 = vmatpush.bf16.msra.mxu2 %v721_v24 }
  0x19   :  { %458 = vmatpush.bf16.msra.mxu3 %v729_v25 }
  0x1a   :  { %402 = vmatpush.bf16.msra.mxu0 %v704_v28 }
  0x1b   :  { %421 = vmatpush.bf16.msra.mxu1 %v712_v29 }
  0x1c   :  { %440 = vmatpush.bf16.msra.mxu2 %v720_v30 }
  0x1d   :  { %459 = vmatpush.bf16.msra.mxu3 %v728_v31 }
  0x1e   :  { %403 = vmatpush.bf16.msra.mxu0 %v703_v32 }
  0x1f   :  { %422 = vmatpush.bf16.msra.mxu1 %v711_v33 }
  0x20   :  { %441 = vmatpush.bf16.msra.mxu2 %v719_v34 }
  0x21   :  { %460 = vmatpush.bf16.msra.mxu3 %v727_v35  ;;  %404 = vmatmul.bf16.vlgmr.msra.gmra.mxu0 %v510_v45 }
  0x22   :  { %476 = vmatpush.bf16.msrb.mxu0 %v738_v44  ;;  %423 = vmatmul.bf16.vlgmr.msra.gmra.mxu1 %v514_v46 }
  0x23   :  { %750 = vmatpush.bf16.msrb.mxu1 %v738_v44  ;;  %442 = vmatmul.bf16.vlgmr.msra.gmra.mxu2 %v518_v47 }
  0x24   :  { %461 = vmatmul.bf16.vlgmr.msra.gmra.mxu3 %v522_v48 }
  0x26   :  { %477 = vmatpush.bf16.msrb.mxu0 %v737_v49 }
  0x27   :  { %751 = vmatpush.bf16.msrb.mxu1 %v737_v49 }
  0x2a   :  { %478 = vmatpush.bf16.msrb.mxu0 %v736_v51 }
  0x2b   :  { %752 = vmatpush.bf16.msrb.mxu1 %v736_v51 }
  0x2e   :  { %479 = vmatpush.bf16.msrb.mxu0 %v735_v52 }
  0x2f   :  { %753 = vmatpush.bf16.msrb.mxu1 %v735_v52 }
  0x31   :  { %409 = vmatmul.bf16.gmra.mxu0 %v530_v61 }
  0x32   :  { %428 = vmatmul.bf16.gmra.mxu1 %v534_v62 }
  0x33   :  { %447 = vmatmul.bf16.gmra.mxu2 %v538_v63 }
  0x34   :  { %466 = vmatmul.bf16.gmra.mxu3 %v542_v0 }
  0x41   :  { %691 = vmatmul.msk.bf16.vlgmr.msrb.gmra.mxu0 %vm389_vm0, %v526_v5 }
  0x42   :  { %692 = vmatmul.msk.bf16.vlgmr.msrb.gmra.mxu1 %vm389_vm0, %v546_v6 }
  0x7c   :  { %v106_v13 = vpop.permute.xlu0 %105 }
  0x7d   :  { %v116_v15 = vpop.permute.xlu1 %115 }
  0x84   :  { %v111_v22 = vpop.permute.xlu0 %110 }
  0x85   :  { %v121_v23 = vpop.permute.xlu1 %120 }
  0x9e   :  { %v405_v7 = vpop.f32.mrf.mxu0 }
  0x9f   :  { %v424_v8 = vpop.f32.mrf.mxu1  ;;  %v406_v24 = vadd.f32 %v405_v7, %v106_v13 }
  0xa1   :  { %v425_v29 = vadd.f32 %v424_v8, %v406_v24 }
  0xa6   :  { %v443_v9 = vpop.f32.mrf.mxu2  ;;  %v407_v11 = vpop.f32.mrf.mxu0 }
  0xa7   :  { %v462_v10 = vpop.f32.mrf.mxu3  ;;  %v426_v12 = vpop.f32.mrf.mxu1  ;;  %v408_v27 = vadd.f32 %v407_v11, %v111_v22  ;;  %v444_v34 = vadd.f32 %v443_v9, %v425_v29 }
  0xa9   :  { %v427_v35 = vadd.f32 %v426_v12, %v408_v27  ;;  %v463_v40 = vadd.f32 %v462_v10, %v444_v34 }
  0xae   :  { %v445_v14 = vpop.f32.mrf.mxu2  ;;  %v410_v16 = vpop.f32.mrf.mxu0 }
  0xaf   :  { %v429_v17 = vpop.f32.mrf.mxu1  ;;  %v464_v18 = vpop.f32.mrf.mxu3  ;;  %v411_v25 = vadd.f32 %v410_v16, %v116_v15  ;;  %v446_v38 = vadd.f32 %v445_v14, %v427_v35 }
  0xb1   :  { %v430_v30 = vadd.f32 %v429_v17, %v411_v25  ;;  %v465_v43 = vadd.f32 %v464_v18, %v446_v38 }
  0xb6   :  { %v448_v19 = vpop.f32.mrf.mxu2  ;;  %v412_v20 = vpop.f32.mrf.mxu0 }
  0xb7   :  { %v431_v21 = vpop.f32.mrf.mxu1  ;;  %v467_v26 = vpop.f32.mrf.mxu3  ;;  %v413_v28 = vadd.f32 %v412_v20, %v121_v23  ;;  %v449_v36 = vadd.f32 %v448_v19, %v430_v30 }
  0xb9   :  { %v432_v37 = vadd.f32 %v431_v21, %v413_v28  ;;  %v468_v41 = vadd.f32 %v467_v26, %v449_v36 }
  0xbe   :  { %v450_v31 = vpop.f32.mrf.mxu2  ;;  %v481_v32 = vpop.f32.mrf.mxu0 }
  0xbf   :  { %v486_v33 = vpop.f32.mrf.mxu1  ;;  %v451_v39 = vadd.f32 %v450_v31, %v432_v37  ;;  %v469_v42 = vpop.f32.mrf.mxu3  ;;  %v482_v45 = vadd.f32 %v481_v32, %v463_v40 }
  0xc0   :  { %v487_v46 = vadd.f32 %v486_v33, %v468_v41 }
  0xc1   :  { %v470_v44 = vadd.f32 %v469_v42, %v451_v39  ;;  %v491_v51 = vmax.f32 %v482_v45, 0.0 }
  0xc2   :  { %v493_v52 = vmax.f32 %v487_v46, 0.0 }
  0xc6   :  { %v483_v47 = vpop.f32.mrf.mxu0 }
  0xc7   :  { %v488_v48 = vpop.f32.mrf.mxu1  ;;  %v484_v49 = vadd.f32 %v483_v47, %v465_v43 }
  0xc8   :  { %v489_v50 = vadd.f32 %v488_v48, %v470_v44 }
  0xc9   :  { %v492_v53 = vmax.f32 %v484_v49, 0.0 }
  0xca   :  { %v494_v54 = vmax.f32 %v489_v50, 0.0 }
  0xcb   :  { %v742_v55 = vpack.c.bf16 %v492_v53, %v491_v51 }
  0xcc   :  { %v747_v56 = vpack.c.bf16 %v494_v54, %v493_v52 }
  0xcd   :  { %743 = vst [vmem:[%s967_s3] sm:$0xff] %v742_v55  }
  0xce   :  { %749 = vst [vmem:[%s967_s3 + $0x8] sm:$0xff] %v747_v56  }

// kernel: deeplabv3plus_forward.24
= control target key start
LH: loop header
LB: loop body
LE: loop exit
PB: predicated region body
PF: predicated region fallthrough
CT: control target
= control target key end

     0   :  { %v177_v1 = vmov 0   ;;  %vm85_vm0 = vcmask 523264   ;;  %s234_s1 = inlined_call_operand.vmem [shape: bf16[64,128], index: 1, kind: input, shape index: {}]   ;;  %s235_s2 = inlined_call_operand.vmem [shape: f32[32,1], index: 2, kind: input, shape index: {}]   ;;  %s236_s0 = inlined_call_operand.vmem [shape: bf16[32,64], index: 0, kind: input, shape index: {}]   ;;  %s237_s3 = inlined_call_operand.vmem [shape: bf16[32,128], index: 3, kind: output, shape index: {}]  }
   0x1   :  { %v158_v0 = vld [vmem:[%s234_s1 + $0x18] sm:$0xff]  ;;  %176 = vset.pattern.permute.xlu1 %v177_v1  ;;  %175 = vset.pattern.permute.xlu0 %v177_v1  ;;  %v157_v2 = vld [vmem:[%s234_s1 + $0x10] sm:$0xff]  ;;  %v27_v4 = vld [vmem:[%s235_s2] sm:$0xff] }
   0x2   :  { %96 = vmatpush.bf16.msra.mxu0 %v158_v0  ;;  %170 = vmatpush.bf16.msra.mxu1 %v158_v0  ;;  %v29_v3 = vld [vmem:[%s235_s2 + $0x10] sm:$0xff]  ;;  %v156_v5 = vld [vmem:[%s234_s1 + $0x8] sm:$0xff]  ;;  %v30_v6 = vld [vmem:[%s235_s2 + $0x18] sm:$0xff] }
   0x3   :  { %43 = vperm.xlu1 %176, %v29_v3   ;;  %33 = vperm.xlu0 %175, %v27_v4   ;;  %v28_v7 = vld [vmem:[%s235_s2 + $0x8] sm:$0xff]  ;;  %v155_v8 = vld [vmem:[%s234_s1] sm:$0xff] }
   0x4   :  { %v153_v9 = vld [vmem:[%s236_s0] sm:$0xff]  ;;  %v154_v10 = vld [vmem:[%s236_s0 + $0x8] sm:$0xff] }
   0x6   :  { %97 = vmatpush.bf16.msra.mxu0 %v157_v2  ;;  %171 = vmatpush.bf16.msra.mxu1 %v157_v2 }
   0xa   :  { %98 = vmatpush.bf16.msra.mxu0 %v156_v5  ;;  %172 = vmatpush.bf16.msra.mxu1 %v156_v5 }
   0xb   :  { %48 = vperm.xlu1 %176, %v30_v6   ;;  %38 = vperm.xlu0 %175, %v28_v7  }
   0xe   :  { %99 = vmatpush.bf16.msra.mxu0 %v155_v8  ;;  %173 = vmatpush.bf16.msra.mxu1 %v155_v8 }
  0x11   :  { %151 = vmatmul.msk.bf16.vlgmr.msra.gmra.mxu0 %vm85_vm0, %v153_v9  ;;  %152 = vmatmul.msk.bf16.vlgmr.msra.gmra.mxu1 %vm85_vm0, %v154_v10 }
  0x75   :  { %v44_v11 = vpop.permute.xlu1 %43  ;;  %v34_v12 = vpop.permute.xlu0 %33 }
  0x7d   :  { %v49_v15 = vpop.permute.xlu1 %48  ;;  %v39_v16 = vpop.permute.xlu0 %38 }
  0x8e   :  { %v101_v13 = vpop.f32.mrf.mxu0  ;;  %v106_v14 = vpop.f32.mrf.mxu1 }
  0x8f   :  { %v102_v17 = vadd.f32 %v101_v13, %v34_v12  ;;  %v107_v18 = vadd.f32 %v106_v14, %v44_v11 }
  0x91   :  { %v111_v23 = vmax.f32 %v102_v17, 0.0  ;;  %v113_v24 = vmax.f32 %v107_v18, 0.0 }
  0x96   :  { %v103_v19 = vpop.f32.mrf.mxu0  ;;  %v108_v20 = vpop.f32.mrf.mxu1 }
  0x97   :  { %v104_v21 = vadd.f32 %v103_v19, %v39_v16  ;;  %v109_v22 = vadd.f32 %v108_v20, %v49_v15 }
  0x99   :  { %v112_v25 = vmax.f32 %v104_v21, 0.0  ;;  %v114_v26 = vmax.f32 %v109_v22, 0.0 }
  0x9b   :  { %v162_v27 = vpack.c.bf16 %v112_v25, %v111_v23  ;;  %v167_v28 = vpack.c.bf16 %v114_v26, %v113_v24 }
  0x9d   :  { %163 = vst [vmem:[%s237_s3] sm:$0xff] %v162_v27  }
  0x9e   :  { %169 = vst [vmem:[%s237_s3 + $0x8] sm:$0xff] %v167_v28  }

// kernel: deeplabv3plus_forward.30
= control target key start
LH: loop header
LB: loop body
LE: loop exit
PB: predicated region body
PF: predicated region fallthrough
CT: control target
= control target key end

     0   :  { %v206_v2 = vmov 0   ;;  %s281_s1 = inlined_call_operand.vmem [shape: bf16[128,128], index: 1, kind: input, shape index: {}]   ;;  %s282_s2 = inlined_call_operand.vmem [shape: f32[32,1], index: 2, kind: input, shape index: {}]   ;;  %s283_s0 = inlined_call_operand.vmem [shape: bf16[32,128], index: 0, kind: input, shape index: {}]   ;;  %s284_s3 = inlined_call_operand.vmem [shape: f32[32,128], index: 3, kind: output, shape index: {}]  }
   0x1   :  { %v194_v0 = vld [vmem:[%s281_s1 + $0x38] sm:$0xff]  ;;  %v193_v1 = vld [vmem:[%s281_s1 + $0x30] sm:$0xff]  ;;  %205 = vset.pattern.permute.xlu1 %v206_v2  ;;  %204 = vset.pattern.permute.xlu0 %v206_v2  ;;  %v34_v4 = vld [vmem:[%s282_s2] sm:$0xff] }
   0x2   :  { %118 = vmatpush.bf16.msra.mxu0 %v194_v0  ;;  %195 = vmatpush.bf16.msra.mxu1 %v194_v0  ;;  %v36_v3 = vld [vmem:[%s282_s2 + $0x10] sm:$0xff]  ;;  %v192_v5 = vld [vmem:[%s281_s1 + $0x28] sm:$0xff]  ;;  %v37_v6 = vld [vmem:[%s282_s2 + $0x18] sm:$0xff] }
   0x3   :  { %50 = vperm.xlu1 %205, %v36_v3   ;;  %40 = vperm.xlu0 %204, %v34_v4   ;;  %v35_v7 = vld [vmem:[%s282_s2 + $0x8] sm:$0xff]  ;;  %v191_v8 = vld [vmem:[%s281_s1 + $0x20] sm:$0xff]  ;;  %v190_v9 = vld [vmem:[%s281_s1 + $0x18] sm:$0xff] }
   0x4   :  { %v189_v10 = vld [vmem:[%s281_s1 + $0x10] sm:$0xff]  ;;  %v188_v11 = vld [vmem:[%s281_s1 + $0x8] sm:$0xff]  ;;  %v187_v12 = vld [vmem:[%s281_s1] sm:$0xff] }
   0x5   :  { %v185_v13 = vld [vmem:[%s283_s0] sm:$0xff]  ;;  %v186_v14 = vld [vmem:[%s283_s0 + $0x8] sm:$0xff] }
   0x6   :  { %119 = vmatpush.bf16.msra.mxu0 %v193_v1  ;;  %196 = vmatpush.bf16.msra.mxu1 %v193_v1 }
   0xa   :  { %120 = vmatpush.bf16.msra.mxu0 %v192_v5  ;;  %197 = vmatpush.bf16.msra.mxu1 %v192_v5 }
   0xb   :  { %55 = vperm.xlu1 %205, %v37_v6   ;;  %45 = vperm.xlu0 %204, %v35_v7  }
   0xe   :  { %121 = vmatpush.bf16.msra.mxu0 %v191_v8  ;;  %198 = vmatpush.bf16.msra.mxu1 %v191_v8 }
  0x12   :  { %122 = vmatpush.bf16.msra.mxu0 %v190_v9  ;;  %199 = vmatpush.bf16.msra.mxu1 %v190_v9 }
  0x16   :  { %123 = vmatpush.bf16.msra.mxu0 %v189_v10  ;;  %200 = vmatpush.bf16.msra.mxu1 %v189_v10 }
  0x1a   :  { %124 = vmatpush.bf16.msra.mxu0 %v188_v11  ;;  %201 = vmatpush.bf16.msra.mxu1 %v188_v11 }
  0x1e   :  { %125 = vmatpush.bf16.msra.mxu0 %v187_v12  ;;  %202 = vmatpush.bf16.msra.mxu1 %v187_v12 }
  0x21   :  { %126 = vmatmul.bf16.vlgmr.msra.gmra.mxu0 %v185_v13  ;;  %131 = vmatmul.bf16.vlgmr.msra.gmra.mxu1 %v186_v14 }
  0x75   :  { %v51_v15 = vpop.permute.xlu1 %50  ;;  %v41_v16 = vpop.permute.xlu0 %40 }
  0x7d   :  { %v56_v21 = vpop.permute.xlu1 %55  ;;  %v46_v22 = vpop.permute.xlu0 %45 }
  0x9e   :  { %v127_v17 = vpop.f32.mrf.mxu0  ;;  %v132_v18 = vpop.f32.mrf.mxu1 }
  0x9f   :  { %v128_v19 = vadd.f32 %v127_v17, %v41_v16  ;;  %v133_v20 = vadd.f32 %v132_v18, %v51_v15 }
  0xa1   :  { %137 = vst [vmem:[%s284_s3] sm:$0xff] %v128_v19 }
  0xa2   :  { %139 = vst [vmem:[%s284_s3 + $0x10] sm:$0xff] %v133_v20 }
  0xa6   :  { %v129_v23 = vpop.f32.mrf.mxu0  ;;  %v134_v24 = vpop.f32.mrf.mxu1 }
  0xa7   :  { %v130_v25 = vadd.f32 %v129_v23, %v46_v22  ;;  %v135_v26 = vadd.f32 %v134_v24, %v56_v21 }
  0xa9   :  { %138 = vst [vmem:[%s284_s3 + $0x8] sm:$0xff] %v130_v25 }
  0xaa   :  { %140 = vst [vmem:[%s284_s3 + $0x18] sm:$0xff] %v135_v26 }

// kernel: deeplabv3plus_forward.28
= control target key start
LH: loop header
LB: loop body
LE: loop exit
PB: predicated region body
PF: predicated region fallthrough
CT: control target
= control target key end

     0   :  { %vm40_vm0 = vcmask 31744   ;;  %vm105_vm1 = vcmask 7168   ;;  %s279_s0 = inlined_call_operand.vmem [shape: bf16[128,4], index: 0, kind: input, shape index: {}]   ;;  %s280_s1 = inlined_call_operand.vmem [shape: f32[128,1], index: 1, kind: output, shape index: {}]  }
   0x1   :  { %v127_v0 = vld [vmem:[%s279_s0] sm:$0xff]   ;;  %v159_v1 = vld [vmem:[%s279_s0 + $0x10] sm:$0xff]   ;;  %v158_v2 = vld [vmem:[%s279_s0 + $0x8] sm:$0xff]  }
   0x2   :  { %v128_v3 = vunpack.c.l.bf16 %v127_v0  ;;  %v136_v4 = vunpack.c.l.bf16 %v159_v1  ;;  %v132_v5 = vunpack.c.l.bf16 %v158_v2  ;;  %v129_v9 = vunpack.c.h.bf16 %v127_v0  ;;  %v160_v15 = vld [vmem:[%s279_s0 + $0x18] sm:$0xff]   ;;  %v161_v16 = vld [vmem:[%s279_s0 + $0x20] sm:$0xff]   ;;  %v162_v23 = vld [vmem:[%s279_s0 + $0x28] sm:$0xff]  }
   0x3   :  { %v137_v10 = vunpack.c.h.bf16 %v159_v1  ;;  %v133_v11 = vunpack.c.h.bf16 %v158_v2  ;;  %v140_v17 = vunpack.c.l.bf16 %v160_v15  ;;  %v144_v18 = vunpack.c.l.bf16 %v161_v16  ;;  %v163_v30 = vld [vmem:[%s279_s0 + $0x30] sm:$0xff]   ;;  %v164_v31 = vld [vmem:[%s279_s0 + $0x38] sm:$0xff]  }
   0x4   :  { %v41_v6 = vsel %vm40_vm0, %v128_v3, 0.0  ;;  %v53_v7 = vsel %vm40_vm0, %v136_v4, 0.0  ;;  %v47_v8 = vsel %vm40_vm0, %v132_v5, 0.0  ;;  %v44_v12 = vsel %vm40_vm0, %v129_v9, 0.0 }
   0x5   :  { %42 = vadd.xlane.f32.xlu0 %v41_v6  ;;  %54 = vadd.xlane.f32.xlu2 %v53_v7  ;;  %v56_v13 = vsel %vm40_vm0, %v137_v10, 0.0  ;;  %v50_v14 = vsel %vm40_vm0, %v133_v11, 0.0  ;;  %v141_v19 = vunpack.c.h.bf16 %v160_v15  ;;  %v59_v20 = vsel %vm40_vm0, %v140_v17, 0.0 }
   0x6   :  { %48 = vadd.xlane.f32.xlu1 %v47_v8  ;;  %v65_v21 = vsel %vm40_vm0, %v144_v18, 0.0  ;;  %v145_v24 = vunpack.c.h.bf16 %v161_v16  ;;  %v149_v25 = vunpack.c.h.bf16 %v162_v23  ;;  %v148_v26 = vunpack.c.l.bf16 %v162_v23 }
   0x7   :  { %v62_v22 = vsel %vm40_vm0, %v141_v19, 0.0  ;;  %v152_v32 = vunpack.c.l.bf16 %v163_v30  ;;  %v156_v33 = vunpack.c.l.bf16 %v164_v31  ;;  %v153_v34 = vunpack.c.h.bf16 %v163_v30 }
   0x8   :  { %v68_v27 = vsel %vm40_vm0, %v145_v24, 0.0  ;;  %v74_v28 = vsel %vm40_vm0, %v149_v25, 0.0  ;;  %v71_v29 = vsel %vm40_vm0, %v148_v26, 0.0  ;;  %v157_v38 = vunpack.c.h.bf16 %v164_v31 }
   0x9   :  { %v77_v35 = vsel %vm40_vm0, %v152_v32, 0.0  ;;  %v83_v36 = vsel %vm40_vm0, %v156_v33, 0.0  ;;  %v80_v37 = vsel %vm40_vm0, %v153_v34, 0.0 }
   0xa   :  { %v86_v39 = vsel %vm40_vm0, %v157_v38, 0.0 }
   0xd   :  { %45 = vadd.xlane.f32.xlu0 %v44_v12  ;;  %57 = vadd.xlane.f32.xlu2 %v56_v13 }
   0xe   :  { %51 = vadd.xlane.f32.xlu1 %v50_v14 }
  0x15   :  { %60 = vadd.xlane.f32.xlu0 %v59_v20  ;;  %66 = vadd.xlane.f32.xlu2 %v65_v21 }
  0x16   :  { %63 = vadd.xlane.f32.xlu1 %v62_v22 }
  0x1d   :  { %69 = vadd.xlane.f32.xlu0 %v68_v27  ;;  %75 = vadd.xlane.f32.xlu2 %v74_v28 }
  0x1e   :  { %72 = vadd.xlane.f32.xlu1 %v71_v29 }
  0x25   :  { %78 = vadd.xlane.f32.xlu0 %v77_v35  ;;  %84 = vadd.xlane.f32.xlu2 %v83_v36 }
  0x26   :  { %81 = vadd.xlane.f32.xlu1 %v80_v37 }
  0x2d   :  { %87 = vadd.xlane.f32.xlu0 %v86_v39 }
  0x78   :  { %v43_v40 = vpop.xlane.xlu0 %42  ;;  %v55_v41 = vpop.xlane.xlu2 %54 }
  0x79   :  { %v89_v42 = vmul.f32 0.25, %v43_v40  ;;  %v93_v43 = vmul.f32 0.25, %v55_v41  ;;  %v49_v44 = vpop.xlane.xlu1 %48 }
  0x7a   :  { %v91_v45 = vmul.f32 0.25, %v49_v44 }
  0x7b   :  { %106 = vst.msk [vmem:[%s280_s1] sm:$0xff] %vm105_vm1, %v89_v42 }
  0x7c   :  { %110 = vst.msk [vmem:[%s280_s1 + $0x20] sm:$0xff] %vm105_vm1, %v93_v43 }
  0x7d   :  { %108 = vst.msk [vmem:[%s280_s1 + $0x10] sm:$0xff] %vm105_vm1, %v91_v45 }
  0x80   :  { %v46_v46 = vpop.xlane.xlu0 %45  ;;  %v58_v47 = vpop.xlane.xlu2 %57 }
  0x81   :  { %v90_v48 = vmul.f32 0.25, %v46_v46  ;;  %v94_v49 = vmul.f32 0.25, %v58_v47  ;;  %v52_v50 = vpop.xlane.xlu1 %51 }
  0x82   :  { %v92_v51 = vmul.f32 0.25, %v52_v50 }
  0x83   :  { %107 = vst.msk [vmem:[%s280_s1 + $0x8] sm:$0xff] %vm105_vm1, %v90_v48 }
  0x84   :  { %111 = vst.msk [vmem:[%s280_s1 + $0x28] sm:$0xff] %vm105_vm1, %v94_v49 }
  0x85   :  { %109 = vst.msk [vmem:[%s280_s1 + $0x18] sm:$0xff] %vm105_vm1, %v92_v51 }
  0x88   :  { %v61_v52 = vpop.xlane.xlu0 %60  ;;  %v67_v53 = vpop.xlane.xlu2 %66 }
  0x89   :  { %v95_v54 = vmul.f32 0.25, %v61_v52  ;;  %v97_v55 = vmul.f32 0.25, %v67_v53  ;;  %v64_v56 = vpop.xlane.xlu1 %63 }
  0x8a   :  { %v96_v57 = vmul.f32 0.25, %v64_v56 }
  0x8b   :  { %112 = vst.msk [vmem:[%s280_s1 + $0x30] sm:$0xff] %vm105_vm1, %v95_v54 }
  0x8c   :  { %114 = vst.msk [vmem:[%s280_s1 + $0x40] sm:$0xff] %vm105_vm1, %v97_v55 }
  0x8d   :  { %113 = vst.msk [vmem:[%s280_s1 + $0x38] sm:$0xff] %vm105_vm1, %v96_v57 }
  0x90   :  { %v70_v58 = vpop.xlane.xlu0 %69  ;;  %v76_v59 = vpop.xlane.xlu2 %75 }
  0x91   :  { %v98_v60 = vmul.f32 0.25, %v70_v58  ;;  %v100_v61 = vmul.f32 0.25, %v76_v59  ;;  %v73_v62 = vpop.xlane.xlu1 %72 }
  0x92   :  { %v99_v63 = vmul.f32 0.25, %v73_v62 }
  0x93   :  { %115 = vst.msk [vmem:[%s280_s1 + $0x48] sm:$0xff] %vm105_vm1, %v98_v60 }
  0x94   :  { %117 = vst.msk [vmem:[%s280_s1 + $0x58] sm:$0xff] %vm105_vm1, %v100_v61 }
  0x95   :  { %116 = vst.msk [vmem:[%s280_s1 + $0x50] sm:$0xff] %vm105_vm1, %v99_v63 }
  0x98   :  { %v79_v0 = vpop.xlane.xlu0 %78  ;;  %v85_v1 = vpop.xlane.xlu2 %84 }
  0x99   :  { %v101_v2 = vmul.f32 0.25, %v79_v0  ;;  %v103_v3 = vmul.f32 0.25, %v85_v1  ;;  %v82_v4 = vpop.xlane.xlu1 %81 }
  0x9a   :  { %v102_v5 = vmul.f32 0.25, %v82_v4 }
  0x9b   :  { %118 = vst.msk [vmem:[%s280_s1 + $0x60] sm:$0xff] %vm105_vm1, %v101_v2 }
  0x9c   :  { %120 = vst.msk [vmem:[%s280_s1 + $0x70] sm:$0xff] %vm105_vm1, %v103_v3 }
  0x9d   :  { %119 = vst.msk [vmem:[%s280_s1 + $0x68] sm:$0xff] %vm105_vm1, %v102_v5 }
  0xa0   :  { %v88_v6 = vpop.xlane.xlu0 %87 }
  0xa1   :  { %v104_v7 = vmul.f32 0.25, %v88_v6 }
  0xa3   :  { %121 = vst.msk [vmem:[%s280_s1 + $0x78] sm:$0xff] %vm105_vm1, %v104_v7 }

// kernel: deeplabv3plus_forward.31
= control target key start
LH: loop header
LB: loop body
LE: loop exit
PB: predicated region body
PF: predicated region fallthrough
CT: control target
= control target key end

     0   :  { %v86_v1 = vmov 0   ;;  %vm42_vm0 = vcmask 130048   ;;  %s122_s1 = inlined_call_operand.vmem [shape: bf16[16,128], index: 1, kind: input, shape index: {}]   ;;  %s123_s0 = inlined_call_operand.vmem [shape: bf16[16,16], index: 0, kind: input, shape index: {}]   ;;  %s124_s2 = inlined_call_operand.vmem [shape: f32[16,1], index: 2, kind: input, shape index: {}]   ;;  %s125_s3 = inlined_call_operand.vmem [shape: bf16[16,128], index: 3, kind: output, shape index: {}]  }
   0x1   :  { %v78_v0 = vld [vmem:[%s122_s1] sm:$0xff]  ;;  %85 = vset.pattern.permute.xlu0 %v86_v1  ;;  %v20_v4 = vld [vmem:[%s124_s2 + $0x8] sm:$0xff] }
   0x2   :  { %v19_v2 = vld [vmem:[%s124_s2] sm:$0xff]  ;;  %53 = vmatpush.bf16.msra.mxu0 %v78_v0 }
   0x3   :  { %v77_v3 = vld [vmem:[%s123_s0] sm:$0xff]  ;;  %23 = vperm.xlu0 %85, %v19_v2  }
   0x5   :  { %76 = vmatmul.msk.bf16.vlgmr.msra.gmra.mxu0 %vm42_vm0, %v77_v3 }
   0xb   :  { %28 = vperm.xlu0 %85, %v20_v4  }
  0x75   :  { %v24_v5 = vpop.permute.xlu0 %23 }
  0x7d   :  { %v29_v7 = vpop.permute.xlu0 %28 }
  0x82   :  { %v55_v6 = vpop.f32.mrf.mxu0 }
  0x83   :  { %v56_v9 = vadd.f32 %v55_v6, %v24_v5 }
  0x8a   :  { %v57_v8 = vpop.f32.mrf.mxu0 }
  0x8b   :  { %v58_v10 = vadd.f32 %v57_v8, %v29_v7 }
  0x8d   :  { %v82_v11 = vpack.c.bf16 %v58_v10, %v56_v9 }
  0x8f   :  { %83 = vst [vmem:[%s125_s3] sm:$0xff] %v82_v11  }

// kernel: deeplabv3plus_forward.32
= control target key start
LH: loop header
LB: loop body
LE: loop exit
PB: predicated region body
PF: predicated region fallthrough
CT: control target
= control target key end

     0   :  { %v161_v3 = vmov 0   ;;  %vm58_vm0 = vcmask 130048   ;;  %s227_s1 = inlined_call_operand.vmem [shape: bf16[16,512], index: 1, kind: input, shape index: {}]   ;;  %s228_s0 = inlined_call_operand.vmem [shape: bf16[16,16], index: 0, kind: input, shape index: {}]   ;;  %s229_s2 = inlined_call_operand.vmem [shape: f32[16,1], index: 2, kind: input, shape index: {}]   ;;  %s230_s3 = inlined_call_operand.vmem [shape: bf16[16,512], index: 3, kind: output, shape index: {}]  }
   0x1   :  { %v136_v0 = vld [vmem:[%s227_s1] sm:$0xf]  ;;  %v157_v1 = vld [vmem:[%s227_s1 + $0xc] sm:$0xf0]  ;;  %v155_v2 = vld [vmem:[%s227_s1 + $0x4] sm:$0xf]  ;;  %160 = vset.pattern.permute.xlu0 %v161_v3 }
   0x2   :  { %v137_v4 = vor.u32 %v157_v1, %v136_v0  ;;  %v138_v5 = vld [vmem:[%s227_s1 + $0x10] sm:$0xf0]  ;;  %v144_v6 = vld [vmem:[%s227_s1 + $0x8] sm:$0xf]  ;;  %v158_v7 = vld [vmem:[%s227_s1 + $0x14] sm:$0xf0] }
   0x3   :  { %v141_v8 = vor.u32 %v155_v2, %v138_v5  ;;  %v145_v9 = vor.u32 %v158_v7, %v144_v6  ;;  %v156_v10 = vld [vmem:[%s227_s1 + $0xc] sm:$0xf]  ;;  %v146_v11 = vld [vmem:[%s227_s1 + $0x18] sm:$0xf0]  ;;  %v154_v12 = vld [vmem:[%s228_s0] sm:$0xff] }
   0x4   :  { %69 = vmatpush.bf16.msra.mxu0 %v137_v4  ;;  %v149_v13 = vor.u32 %v156_v10, %v146_v11  ;;  %v21_v14 = vld [vmem:[%s229_s2] sm:$0xff]  ;;  %v22_v15 = vld [vmem:[%s229_s2 + $0x8] sm:$0xff] }
   0x5   :  { %83 = vmatpush.bf16.msra.mxu1 %v141_v8  ;;  %97 = vmatpush.bf16.msra.mxu2 %v145_v9 }
   0x6   :  { %111 = vmatpush.bf16.msra.mxu3 %v149_v13  ;;  %25 = vperm.xlu0 %160, %v21_v14  }
   0x7   :  { %150 = vmatmul.msk.bf16.vlgmr.msra.gmra.mxu0 %vm58_vm0, %v154_v12 }
   0x8   :  { %151 = vmatmul.msk.bf16.vlgmr.msra.gmra.mxu1 %vm58_vm0, %v154_v12  ;;  %152 = vmatmul.msk.bf16.vlgmr.msra.gmra.mxu2 %vm58_vm0, %v154_v12 }
   0x9   :  { %153 = vmatmul.msk.bf16.vlgmr.msra.gmra.mxu3 %vm58_vm0, %v154_v12 }
   0xe   :  { %30 = vperm.xlu0 %160, %v22_v15  }
  0x78   :  { %v26_v16 = vpop.permute.xlu0 %25 }
  0x80   :  { %v31_v22 = vpop.permute.xlu0 %30 }
  0x84   :  { %v71_v17 = vpop.f32.mrf.mxu0 }
  0x85   :  { %v72_v18 = vadd.f32 %v71_v17, %v26_v16  ;;  %v85_v19 = vpop.f32.mrf.mxu1 }
  0x86   :  { %v86_v20 = vadd.f32 %v85_v19, %v26_v16 }
  0x88   :  { %v118_v21 = vpack.c.bf16 %v86_v20, %v72_v18 }
  0x8a   :  { %122 = vst [vmem:[%s230_s3] sm:$0xff] %v118_v21 }
  0x8b   :  { %v99_v23 = vpop.f32.mrf.mxu2 }
  0x8c   :  { %v100_v24 = vadd.f32 %v99_v23, %v26_v16  ;;  %v113_v25 = vpop.f32.mrf.mxu3  ;;  %v73_v26 = vpop.f32.mrf.mxu0 }
  0x8d   :  { %v114_v27 = vadd.f32 %v113_v25, %v26_v16  ;;  %v74_v28 = vadd.f32 %v73_v26, %v31_v22  ;;  %v87_v29 = vpop.f32.mrf.mxu1 }
  0x8e   :  { %v88_v30 = vadd.f32 %v87_v29, %v31_v22 }
  0x8f   :  { %v119_v31 = vpack.c.bf16 %v114_v27, %v100_v24 }
  0x90   :  { %v120_v32 = vpack.c.bf16 %v88_v30, %v74_v28 }
  0x91   :  { %123 = vst [vmem:[%s230_s3 + $0x8] sm:$0xff] %v119_v31 }
  0x92   :  { %124 = vst [vmem:[%s230_s3 + $0x10] sm:$0xff] %v120_v32 }
  0x93   :  { %v101_v33 = vpop.f32.mrf.mxu2 }
  0x94   :  { %v102_v34 = vadd.f32 %v101_v33, %v31_v22  ;;  %v115_v35 = vpop.f32.mrf.mxu3 }
  0x95   :  { %v116_v36 = vadd.f32 %v115_v35, %v31_v22 }
  0x97   :  { %v121_v37 = vpack.c.bf16 %v116_v36, %v102_v34 }
  0x99   :  { %125 = vst [vmem:[%s230_s3 + $0x18] sm:$0xff] %v121_v37 }

// kernel: deeplabv3plus_forward.33
= control target key start
LH: loop header
LB: loop body
LE: loop exit
PB: predicated region body
PF: predicated region fallthrough
CT: control target
= control target key end

     0   :  { %v101_v1 = vmov 0   ;;  %vm50_vm0 = vcmask 261120   ;;  %s140_s1 = inlined_call_operand.vmem [shape: bf16[32,128], index: 1, kind: input, shape index: {}]   ;;  %s141_s2 = inlined_call_operand.vmem [shape: f32[16,1], index: 2, kind: input, shape index: {}]   ;;  %s142_s0 = inlined_call_operand.vmem [shape: bf16[16,32], index: 0, kind: input, shape index: {}]   ;;  %s143_s3 = inlined_call_operand.vmem [shape: bf16[16,128], index: 3, kind: output, shape index: {}]  }
   0x1   :  { %v93_v0 = vld [vmem:[%s140_s1 + $0x8] sm:$0xff]  ;;  %100 = vset.pattern.permute.xlu0 %v101_v1  ;;  %v21_v2 = vld [vmem:[%s141_s2] sm:$0xff] }
   0x2   :  { %60 = vmatpush.bf16.msra.mxu0 %v93_v0  ;;  %v92_v3 = vld [vmem:[%s140_s1] sm:$0xff]  ;;  %25 = vperm.xlu0 %100, %v21_v2   ;;  %v22_v5 = vld [vmem:[%s141_s2 + $0x8] sm:$0xff] }
   0x3   :  { %v91_v4 = vld [vmem:[%s142_s0] sm:$0xff] }
   0x6   :  { %61 = vmatpush.bf16.msra.mxu0 %v92_v3 }
   0x9   :  { %90 = vmatmul.msk.bf16.vlgmr.msra.gmra.mxu0 %vm50_vm0, %v91_v4 }
   0xa   :  { %30 = vperm.xlu0 %100, %v22_v5  }
  0x74   :  { %v26_v6 = vpop.permute.xlu0 %25 }
  0x7c   :  { %v31_v9 = vpop.permute.xlu0 %30 }
  0x86   :  { %v63_v7 = vpop.f32.mrf.mxu0 }
  0x87   :  { %v64_v8 = vadd.f32 %v63_v7, %v26_v6 }
  0x89   :  { %v68_v12 = vmax.f32 %v64_v8, 0.0 }
  0x8e   :  { %v65_v10 = vpop.f32.mrf.mxu0 }
  0x8f   :  { %v66_v11 = vadd.f32 %v65_v10, %v31_v9 }
  0x91   :  { %v69_v13 = vmax.f32 %v66_v11, 0.0 }
  0x93   :  { %v97_v14 = vpack.c.bf16 %v69_v13, %v68_v12 }
  0x95   :  { %98 = vst [vmem:[%s143_s3] sm:$0xff] %v97_v14  }

// kernel: deeplabv3plus_forward.34
= control target key start
LH: loop header
LB: loop body
LE: loop exit
PB: predicated region body
PF: predicated region fallthrough
CT: control target
= control target key end

     0   :  { %v565_v6 = vmov 0   ;;  %vm285_vm0 = vcmask 130048   ;;  %s729_s1 = inlined_call_operand.vmem [shape: bf16[400,128], index: 1, kind: input, shape index: {}]   ;;  %s730_s0 = inlined_call_operand.vmem [shape: bf16[32,400], index: 0, kind: input, shape index: {}]   ;;  %s731_s2 = inlined_call_operand.vmem [shape: f32[32,1], index: 2, kind: input, shape index: {}]   ;;  %s732_s3 = inlined_call_operand.vmem [shape: bf16[32,128], index: 3, kind: output, shape index: {}]  }
   0x1   :  { %v533_v0 = vld [vmem:[%s729_s1 + $0x38] sm:$0xff]  ;;  %v532_v3 = vld [vmem:[%s729_s1 + $0x30] sm:$0xff]  ;;  %563 = vset.pattern.permute.xlu0 %v565_v6  ;;  %564 = vset.pattern.permute.xlu1 %v565_v6  ;;  %v531_v7 = vld [vmem:[%s729_s1 + $0x28] sm:$0xff] }
   0x2   :  { %v541_v1 = vld [vmem:[%s729_s1 + $0x78] sm:$0xff]  ;;  %292 = vmatpush.bf16.msra.mxu0 %v533_v0  ;;  %v540_v4 = vld [vmem:[%s729_s1 + $0x70] sm:$0xff]  ;;  %v539_v8 = vld [vmem:[%s729_s1 + $0x68] sm:$0xff] }
   0x3   :  { %v549_v2 = vld [vmem:[%s729_s1 + $0xb8] sm:$0xff]  ;;  %311 = vmatpush.bf16.msra.mxu1 %v541_v1  ;;  %v548_v5 = vld [vmem:[%s729_s1 + $0xb0] sm:$0xff]  ;;  %v550_v9 = vld [vmem:[%s729_s1 + $0xc0] sm:$0xff] }
   0x4   :  { %330 = vmatpush.bf16.msra.mxu2 %v549_v2  ;;  %v547_v10 = vld [vmem:[%s729_s1 + $0xa8] sm:$0xff]  ;;  %v396_v12 = vld [vmem:[%s730_s0 + $0x18] sm:$0xf0]  ;;  %356 = vmatpush.bf16.msra.mxu3 %v550_v9  ;;  %v530_v14 = vld [vmem:[%s729_s1 + $0x20] sm:$0xff] }
   0x5   :  { %v519_v11 = vld [vmem:[%s730_s0 + $0xc] sm:$0xf]  ;;  %v538_v15 = vld [vmem:[%s729_s1 + $0x60] sm:$0xff]  ;;  %v529_v18 = vld [vmem:[%s729_s1 + $0x18] sm:$0xff] }
   0x6   :  { %293 = vmatpush.bf16.msra.mxu0 %v532_v3  ;;  %v399_v13 = vor.u32 %v519_v11, %v396_v12  ;;  %v546_v16 = vld [vmem:[%s729_s1 + $0xa0] sm:$0xff]  ;;  %v537_v19 = vld [vmem:[%s729_s1 + $0x58] sm:$0xff]  ;;  %v528_v21 = vld [vmem:[%s729_s1 + $0x10] sm:$0xff] }
   0x7   :  { %312 = vmatpush.bf16.msra.mxu1 %v540_v4  ;;  %v73_v17 = vld [vmem:[%s731_s2] sm:$0xff]  ;;  %v545_v20 = vld [vmem:[%s729_s1 + $0x98] sm:$0xff]  ;;  %v536_v22 = vld [vmem:[%s729_s1 + $0x50] sm:$0xff] }
   0x8   :  { %331 = vmatpush.bf16.msra.mxu2 %v548_v5  ;;  %516 = vmatmul.msk.bf16.vlgmr.msra.gmra.mxu3 %vm285_vm0, %v399_v13  ;;  %v74_v23 = vld [vmem:[%s731_s2 + $0x8] sm:$0xff]  ;;  %v75_v24 = vld [vmem:[%s731_s2 + $0x10] sm:$0xff]  ;;  %v412_v27 = vld [vmem:[%s730_s0 + $0x38] sm:$0xf0] }
   0x9   :  { %79 = vperm.xlu0 %563, %v73_v17   ;;  %v544_v25 = vld [vmem:[%s729_s1 + $0x90] sm:$0xff]  ;;  %89 = vperm.xlu1 %564, %v75_v24   ;;  %v523_v26 = vld [vmem:[%s730_s0 + $0x2c] sm:$0xf]  ;;  %v526_v32 = vld [vmem:[%s729_s1] sm:$0xff] }
   0xa   :  { %294 = vmatpush.bf16.msra.mxu0 %v531_v7  ;;  %v527_v28 = vld [vmem:[%s729_s1 + $0x8] sm:$0xff]  ;;  %v415_v31 = vor.u32 %v523_v26, %v412_v27  ;;  %v534_v33 = vld [vmem:[%s729_s1 + $0x40] sm:$0xff]  ;;  %v76_v35 = vld [vmem:[%s731_s2 + $0x18] sm:$0xff] }
   0xb   :  { %313 = vmatpush.bf16.msra.mxu1 %v539_v8  ;;  %v535_v29 = vld [vmem:[%s729_s1 + $0x48] sm:$0xff]  ;;  %v386_v34 = vld [vmem:[%s730_s0] sm:$0xf]  ;;  %v520_v36 = vld [vmem:[%s730_s0 + $0xc] sm:$0xf0] }
   0xc   :  { %332 = vmatpush.bf16.msra.mxu2 %v547_v10  ;;  %v543_v30 = vld [vmem:[%s729_s1 + $0x88] sm:$0xff]  ;;  %v518_v37 = vld [vmem:[%s730_s0 + $0x4] sm:$0xf]  ;;  %v388_v38 = vld [vmem:[%s730_s0 + $0x10] sm:$0xf0]  ;;  %v387_v42 = vor.u32 %v520_v36, %v386_v34 }
   0xd   :  { %v542_v39 = vld [vmem:[%s729_s1 + $0x80] sm:$0xff]  ;;  %v394_v40 = vld [vmem:[%s730_s0 + $0x8] sm:$0xf]  ;;  %v521_v41 = vld [vmem:[%s730_s0 + $0x14] sm:$0xf0]  ;;  %v391_v43 = vor.u32 %v518_v37, %v388_v38 }
   0xe   :  { %295 = vmatpush.bf16.msra.mxu0 %v530_v14  ;;  %v395_v44 = vor.u32 %v521_v41, %v394_v40  ;;  %v402_v45 = vld [vmem:[%s730_s0 + $0x20] sm:$0xf]  ;;  %v524_v46 = vld [vmem:[%s730_s0 + $0x2c] sm:$0xf0]  ;;  %v522_v47 = vld [vmem:[%s730_s0 + $0x24] sm:$0xf] }
   0xf   :  { %314 = vmatpush.bf16.msra.mxu1 %v538_v15  ;;  %v404_v48 = vld [vmem:[%s730_s0 + $0x30] sm:$0xf0]  ;;  %v410_v49 = vld [vmem:[%s730_s0 + $0x28] sm:$0xf]  ;;  %v525_v50 = vld [vmem:[%s730_s0 + $0x34] sm:$0xf0]  ;;  %v403_v51 = vor.u32 %v524_v46, %v402_v45 }
  0x10   :  { %333 = vmatpush.bf16.msra.mxu2 %v546_v16  ;;  %v407_v52 = vor.u32 %v522_v47, %v404_v48  ;;  %v411_v53 = vor.u32 %v525_v50, %v410_v49 }
  0x11   :  { %84 = vperm.xlu0 %563, %v74_v23   ;;  %94 = vperm.xlu1 %564, %v76_v35  }
  0x12   :  { %296 = vmatpush.bf16.msra.mxu0 %v529_v18 }
  0x13   :  { %315 = vmatpush.bf16.msra.mxu1 %v537_v19 }
  0x14   :  { %334 = vmatpush.bf16.msra.mxu2 %v545_v20 }
  0x16   :  { %297 = vmatpush.bf16.msra.mxu0 %v528_v21 }
  0x17   :  { %316 = vmatpush.bf16.msra.mxu1 %v536_v22 }
  0x18   :  { %335 = vmatpush.bf16.msra.mxu2 %v544_v25  ;;  %517 = vmatmul.msk.bf16.gmra.mxu3 %vm285_vm0, %v415_v31 }
  0x1a   :  { %298 = vmatpush.bf16.msra.mxu0 %v527_v28 }
  0x1b   :  { %317 = vmatpush.bf16.msra.mxu1 %v535_v29 }
  0x1c   :  { %336 = vmatpush.bf16.msra.mxu2 %v543_v30 }
  0x1e   :  { %299 = vmatpush.bf16.msra.mxu0 %v526_v32 }
  0x1f   :  { %318 = vmatpush.bf16.msra.mxu1 %v534_v33 }
  0x20   :  { %337 = vmatpush.bf16.msra.mxu2 %v542_v39 }
  0x21   :  { %300 = vmatmul.bf16.vlgmr.msra.gmra.mxu0 %v387_v42 }
  0x22   :  { %319 = vmatmul.bf16.vlgmr.msra.gmra.mxu1 %v391_v43 }
  0x23   :  { %338 = vmatmul.bf16.vlgmr.msra.gmra.mxu2 %v395_v44 }
  0x31   :  { %305 = vmatmul.bf16.gmra.mxu0 %v403_v51 }
  0x32   :  { %324 = vmatmul.bf16.gmra.mxu1 %v407_v52 }
  0x33   :  { %343 = vmatmul.bf16.gmra.mxu2 %v411_v53 }
  0x7b   :  { %v80_v54 = vpop.permute.xlu0 %79  ;;  %v90_v4 = vpop.permute.xlu1 %89 }
  0x83   :  { %v85_v60 = vpop.permute.xlu0 %84  ;;  %v95_v19 = vpop.permute.xlu1 %94 }
  0x8b   :  { %v358_v57 = vpop.f32.mrf.mxu3 }
  0x93   :  { %v360_v2 = vpop.f32.mrf.mxu3 }
  0x9b   :  { %v363_v15 = vpop.f32.mrf.mxu3 }
  0x9e   :  { %v301_v55 = vpop.f32.mrf.mxu0 }
  0x9f   :  { %v320_v56 = vpop.f32.mrf.mxu1  ;;  %v302_v58 = vadd.f32 %v301_v55, %v80_v54 }
  0xa1   :  { %v321_v61 = vadd.f32 %v320_v56, %v302_v58 }
  0xa3   :  { %v365_v27 = vpop.f32.mrf.mxu3 }
  0xa6   :  { %v339_v59 = vpop.f32.mrf.mxu2  ;;  %v303_v62 = vpop.f32.mrf.mxu0 }
  0xa7   :  { %v322_v63 = vpop.f32.mrf.mxu1  ;;  %v304_v0 = vadd.f32 %v303_v62, %v85_v60  ;;  %v340_v1 = vadd.f32 %v339_v59, %v321_v61 }
  0xa9   :  { %v323_v3 = vadd.f32 %v322_v63, %v304_v0  ;;  %v359_v6 = vadd.f32 %v358_v57, %v340_v1 }
  0xab   :  { %v368_v11 = vmax.f32 %v359_v6, 0.0 }
  0xae   :  { %v341_v5 = vpop.f32.mrf.mxu2  ;;  %v306_v8 = vpop.f32.mrf.mxu0 }
  0xaf   :  { %v342_v7 = vadd.f32 %v341_v5, %v323_v3  ;;  %v325_v10 = vpop.f32.mrf.mxu1  ;;  %v307_v13 = vadd.f32 %v306_v8, %v90_v4 }
  0xb1   :  { %v361_v9 = vadd.f32 %v360_v2, %v342_v7  ;;  %v326_v17 = vadd.f32 %v325_v10, %v307_v13 }
  0xb3   :  { %v369_v12 = vmax.f32 %v361_v9, 0.0 }
  0xb5   :  { %v554_v14 = vpack.c.bf16 %v369_v12, %v368_v11 }
  0xb6   :  { %v344_v16 = vpop.f32.mrf.mxu2  ;;  %v308_v18 = vpop.f32.mrf.mxu0 }
  0xb7   :  { %555 = vst [vmem:[%s732_s3] sm:$0xff] %v554_v14   ;;  %v309_v20 = vadd.f32 %v308_v18, %v95_v19  ;;  %v345_v21 = vadd.f32 %v344_v16, %v326_v17  ;;  %v327_v22 = vpop.f32.mrf.mxu1 }
  0xb9   :  { %v328_v23 = vadd.f32 %v327_v22, %v309_v20  ;;  %v364_v25 = vadd.f32 %v363_v15, %v345_v21 }
  0xbb   :  { %v370_v29 = vmax.f32 %v364_v25, 0.0 }
  0xbe   :  { %v346_v24 = vpop.f32.mrf.mxu2 }
  0xbf   :  { %v347_v26 = vadd.f32 %v346_v24, %v328_v23 }
  0xc1   :  { %v366_v28 = vadd.f32 %v365_v27, %v347_v26 }
  0xc3   :  { %v371_v30 = vmax.f32 %v366_v28, 0.0 }
  0xc5   :  { %v559_v31 = vpack.c.bf16 %v371_v30, %v370_v29 }
  0xc7   :  { %561 = vst [vmem:[%s732_s3 + $0x8] sm:$0xff] %v559_v31  }

// kernel: deeplabv3plus_forward.35
= control target key start
LH: loop header
LB: loop body
LE: loop exit
PB: predicated region body
PF: predicated region fallthrough
CT: control target
= control target key end

     0   :  { %v445_v5 = vmov 0   ;;  %vm221_vm0 = vcmask 261120   ;;  %s576_s1 = inlined_call_operand.vmem [shape: bf16[288,128], index: 1, kind: input, shape index: {}]   ;;  %s577_s0 = inlined_call_operand.vmem [shape: bf16[32,288], index: 0, kind: input, shape index: {}]   ;;  %s578_s2 = inlined_call_operand.vmem [shape: f32[32,1], index: 2, kind: input, shape index: {}]   ;;  %s579_s3 = inlined_call_operand.vmem [shape: bf16[32,128], index: 3, kind: output, shape index: {}]  }
   0x1   :  { %v412_v0 = vld [vmem:[%s576_s1 + $0x38] sm:$0xff]  ;;  %v411_v2 = vld [vmem:[%s576_s1 + $0x30] sm:$0xff]  ;;  %v422_v3 = vld [vmem:[%s576_s1 + $0x88] sm:$0xff]  ;;  %443 = vset.pattern.permute.xlu0 %v445_v5  ;;  %444 = vset.pattern.permute.xlu1 %v445_v5 }
   0x2   :  { %v420_v1 = vld [vmem:[%s576_s1 + $0x78] sm:$0xff]  ;;  %228 = vmatpush.bf16.msra.mxu0 %v412_v0  ;;  %434 = vmatpush.bf16.msra.mxu3 %v412_v0  ;;  %v419_v4 = vld [vmem:[%s576_s1 + $0x70] sm:$0xff]  ;;  %v421_v6 = vld [vmem:[%s576_s1 + $0x80] sm:$0xff] }
   0x3   :  { %247 = vmatpush.bf16.msra.mxu1 %v420_v1  ;;  %272 = vmatpush.bf16.msra.mxu2 %v422_v3  ;;  %v311_v7 = vld [vmem:[%s577_s0 + $0x8] sm:$0xf]  ;;  %v401_v8 = vld [vmem:[%s577_s0 + $0x10] sm:$0xf0]  ;;  %v59_v12 = vld [vmem:[%s578_s2] sm:$0xff] }
   0x4   :  { %v410_v9 = vld [vmem:[%s576_s1 + $0x28] sm:$0xff]  ;;  %v312_v11 = vor.u32 %v401_v8, %v311_v7  ;;  %v409_v13 = vld [vmem:[%s576_s1 + $0x20] sm:$0xff]  ;;  %65 = vperm.xlu0 %443, %v59_v12   ;;  %v408_v15 = vld [vmem:[%s576_s1 + $0x18] sm:$0xff] }
   0x5   :  { %v418_v10 = vld [vmem:[%s576_s1 + $0x68] sm:$0xff]  ;;  %v417_v14 = vld [vmem:[%s576_s1 + $0x60] sm:$0xff]  ;;  %v416_v16 = vld [vmem:[%s576_s1 + $0x58] sm:$0xff] }
   0x6   :  { %229 = vmatpush.bf16.msra.mxu0 %v411_v2  ;;  %435 = vmatpush.bf16.msra.mxu3 %v411_v2  ;;  %v407_v17 = vld [vmem:[%s576_s1 + $0x10] sm:$0xff]  ;;  %v60_v19 = vld [vmem:[%s578_s2 + $0x8] sm:$0xff]  ;;  %v323_v21 = vld [vmem:[%s577_s0 + $0x20] sm:$0xf] }
   0x7   :  { %248 = vmatpush.bf16.msra.mxu1 %v419_v4  ;;  %273 = vmatpush.bf16.msra.mxu2 %v421_v6  ;;  %v61_v18 = vld [vmem:[%s578_s2 + $0x10] sm:$0xff]  ;;  %v404_v22 = vld [vmem:[%s577_s0 + $0x28] sm:$0xf0]  ;;  %v405_v26 = vld [vmem:[%s576_s1] sm:$0xff] }
   0x8   :  { %v415_v20 = vld [vmem:[%s576_s1 + $0x50] sm:$0xff]  ;;  %75 = vperm.xlu1 %444, %v61_v18   ;;  %v406_v23 = vld [vmem:[%s576_s1 + $0x8] sm:$0xff]  ;;  %v324_v25 = vor.u32 %v404_v22, %v323_v21  ;;  %v303_v27 = vld [vmem:[%s577_s0] sm:$0xf] }
   0x9   :  { %v414_v24 = vld [vmem:[%s576_s1 + $0x48] sm:$0xff]  ;;  %v62_v28 = vld [vmem:[%s578_s2 + $0x18] sm:$0xff]  ;;  %v403_v31 = vld [vmem:[%s577_s0 + $0x20] sm:$0xf0] }
   0xa   :  { %230 = vmatpush.bf16.msra.mxu0 %v410_v9  ;;  %436 = vmatpush.bf16.msra.mxu3 %v410_v9  ;;  %v400_v29 = vld [vmem:[%s577_s0 + $0x8] sm:$0xf0]  ;;  %v315_v30 = vld [vmem:[%s577_s0 + $0x18] sm:$0xf]  ;;  %v413_v32 = vld [vmem:[%s576_s1 + $0x40] sm:$0xff] }
   0xb   :  { %249 = vmatpush.bf16.msra.mxu1 %v418_v10  ;;  %397 = vmatmul.msk.bf16.vlgmr.msra.gmra.mxu2 %vm221_vm0, %v312_v11  ;;  %v399_v33 = vld [vmem:[%s577_s0 + $0x4] sm:$0xf]  ;;  %v305_v34 = vld [vmem:[%s577_s0 + $0xc] sm:$0xf0]  ;;  %v304_v35 = vor.u32 %v400_v29, %v303_v27  ;;  %v316_v36 = vor.u32 %v403_v31, %v315_v30  ;;  %v402_v38 = vld [vmem:[%s577_s0 + $0x1c] sm:$0xf] }
   0xc   :  { %70 = vperm.xlu0 %443, %v60_v19   ;;  %v308_v37 = vor.u32 %v399_v33, %v305_v34  ;;  %v317_v39 = vld [vmem:[%s577_s0 + $0x24] sm:$0xf0] }
   0xd   :  { %v320_v40 = vor.u32 %v402_v38, %v317_v39 }
   0xe   :  { %231 = vmatpush.bf16.msra.mxu0 %v409_v13  ;;  %437 = vmatpush.bf16.msra.mxu3 %v409_v13 }
   0xf   :  { %250 = vmatpush.bf16.msra.mxu1 %v417_v14 }
  0x10   :  { %80 = vperm.xlu1 %444, %v62_v28  }
  0x12   :  { %232 = vmatpush.bf16.msra.mxu0 %v408_v15  ;;  %438 = vmatpush.bf16.msra.mxu3 %v408_v15 }
  0x13   :  { %251 = vmatpush.bf16.msra.mxu1 %v416_v16 }
  0x16   :  { %233 = vmatpush.bf16.msra.mxu0 %v407_v17  ;;  %439 = vmatpush.bf16.msra.mxu3 %v407_v17 }
  0x17   :  { %252 = vmatpush.bf16.msra.mxu1 %v415_v20 }
  0x1a   :  { %234 = vmatpush.bf16.msra.mxu0 %v406_v23  ;;  %440 = vmatpush.bf16.msra.mxu3 %v406_v23 }
  0x1b   :  { %253 = vmatpush.bf16.msra.mxu1 %v414_v24  ;;  %398 = vmatmul.msk.bf16.gmra.mxu2 %vm221_vm0, %v324_v25 }
  0x1e   :  { %235 = vmatpush.bf16.msra.mxu0 %v405_v26  ;;  %441 = vmatpush.bf16.msra.mxu3 %v405_v26 }
  0x1f   :  { %254 = vmatpush.bf16.msra.mxu1 %v413_v32 }
  0x21   :  { %236 = vmatmul.bf16.vlgmr.msra.gmra.mxu0 %v304_v35  ;;  %241 = vmatmul.bf16.vlgmr.msra.gmra.mxu3 %v316_v36 }
  0x22   :  { %255 = vmatmul.bf16.vlgmr.msra.gmra.mxu1 %v308_v37 }
  0x32   :  { %260 = vmatmul.bf16.gmra.mxu1 %v320_v40 }
  0x76   :  { %v66_v41 = vpop.permute.xlu0 %65 }
  0x7a   :  { %v76_v53 = vpop.permute.xlu1 %75 }
  0x7e   :  { %v71_v46 = vpop.permute.xlu0 %70 }
  0x82   :  { %v81_v63 = vpop.permute.xlu1 %80 }
  0x8e   :  { %v275_v42 = vpop.f32.mrf.mxu2 }
  0x96   :  { %v277_v48 = vpop.f32.mrf.mxu2 }
  0x9e   :  { %v237_v43 = vpop.f32.mrf.mxu0  ;;  %v280_v60 = vpop.f32.mrf.mxu2 }
  0x9f   :  { %v256_v44 = vpop.f32.mrf.mxu1  ;;  %v238_v45 = vadd.f32 %v237_v43, %v66_v41 }
  0xa1   :  { %v257_v47 = vadd.f32 %v256_v44, %v238_v45 }
  0xa3   :  { %v276_v52 = vadd.f32 %v275_v42, %v257_v47 }
  0xa4   :  { %v242_v54 = vpop.f32.mrf.mxu3 }
  0xa5   :  { %v285_v57 = vmax.f32 %v276_v52, 0.0  ;;  %v243_v62 = vadd.f32 %v242_v54, %v76_v53 }
  0xa6   :  { %v239_v49 = vpop.f32.mrf.mxu0  ;;  %v282_v6 = vpop.f32.mrf.mxu2 }
  0xa7   :  { %v240_v50 = vadd.f32 %v239_v49, %v71_v46  ;;  %v258_v51 = vpop.f32.mrf.mxu1 }
  0xa9   :  { %v259_v55 = vadd.f32 %v258_v51, %v240_v50 }
  0xab   :  { %v278_v56 = vadd.f32 %v277_v48, %v259_v55 }
  0xac   :  { %v244_v0 = vpop.f32.mrf.mxu3 }
  0xad   :  { %v286_v58 = vmax.f32 %v278_v56, 0.0  ;;  %v245_v2 = vadd.f32 %v244_v0, %v81_v63 }
  0xaf   :  { %v426_v59 = vpack.c.bf16 %v286_v58, %v285_v57  ;;  %v261_v61 = vpop.f32.mrf.mxu1 }
  0xb0   :  { %v262_v1 = vadd.f32 %v261_v61, %v243_v62 }
  0xb1   :  { %427 = vst [vmem:[%s579_s3] sm:$0xff] %v426_v59  }
  0xb2   :  { %v281_v4 = vadd.f32 %v280_v60, %v262_v1 }
  0xb4   :  { %v287_v8 = vmax.f32 %v281_v4, 0.0 }
  0xb7   :  { %v263_v3 = vpop.f32.mrf.mxu1 }
  0xb8   :  { %v264_v5 = vadd.f32 %v263_v3, %v245_v2 }
  0xba   :  { %v283_v7 = vadd.f32 %v282_v6, %v264_v5 }
  0xbc   :  { %v288_v9 = vmax.f32 %v283_v7, 0.0 }
  0xbe   :  { %v431_v10 = vpack.c.bf16 %v288_v9, %v287_v8 }
  0xc0   :  { %433 = vst [vmem:[%s579_s3 + $0x8] sm:$0xff] %v431_v10  }

// kernel: deeplabv3plus_forward.36
= control target key start
LH: loop header
LB: loop body
LE: loop exit
PB: predicated region body
PF: predicated region fallthrough
CT: control target
= control target key end

     0   :  { %v92_v1 = vmov 0   ;;  %vm50_vm0 = vcmask 261120   ;;  %s134_s1 = inlined_call_operand.vmem [shape: bf16[32,128], index: 1, kind: input, shape index: {}]   ;;  %s135_s2 = inlined_call_operand.vmem [shape: f32[16,1], index: 2, kind: input, shape index: {}]   ;;  %s136_s0 = inlined_call_operand.vmem [shape: bf16[16,32], index: 0, kind: input, shape index: {}]   ;;  %s137_s3 = inlined_call_operand.vmem [shape: f32[16,128], index: 3, kind: output, shape index: {}]  }
   0x1   :  { %v89_v0 = vld [vmem:[%s134_s1 + $0x8] sm:$0xff]  ;;  %91 = vset.pattern.permute.xlu0 %v92_v1  ;;  %v21_v2 = vld [vmem:[%s135_s2] sm:$0xff] }
   0x2   :  { %60 = vmatpush.bf16.msra.mxu0 %v89_v0  ;;  %v88_v3 = vld [vmem:[%s134_s1] sm:$0xff]  ;;  %25 = vperm.xlu0 %91, %v21_v2   ;;  %v22_v5 = vld [vmem:[%s135_s2 + $0x8] sm:$0xff] }
   0x3   :  { %v87_v4 = vld [vmem:[%s136_s0] sm:$0xff] }
   0x6   :  { %61 = vmatpush.bf16.msra.mxu0 %v88_v3 }
   0x9   :  { %86 = vmatmul.msk.bf16.vlgmr.msra.gmra.mxu0 %vm50_vm0, %v87_v4 }
   0xa   :  { %30 = vperm.xlu0 %91, %v22_v5  }
  0x74   :  { %v26_v6 = vpop.permute.xlu0 %25 }
  0x7c   :  { %v31_v9 = vpop.permute.xlu0 %30 }
  0x86   :  { %v63_v7 = vpop.f32.mrf.mxu0 }
  0x87   :  { %v64_v8 = vadd.f32 %v63_v7, %v26_v6 }
  0x89   :  { %68 = vst [vmem:[%s137_s3] sm:$0xff] %v64_v8 }
  0x8e   :  { %v65_v10 = vpop.f32.mrf.mxu0 }
  0x8f   :  { %v66_v11 = vadd.f32 %v65_v10, %v31_v9 }
  0x91   :  { %69 = vst [vmem:[%s137_s3 + $0x8] sm:$0xff] %v66_v11 }

// kernel: deeplabv3plus_forward.37
= control target key start
LH: loop header
LB: loop body
LE: loop exit
PB: predicated region body
PF: predicated region fallthrough
CT: control target
= control target key end

     0   :  { %v116_v2 = vmov 0   ;;  %vm61_vm0 = vcmask 130048   ;;  %s170_s1 = inlined_call_operand.vmem [shape: bf16[16,128], index: 1, kind: input, shape index: {}]   ;;  %s171_s0 = inlined_call_operand.vmem [shape: bf16[32,16], index: 0, kind: input, shape index: {}]   ;;  %s172_s2 = inlined_call_operand.vmem [shape: f32[32,1], index: 2, kind: input, shape index: {}]   ;;  %s173_s3 = inlined_call_operand.vmem [shape: f32[32,128], index: 3, kind: output, shape index: {}]  }
   0x1   :  { %v111_v0 = vld [vmem:[%s170_s1] sm:$0xff]  ;;  %115 = vset.pattern.permute.xlu1 %v116_v2  ;;  %114 = vset.pattern.permute.xlu0 %v116_v2  ;;  %v110_v3 = vld [vmem:[%s171_s0 + $0x8] sm:$0xff]  ;;  %v23_v4 = vld [vmem:[%s172_s2 + $0x10] sm:$0xff] }
   0x2   :  { %v109_v1 = vld [vmem:[%s171_s0] sm:$0xff]  ;;  %75 = vmatpush.bf16.msra.mxu0 %v111_v0  ;;  %112 = vmatpush.bf16.msra.mxu1 %v111_v0  ;;  %v24_v6 = vld [vmem:[%s172_s2 + $0x18] sm:$0xff]  ;;  %v22_v7 = vld [vmem:[%s172_s2 + $0x8] sm:$0xff] }
   0x3   :  { %v21_v5 = vld [vmem:[%s172_s2] sm:$0xff]  ;;  %37 = vperm.xlu1 %115, %v23_v4  }
   0x4   :  { %27 = vperm.xlu0 %114, %v21_v5  }
   0x5   :  { %107 = vmatmul.msk.bf16.vlgmr.msra.gmra.mxu0 %vm61_vm0, %v109_v1  ;;  %108 = vmatmul.msk.bf16.vlgmr.msra.gmra.mxu1 %vm61_vm0, %v110_v3 }
   0xb   :  { %42 = vperm.xlu1 %115, %v24_v6  }
   0xc   :  { %32 = vperm.xlu0 %114, %v22_v7  }
  0x75   :  { %v38_v8 = vpop.permute.xlu1 %37 }
  0x76   :  { %v28_v9 = vpop.permute.xlu0 %27 }
  0x7d   :  { %v43_v14 = vpop.permute.xlu1 %42 }
  0x7e   :  { %v33_v15 = vpop.permute.xlu0 %32 }
  0x82   :  { %v77_v10 = vpop.f32.mrf.mxu0  ;;  %v82_v11 = vpop.f32.mrf.mxu1 }
  0x83   :  { %v78_v12 = vadd.f32 %v77_v10, %v28_v9  ;;  %v83_v13 = vadd.f32 %v82_v11, %v38_v8 }
  0x85   :  { %87 = vst [vmem:[%s173_s3] sm:$0xff] %v78_v12 }
  0x86   :  { %89 = vst [vmem:[%s173_s3 + $0x10] sm:$0xff] %v83_v13 }
  0x8a   :  { %v79_v16 = vpop.f32.mrf.mxu0  ;;  %v84_v17 = vpop.f32.mrf.mxu1 }
  0x8b   :  { %v80_v18 = vadd.f32 %v79_v16, %v33_v15  ;;  %v85_v19 = vadd.f32 %v84_v17, %v43_v14 }
  0x8d   :  { %88 = vst [vmem:[%s173_s3 + $0x8] sm:$0xff] %v80_v18 }
  0x8e   :  { %90 = vst [vmem:[%s173_s3 + $0x18] sm:$0xff] %v85_v19 }

// kernel: deeplabv3plus_forward.38
= control target key start
LH: loop header
LB: loop body
LE: loop exit
PB: predicated region body
PF: predicated region fallthrough
CT: control target
= control target key end

     0   :  { %v188_v3 = vmov 0   ;;  %vm73_vm0 = vcmask 130048   ;;  %s287_s1 = inlined_call_operand.vmem [shape: bf16[16,384], index: 1, kind: input, shape index: {}]   ;;  %s288_s0 = inlined_call_operand.vmem [shape: bf16[32,16], index: 0, kind: input, shape index: {}]   ;;  %s289_s2 = inlined_call_operand.vmem [shape: f32[32,1], index: 2, kind: input, shape index: {}]   ;;  %s290_s3 = inlined_call_operand.vmem [shape: f32[32,384], index: 3, kind: output, shape index: {}]  }
   0x1   :  { %v181_v0 = vld [vmem:[%s287_s1 + $0x4] sm:$0xf]  ;;  %v165_v1 = vld [vmem:[%s287_s1 + $0xc] sm:$0xf0]  ;;  %v171_v2 = vld [vmem:[%s287_s1 + $0x8] sm:$0xf]  ;;  %186 = vset.pattern.permute.xlu0 %v188_v3  ;;  %187 = vset.pattern.permute.xlu1 %v188_v3 }
   0x2   :  { %v168_v4 = vor.u32 %v181_v0, %v165_v1  ;;  %v183_v5 = vld [vmem:[%s287_s1 + $0x10] sm:$0xf0]  ;;  %v163_v6 = vld [vmem:[%s287_s1] sm:$0xf]  ;;  %v182_v9 = vld [vmem:[%s287_s1 + $0x8] sm:$0xf0] }
   0x3   :  { %v172_v7 = vor.u32 %v183_v5, %v171_v2  ;;  %v179_v8 = vld [vmem:[%s288_s0] sm:$0xff]  ;;  %v164_v11 = vor.u32 %v182_v9, %v163_v6  ;;  %v25_v12 = vld [vmem:[%s289_s2 + $0x10] sm:$0xff]  ;;  %v180_v13 = vld [vmem:[%s288_s0 + $0x8] sm:$0xff] }
   0x4   :  { %v23_v10 = vld [vmem:[%s289_s2] sm:$0xff]  ;;  %106 = vmatpush.bf16.msra.mxu1 %v168_v4  ;;  %39 = vperm.xlu1 %187, %v25_v12   ;;  %v24_v14 = vld [vmem:[%s289_s2 + $0x8] sm:$0xff]  ;;  %v26_v15 = vld [vmem:[%s289_s2 + $0x18] sm:$0xff] }
   0x5   :  { %29 = vperm.xlu0 %186, %v23_v10   ;;  %125 = vmatpush.bf16.msra.mxu2 %v172_v7 }
   0x6   :  { %184 = vmatpush.bf16.msra.mxu3 %v164_v11  ;;  %87 = vmatpush.bf16.msra.mxu0 %v164_v11 }
   0x7   :  { %175 = vmatmul.msk.bf16.vlgmr.msra.gmra.mxu1 %vm73_vm0, %v179_v8 }
   0x8   :  { %177 = vmatmul.msk.bf16.vlgmr.msra.gmra.mxu2 %vm73_vm0, %v179_v8 }
   0x9   :  { %174 = vmatmul.msk.bf16.vlgmr.msra.gmra.mxu3 %vm73_vm0, %v180_v13  ;;  %173 = vmatmul.msk.bf16.vlgmr.msra.gmra.mxu0 %vm73_vm0, %v179_v8 }
   0xc   :  { %44 = vperm.xlu1 %187, %v26_v15  }
   0xd   :  { %34 = vperm.xlu0 %186, %v24_v14  }
  0x17   :  { %176 = vmatmul.msk.bf16.gmra.mxu1 %vm73_vm0, %v180_v13 }
  0x18   :  { %178 = vmatmul.msk.bf16.gmra.mxu2 %vm73_vm0, %v180_v13 }
  0x76   :  { %v40_v21 = vpop.permute.xlu1 %39 }
  0x77   :  { %v30_v16 = vpop.permute.xlu0 %29 }
  0x7e   :  { %v45_v31 = vpop.permute.xlu1 %44 }
  0x7f   :  { %v35_v22 = vpop.permute.xlu0 %34 }
  0x84   :  { %v108_v17 = vpop.f32.mrf.mxu1 }
  0x85   :  { %v109_v18 = vadd.f32 %v108_v17, %v30_v16 }
  0x86   :  { %v89_v19 = vpop.f32.mrf.mxu0 }
  0x87   :  { %138 = vst [vmem:[%s290_s3 + $0x8] sm:$0xff] %v109_v18  ;;  %v90_v20 = vadd.f32 %v89_v19, %v30_v16 }
  0x89   :  { %137 = vst [vmem:[%s290_s3] sm:$0xff] %v90_v20 }
  0x8b   :  { %v127_v23 = vpop.f32.mrf.mxu2 }
  0x8c   :  { %v128_v24 = vadd.f32 %v127_v23, %v30_v16  ;;  %v110_v25 = vpop.f32.mrf.mxu1  ;;  %v94_v26 = vpop.f32.mrf.mxu3 }
  0x8d   :  { %v111_v27 = vadd.f32 %v110_v25, %v35_v22  ;;  %v95_v28 = vadd.f32 %v94_v26, %v40_v21 }
  0x8e   :  { %139 = vst [vmem:[%s290_s3 + $0x10] sm:$0xff] %v128_v24  ;;  %v91_v29 = vpop.f32.mrf.mxu0 }
  0x8f   :  { %141 = vst [vmem:[%s290_s3 + $0x20] sm:$0xff] %v111_v27  ;;  %v92_v30 = vadd.f32 %v91_v29, %v35_v22 }
  0x90   :  { %143 = vst [vmem:[%s290_s3 + $0x30] sm:$0xff] %v95_v28 }
  0x91   :  { %140 = vst [vmem:[%s290_s3 + $0x18] sm:$0xff] %v92_v30 }
  0x93   :  { %v129_v32 = vpop.f32.mrf.mxu2 }
  0x94   :  { %v130_v33 = vadd.f32 %v129_v32, %v35_v22  ;;  %v113_v34 = vpop.f32.mrf.mxu1  ;;  %v96_v35 = vpop.f32.mrf.mxu3 }
  0x95   :  { %v114_v36 = vadd.f32 %v113_v34, %v40_v21  ;;  %v97_v37 = vadd.f32 %v96_v35, %v45_v31 }
  0x96   :  { %142 = vst [vmem:[%s290_s3 + $0x28] sm:$0xff] %v130_v33 }
  0x97   :  { %144 = vst [vmem:[%s290_s3 + $0x38] sm:$0xff] %v114_v36 }
  0x98   :  { %146 = vst [vmem:[%s290_s3 + $0x48] sm:$0xff] %v97_v37 }
  0x9b   :  { %v132_v38 = vpop.f32.mrf.mxu2 }
  0x9c   :  { %v133_v39 = vadd.f32 %v132_v38, %v40_v21  ;;  %v115_v40 = vpop.f32.mrf.mxu1 }
  0x9d   :  { %v116_v41 = vadd.f32 %v115_v40, %v45_v31 }
  0x9e   :  { %145 = vst [vmem:[%s290_s3 + $0x40] sm:$0xff] %v133_v39 }
  0x9f   :  { %147 = vst [vmem:[%s290_s3 + $0x50] sm:$0xff] %v116_v41 }
  0xa3   :  { %v134_v42 = vpop.f32.mrf.mxu2 }
  0xa4   :  { %v135_v43 = vadd.f32 %v134_v42, %v45_v31 }
  0xa6   :  { %148 = vst [vmem:[%s290_s3 + $0x58] sm:$0xff] %v135_v43 }

// kernel: deeplabv3plus_forward.39
= control target key start
LH: loop header
LB: loop body
LE: loop exit
PB: predicated region body
PF: predicated region fallthrough
CT: control target
= control target key end

     0   :  { %7 = vsyncpa [#allocation8], 0  ;;  %v41_v0 = vlaneseq  ;;  %v2998_v7 = vmov 0.0   ;;  %v3145_v41 = vmov 0  ;;  %s1470_s21 = smov [#allocation7]   ;;  %s2994_s0 = inlined_call_operand.vmem [shape: f32[8,2048], index: 0, kind: input, shape index: {}]   ;;  %s2995_s1 = inlined_call_operand.vmem [shape: s32[1,2048], index: 1, kind: input, shape index: {}]   ;;  %s2996_s2 = inlined_call_operand.vmem [shape: f32[4], index: 2, kind: output, shape index: {}]  }
   0x1   :  { %v39_v1 = vld [vmem:[%s2995_s1] sm:$0xff]  ;;  %v40_v2 = vld [vmem:[%s2995_s1 + $0x8] sm:$0xff]  ;;  %v25_v33 = vld [vmem:[%s2994_s0 + $0x10] sm:$0xff]  ;;  %s1313_s16 = sshll.u32 %s2996_s2, 4  ;;  %s1314_s16 = int_to_ptr.vmem [resolvable:$true] %s1313_s16 }
   0x2   :  { %v1492_v3 = vshrl.u32 %v41_v0, 7  ;;  %vm44_vm0 = vcmp.ne.s32.totalorder %v39_v1, 255  ;;  %vm46_vm1 = vcmp.lt.s32.totalorder %v39_v1, 5  ;;  %vm45_vm2 = vcmp.ne.s32.totalorder %v40_v2, 255  ;;  %v23_v4 = vld [vmem:[%s2994_s0] sm:$0xff]  ;;  %v24_v28 = vld [vmem:[%s2994_s0 + $0x8] sm:$0xff] }
   0x3   :  { %vm47_vm3 = vcmp.lt.s32.totalorder %v40_v2, 5  ;;  %vm48_vm5 = vmand %vm44_vm0, %vm46_vm1  ;;  %v54_v5 = vperm.slane %v39_v1, 0  ;;  %v55_v9 = vperm.slane %v39_v1, 1  ;;  %v56_v10 = vperm.slane %v39_v1, 2  ;;  %v26_v42 = vld [vmem:[%s2994_s0 + $0x18] sm:$0xff]  ;;  %v27_v43 = vld [vmem:[%s2994_s0 + $0x20] sm:$0xff] }
   0x4   :  { %3116 = vst [vmem:[#allocation10_spill] sm:$0xff] %v1492_v3  ;;  %vm2997_vm4 = vcmp.lt.s32.totalorder %v1492_v3, 5  ;;  %vm49_vm6 = vmand %vm45_vm2, %vm47_vm3  ;;  %v1503_v8 = vsel %vm48_vm5, 1.0, %v2998_v7  ;;  %v57_v11 = vperm.slane %v39_v1, 3  ;;  %v58_v13 = vperm.slane %v39_v1, 4  ;;  %v28_v52 = vld [vmem:[%s2994_s0 + $0x28] sm:$0xff] }
   0x5   :  { %v1500_v6 = vsel %vm2997_vm4, %v23_v4, -1e+30  ;;  %v1506_v12 = vsel %vm49_vm6, 1.0, %v2998_v7  ;;  %v59_v14 = vperm.slane %v39_v1, 5  ;;  %v60_v15 = vperm.slane %v39_v1, 6  ;;  %v29_v53 = vld [vmem:[%s2994_s0 + $0x30] sm:$0xff] }
   0x6   :  { %v61_v16 = vperm.slane %v39_v1, 7  ;;  %v62_v17 = vperm.slane %v40_v2, 0  ;;  %v63_v18 = vperm.slane %v40_v2, 1  ;;  %v64_v19 = vperm.slane %v40_v2, 2  ;;  %v30_v62 = vld [vmem:[%s2994_s0 + $0x38] sm:$0xff]  ;;  %v33_v26 = vld [vmem:[%s2994_s0 + $0x50] sm:$0xff] }
   0x7   :  { %v65_v20 = vperm.slane %v40_v2, 3  ;;  %v66_v21 = vperm.slane %v40_v2, 4  ;;  %v67_v22 = vperm.slane %v40_v2, 5  ;;  %v68_v23 = vperm.slane %v40_v2, 6  ;;  %v34_v27 = vld [vmem:[%s2994_s0 + $0x58] sm:$0xff]  ;;  %v35_v32 = vld [vmem:[%s2994_s0 + $0x60] sm:$0xff] }
   0x8   :  { %v69_v24 = vperm.slane %v40_v2, 7  ;;  %vm1509_vm7 = vcmp.eq.s32.totalorder %v1492_v3, %v54_v5  ;;  %vm1514_vm8 = vcmp.eq.s32.totalorder %v1492_v3, %v55_v9  ;;  %vm1519_vm9 = vcmp.eq.s32.totalorder %v1492_v3, %v56_v10  ;;  %v37_v34 = vld [vmem:[%s2994_s0 + $0x70] sm:$0xff] }
   0x9   :  { %vm1527_vm10 = vcmp.eq.s32.totalorder %v1492_v3, %v57_v11  ;;  %vm1532_vm11 = vcmp.eq.s32.totalorder %v1492_v3, %v58_v13  ;;  %vm1537_vm12 = vcmp.eq.s32.totalorder %v1492_v3, %v59_v14  ;;  %vm1542_vm13 = vcmp.eq.s32.totalorder %v1492_v3, %v60_v15 }
   0xa   :  { %vm1550_vm14 = vcmp.eq.s32.totalorder %v1492_v3, %v61_v16  ;;  %vm1555_vm15 = vcmp.eq.s32.totalorder %v1492_v3, %v62_v17  ;;  %vm1560_vm0 = vcmp.eq.s32.totalorder %v1492_v3, %v63_v18  ;;  %vm1565_vm1 = vcmp.eq.s32.totalorder %v1492_v3, %v64_v19 }
   0xb   :  { %vm1570_vm2 = vcmp.eq.s32.totalorder %v1492_v3, %v65_v20  ;;  %vm1575_vm3 = vcmp.eq.s32.totalorder %v1492_v3, %v66_v21  ;;  %vm1580_vm5 = vcmp.eq.s32.totalorder %v1492_v3, %v67_v22  ;;  %vm1585_vm6 = vcmp.eq.s32.totalorder %v1492_v3, %v68_v23  ;;  %v31_v20 = vld [vmem:[%s2994_s0 + $0x40] sm:$0xff]  ;;  %v32_v21 = vld [vmem:[%s2994_s0 + $0x48] sm:$0xff] }
   0xc   :  { %v3146_v41 = vsel %vm1585_vm6, 4294967295, %v3145_v41  ;;  %vm1596_vm4 = vcmp.eq.s32.totalorder %v1492_v3, %v69_v24  ;;  %v1603_v45 = vsel %vm1509_vm7, 1.0, %v2998_v7  ;;  %v1608_v46 = vsel %vm1514_vm8, 1.0, %v2998_v7 }
   0xd   :  { %vm3149_vm6 = vcmp.lt.s32.totalorder %v1492_v3, 5  ;;  %v1617_v48 = vsel %vm1519_vm9, 1.0, %v2998_v7  ;;  %v1622_v49 = vsel %vm1527_vm10, 1.0, %v2998_v7  ;;  %v1627_v50 = vsel %vm1532_vm11, 1.0, %v2998_v7 }
   0xe   :  { %v1612_v47 = vsel %vm3149_vm6, %v24_v28, -1e+30  ;;  %3150 = vst [vmem:[#allocation11_spill] sm:$0xff] %v1622_v49  ;;  %vm3152_vm7 = vmmov %vm3149_vm6  ;;  %v1642_v54 = vsel %vm1537_vm12, 1.0, %v2998_v7  ;;  %v1647_v55 = vsel %vm1542_vm13, 1.0, %v2998_v7  ;;  %v1652_v56 = vsel %vm1550_vm14, 1.0, %v2998_v7 }
   0xf   :  { %3151 = vst [vmem:[#allocation12_spill] sm:$0xff] %v1627_v50  ;;  %v1631_v51 = vsel %vm3152_vm7, %v25_v33, -1e+30  ;;  %v1657_v57 = vsel %vm1555_vm15, 1.0, %v2998_v7  ;;  %vm3157_vm8 = vmmov %vm3149_vm6  ;;  %v184_v60 = vrot.slane %v1500_v6, 4  ;;  %v190_v61 = vrot.slane %v1612_v47, 4 }
  0x10   :  { %3153 = vst [vmem:[#allocation13_spill] sm:$0xff] %v1642_v54  ;;  %v1661_v58 = vsel %vm3157_vm8, %v26_v42, -1e+30  ;;  %vm3158_vm9 = vmmov %vm3149_vm6  ;;  %v1675_v63 = vsel %vm1560_vm0, 1.0, %v2998_v7  ;;  %v1680_v0 = vsel %vm1565_vm1, 1.0, %v2998_v7  ;;  %v1685_v1 = vsel %vm1570_vm2, 1.0, %v2998_v7 }
  0x11   :  { %3154 = vst [vmem:[#allocation14_spill] sm:$0xff] %v1647_v55  ;;  %v1665_v59 = vsel %vm3158_vm9, %v27_v43, -1e+30  ;;  %v196_v2 = vrot.slane %v1631_v51, 4  ;;  %v1691_v4 = vsel %vm1575_vm3, 1.0, %v2998_v7  ;;  %v1696_v5 = vsel %vm1580_vm5, 1.0, %v2998_v7  ;;  %vm3166_vm11 = vmmov %vm3149_vm6 }
  0x12   :  { %3155 = vst [vmem:[#allocation15_spill] sm:$0xff] %v1652_v56  ;;  %vm3164_vm10 = vnez %v3146_v41  ;;  %v1705_v10 = vsel %vm3166_vm11, %v28_v52, -1e+30  ;;  %vm3167_vm12 = vmmov %vm3149_vm6  ;;  %v185_v13 = vmax.f32 %v1500_v6, %v184_v60  ;;  %v202_v14 = vrot.slane %v1661_v58, 4  ;;  %v36_v33 = vld [vmem:[%s2994_s0 + $0x68] sm:$0xff] }
  0x13   :  { %3156 = vst [vmem:[#allocation16_spill] sm:$0xff] %v1657_v57  ;;  %v1701_v9 = vsel %vm3164_vm10, 1.0, %v2998_v7  ;;  %v1709_v11 = vsel %vm3167_vm12, %v29_v53, -1e+30  ;;  %v208_v15 = vrot.slane %v1665_v59, 4  ;;  %v1717_v16 = vsel %vm1596_vm4, 1.0, %v2998_v7  ;;  %vm3170_vm13 = vmmov %vm3149_vm6 }
  0x14   :  { %3159 = vst [vmem:[#allocation17_spill] sm:$0xff] %v1675_v63  ;;  %v1720_v17 = vperm.slane %v1503_v8, 0  ;;  %v1724_v18 = vsel %vm3170_vm13, %v30_v62, -1e+30  ;;  %v191_v19 = vmax.f32 %v1612_v47, %v190_v61  ;;  %v1734_v22 = vperm.slane %v1503_v8, 1  ;;  %vm3177_vm4 = vmmov %vm3149_vm6 }
  0x15   :  { %3160 = vst [vmem:[#allocation18_spill] sm:$0xff] %v1680_v0  ;;  %v1737_v23 = vperm.slane %v1503_v8, 2  ;;  %v197_v24 = vmax.f32 %v1631_v51, %v196_v2  ;;  %v214_v25 = vrot.slane %v1705_v10, 4  ;;  %v1748_v28 = vperm.slane %v1503_v8, 3  ;;  %vm3178_vm14 = vmmov %vm3177_vm4 }
  0x16   :  { %3161 = vst [vmem:[#allocation19_spill] sm:$0xff] %v1685_v1  ;;  %v1751_v29 = vperm.slane %v1503_v8, 4  ;;  %v1754_v30 = vperm.slane %v1503_v8, 5  ;;  %v220_v31 = vrot.slane %v1709_v11, 4  ;;  %v186_v35 = vrot.slane %v185_v13, 2  ;;  %vm3179_vm15 = vmmov %vm3177_vm4 }
  0x17   :  { %3162 = vst [vmem:[#allocation20_spill] sm:$0xff] %v1691_v4  ;;  %v203_v36 = vmax.f32 %v1661_v58, %v202_v14  ;;  %v209_v37 = vmax.f32 %v1665_v59, %v208_v15  ;;  %v226_v38 = vrot.slane %v1724_v18, 4  ;;  %v1770_v39 = vperm.slane %v1503_v8, 6  ;;  %vm3180_vm0 = vmmov %vm3177_vm4 }
  0x18   :  { %3163 = vst [vmem:[#allocation21_spill] sm:$0xff] %v1696_v5  ;;  %v1774_v40 = vsel %vm3177_vm4, %v31_v20, -1e+30  ;;  %v1778_v41 = vsel %vm3178_vm14, %v32_v21, -1e+30  ;;  %v192_v42 = vrot.slane %v191_v19, 2  ;;  %v215_v53 = vmax.f32 %v1705_v10, %v214_v25  ;;  %vm3181_vm1 = vmmov %vm3180_vm0 }
  0x19   :  { %3165 = vst [vmem:[#allocation22_spill] sm:$0xff] %v1701_v9  ;;  %v1782_v43 = vsel %vm3179_vm15, %v33_v26, -1e+30  ;;  %v1786_v44 = vsel %vm3180_vm0, %v34_v27, -1e+30  ;;  %v198_v52 = vrot.slane %v197_v24, 2  ;;  %vm3182_vm2 = vmmov %vm3180_vm0  ;;  %v221_v2 = vmax.f32 %v1709_v11, %v220_v31 }
  0x1a   :  { %3168 = vst [vmem:[#allocation23_spill] sm:$0xff] %v1717_v16  ;;  %v1791_v60 = vsel %vm3181_vm1, %v35_v32, -1e+30  ;;  %v1795_v61 = vsel %vm3182_vm2, %v36_v33, -1e+30  ;;  %vm3183_vm3 = vmmov %vm3180_vm0  ;;  %v187_v14 = vmax.f32 %v185_v13, %v186_v35  ;;  %v204_v15 = vrot.slane %v203_v36, 2 }
  0x1b   :  { %3169 = vst [vmem:[#allocation24_spill] sm:$0xff] %v1720_v17  ;;  %v1799_v62 = vsel %vm3183_vm3, %v37_v34, -1e+30  ;;  %v210_v20 = vrot.slane %v209_v37, 2  ;;  %v227_v21 = vmax.f32 %v1724_v18, %v226_v38  ;;  %v38_v25 = vld [vmem:[%s2994_s0 + $0x78] sm:$0xff]  ;;  %v193_v26 = vmax.f32 %v191_v19, %v192_v42  ;;  %vm3184_vm5 = vmmov %vm3180_vm0 }
  0x1c   :  { %3171 = vst [vmem:[#allocation25_spill] sm:$0xff] %v1734_v22  ;;  %v232_v27 = vrot.slane %v1774_v40, 4  ;;  %v238_v32 = vrot.slane %v1778_v41, 4  ;;  %v244_v33 = vrot.slane %v1782_v43, 4  ;;  %v199_v34 = vmax.f32 %v197_v24, %v198_v52 }
  0x1d   :  { %3172 = vst [vmem:[#allocation26_spill] sm:$0xff] %v1737_v23  ;;  %v216_v7 = vrot.slane %v215_v53, 2  ;;  %v250_v31 = vrot.slane %v1786_v44, 4  ;;  %v256_v13 = vrot.slane %v1791_v60, 4  ;;  %v222_v35 = vrot.slane %v221_v2, 2 }
  0x1e   :  { %3173 = vst [vmem:[#allocation27_spill] sm:$0xff] %v1748_v28  ;;  %v233_v38 = vmax.f32 %v1774_v40, %v232_v27  ;;  %v239_v16 = vmax.f32 %v1778_v41, %v238_v32  ;;  %v262_v9 = vrot.slane %v1795_v61, 4  ;;  %v1816_v19 = vsel %vm3184_vm5, %v38_v25, -1e+30 }
  0x1f   :  { %3174 = vst [vmem:[#allocation28_spill] sm:$0xff] %v1751_v29  ;;  %v228_v42 = vrot.slane %v227_v21, 2  ;;  %v245_v5 = vmax.f32 %v1782_v43, %v244_v33  ;;  %v268_v24 = vrot.slane %v1799_v62, 4  ;;  %v188_v52 = vrot.slane %v187_v14, 1 }
  0x20   :  { %3175 = vst [vmem:[#allocation29_spill] sm:$0xff] %v1754_v30  ;;  %v194_v4 = vrot.slane %v193_v26, 1  ;;  %v205_v1 = vmax.f32 %v203_v36, %v204_v15  ;;  %v251_v0 = vmax.f32 %v1786_v44, %v250_v31  ;;  %v200_v63 = vrot.slane %v199_v34, 1 }
  0x21   :  { %3176 = vst [vmem:[#allocation30_spill] sm:$0xff] %v1770_v39  ;;  %v211_v27 = vmax.f32 %v209_v37, %v210_v20  ;;  %v234_v57 = vrot.slane %v233_v38, 2  ;;  %v257_v32 = vmax.f32 %v1791_v60, %v256_v13  ;;  %v217_v56 = vmax.f32 %v215_v53, %v216_v7 }
  0x22   :  { %v223_v55 = vmax.f32 %v221_v2, %v222_v35  ;;  %v240_v3 = vrot.slane %v239_v16, 2  ;;  %v263_v25 = vmax.f32 %v1795_v61, %v262_v9  ;;  %v229_v39 = vmax.f32 %v227_v21, %v228_v42 }
  0x23   :  { %v246_v54 = vrot.slane %v245_v5, 2  ;;  %v269_v33 = vmax.f32 %v1799_v62, %v268_v24  ;;  %v274_v30 = vrot.slane %v1816_v19, 4  ;;  %v189_v50 = vmax.f32 %v187_v14, %v188_v52 }
  0x24   :  { %v195_v36 = vmax.f32 %v193_v26, %v194_v4  ;;  %v206_v15 = vrot.slane %v205_v1, 1  ;;  %v252_v31 = vrot.slane %v251_v0, 2  ;;  %v201_v29 = vmax.f32 %v199_v34, %v200_v63 }
  0x25   :  { %v212_v37 = vrot.slane %v211_v27, 1  ;;  %v235_v20 = vmax.f32 %v233_v38, %v234_v57  ;;  %v258_v49 = vrot.slane %v257_v32, 2  ;;  %v218_v13 = vrot.slane %v217_v56, 1 }
  0x26   :  { %v224_v7 = vrot.slane %v223_v55, 1  ;;  %v241_v53 = vmax.f32 %v239_v16, %v240_v3  ;;  %v264_v2 = vrot.slane %v263_v25, 2  ;;  %v230_v35 = vrot.slane %v229_v39, 1 }
  0x27   :  { %v247_v9 = vmax.f32 %v245_v5, %v246_v54  ;;  %v270_v21 = vrot.slane %v269_v33, 2  ;;  %v275_v42 = vmax.f32 %v1816_v19, %v274_v30  ;;  %v207_v24 = vmax.f32 %v205_v1, %v206_v15 }
  0x28   :  { %v253_v28 = vmax.f32 %v251_v0, %v252_v31  ;;  %v1827_v14 = vsub.f32 %v1500_v6, %v189_v50  ;;  %v1830_v4 = vsub.f32 %v1612_v47, %v195_v36  ;;  %v213_v63 = vmax.f32 %v211_v27, %v212_v37 }
  0x29   :  { %v236_v57 = vrot.slane %v235_v20, 1  ;;  %v259_v26 = vmax.f32 %v257_v32, %v258_v49  ;;  %v1833_v34 = vsub.f32 %v1631_v51, %v201_v29  ;;  %v219_v3 = vmax.f32 %v217_v56, %v218_v13 }
  0x2a   :  { %3185 = vst [vmem:[#allocation31_spill] sm:$0xff] %v1827_v14  ;;  %v225_v16 = vmax.f32 %v223_v55, %v224_v7  ;;  %v242_v54 = vrot.slane %v241_v53, 1  ;;  %v265_v5 = vmax.f32 %v263_v25, %v264_v2  ;;  %v231_v38 = vmax.f32 %v229_v39, %v230_v35 }
  0x2b   :  { %3186 = vst [vmem:[#allocation32_spill] sm:$0xff] %v1830_v4  ;;  %v248_v30 = vrot.slane %v247_v9, 1  ;;  %v271_v1 = vmax.f32 %v269_v33, %v270_v21  ;;  %v276_v0 = vrot.slane %v275_v42, 2  ;;  %v254_v52 = vrot.slane %v253_v28, 1 }
  0x2c   :  { %3187 = vst [vmem:[#allocation33_spill] sm:$0xff] %v1833_v34  ;;  %v1836_v6 = vsub.f32 %v1661_v58, %v207_v24  ;;  %v296_v47 = vmul.f32 1.442695, %v1827_v14  ;;  %v298_v50 = vmul.f32 1.442695, %v1830_v4  ;;  %v237_v49 = vmax.f32 %v235_v20, %v236_v57 }
  0x2d   :  { %v260_v27 = vrot.slane %v259_v26, 1  ;;  %v1841_v51 = vsub.f32 %v1665_v59, %v213_v63  ;;  %v300_v55 = vmul.f32 1.442695, %v1833_v34  ;;  %v243_v56 = vmax.f32 %v241_v53, %v242_v54 }
  0x2e   :  { %3188 = vst [vmem:[#allocation34_spill] sm:$0xff] %v1836_v6  ;;  %v266_v29 = vrot.slane %v265_v5, 1  ;;  %v1845_v39 = vsub.f32 %v1705_v10, %v219_v3  ;;  %1352 = vpow2.f32 %v296_v47  ;;  %v249_v32 = vmax.f32 %v247_v9, %v248_v30 }
  0x2f   :  { %3189 = vst [vmem:[#allocation35_spill] sm:$0xff] %v1841_v51  ;;  %v277_v58 = vmax.f32 %v275_v42, %v276_v0  ;;  %v1848_v25 = vsub.f32 %v1709_v11, %v225_v16  ;;  %1354 = vpow2.f32 %v298_v50  ;;  %v1851_v33 = vperm.slane %v1503_v8, 7 }
  0x30   :  { %3190 = vst [vmem:[#allocation36_spill] sm:$0xff] %v1845_v39  ;;  %v255_v36 = vmax.f32 %v253_v28, %v254_v52  ;;  %v1854_v59 = vsub.f32 %v1724_v18, %v231_v38  ;;  %v302_v15 = vmul.f32 1.442695, %v1836_v6  ;;  %v261_v31 = vmax.f32 %v259_v26, %v260_v27 }
  0x31   :  { %3191 = vst [vmem:[#allocation37_spill] sm:$0xff] %v1848_v25  ;;  %v1858_v10 = vsub.f32 %v1774_v40, %v237_v49  ;;  %1356 = vpow2.f32 %v300_v55  ;;  %v304_v37 = vmul.f32 1.442695, %v1841_v51  ;;  %v267_v20 = vmax.f32 %v265_v5, %v266_v29 }
  0x32   :  { %3192 = vst [vmem:[#allocation38_spill] sm:$0xff] %v1851_v33  ;;  %v272_v11 = vrot.slane %v271_v1, 1  ;;  %v1862_v13 = vsub.f32 %v1778_v41, %v243_v56  ;;  %v306_v8 = vmul.f32 1.442695, %v1845_v39  ;;  %v1866_v28 = vperm.slane %v1506_v12, 0 }
  0x33   :  { %3193 = vst [vmem:[#allocation39_spill] sm:$0xff] %v1854_v59  ;;  %v278_v18 = vrot.slane %v277_v58, 1  ;;  %v1869_v7 = vsub.f32 %v1782_v43, %v249_v32  ;;  %v308_v40 = vmul.f32 1.442695, %v1848_v25  ;;  %v1875_v2 = vperm.slane %v1506_v12, 1 }
  0x34   :  { %3194 = vst [vmem:[#allocation40_spill] sm:$0xff] %v1858_v10  ;;  %v1872_v53 = vpop.eup %1352  ;;  %v1878_v35 = vsub.f32 %v1786_v44, %v255_v36  ;;  %1358 = vpow2.f32 %v302_v15  ;;  %v310_v41 = vmul.f32 1.442695, %v1854_v59  ;;  %v1884_v21 = vsub.f32 %v1791_v60, %v261_v31 }
  0x35   :  { %3195 = vst [vmem:[#allocation41_spill] sm:$0xff] %v1862_v13  ;;  %v1881_v9 = vpop.eup %1354  ;;  %1360 = vpow2.f32 %v304_v37  ;;  %v312_v43 = vmul.f32 1.442695, %v1858_v10  ;;  %v328_v42 = vrot.slane %v1872_v53, 4  ;;  %v273_v24 = vmax.f32 %v271_v1, %v272_v11  ;;  %v3210_v11 = vld [vmem:[#allocation27_spill] sm:$0xff] }
  0x36   :  { %3196 = vst [vmem:[#allocation42_spill] sm:$0xff] %v1866_v28  ;;  %v1889_v63 = vsub.f32 %v1795_v61, %v267_v20  ;;  %1362 = vpow2.f32 %v306_v8  ;;  %v314_v44 = vmul.f32 1.442695, %v1862_v13  ;;  %v1895_v26 = vperm.slane %v1506_v12, 2  ;;  %v3227_v13 = vld [vmem:[#allocation17_spill] sm:$0xff] }
  0x37   :  { %3197 = vst [vmem:[#allocation43_spill] sm:$0xff] %v1869_v7  ;;  %v1892_v57 = vpop.eup %1356  ;;  %v279_v3 = vmax.f32 %v277_v58, %v278_v18  ;;  %1364 = vpow2.f32 %v308_v40  ;;  %v316_v60 = vmul.f32 1.442695, %v1869_v7  ;;  %v1899_v16 = vperm.slane %v1506_v12, 3  ;;  %v3213_v18 = vld [vmem:[#allocation28_spill] sm:$0xff] }
  0x38   :  { %3198 = vst [vmem:[#allocation44_spill] sm:$0xff] %v1875_v2  ;;  %1366 = vpow2.f32 %v310_v41  ;;  %v318_v54 = vmul.f32 1.442695, %v1878_v35  ;;  %v334_v61 = vrot.slane %v1881_v9, 4  ;;  %v1904_v5 = vperm.slane %v1506_v12, 4  ;;  %v3214_v40 = vld [vmem:[#allocation12_spill] sm:$0xff] }
  0x39   :  { %3199 = vst [vmem:[#allocation45_spill] sm:$0xff] %v1878_v35  ;;  %1368 = vpow2.f32 %v312_v43  ;;  %v320_v38 = vmul.f32 1.442695, %v1884_v21  ;;  %v329_v30 = vadd.f32 %v1872_v53, %v328_v42  ;;  %v1911_v0 = vsub.f32 %v1799_v62, %v273_v24  ;;  %v3216_v24 = vld [vmem:[#allocation29_spill] sm:$0xff] }
  0x3a   :  { %3200 = vst [vmem:[#allocation46_spill] sm:$0xff] %v1884_v21  ;;  %v1908_v1 = vpop.eup %1358  ;;  %1370 = vpow2.f32 %v314_v44  ;;  %v322_v52 = vmul.f32 1.442695, %v1889_v63  ;;  %v340_v47 = vrot.slane %v1892_v57, 4  ;;  %v1918_v49 = vperm.slane %v1506_v12, 5  ;;  %v3217_v44 = vld [vmem:[#allocation13_spill] sm:$0xff] }
  0x3b   :  { %3201 = vst [vmem:[#allocation47_spill] sm:$0xff] %v1889_v63  ;;  %v1915_v50 = vpop.eup %1360  ;;  %v1921_v27 = vperm.slane %v1506_v12, 6  ;;  %v1924_v55 = vsub.f32 %v1816_v19, %v279_v3  ;;  %1372 = vpow2.f32 %v316_v60  ;;  %v1929_v62 = vperm.slane %v1506_v12, 7  ;;  %v3219_v60 = vld [vmem:[#allocation30_spill] sm:$0xff] }
  0x3c   :  { %3202 = vst [vmem:[#allocation48_spill] sm:$0xff] %v1895_v26  ;;  %v1926_v56 = vpop.eup %1362  ;;  %v1933_v29 = vmul.f32 %v1603_v45, %v1720_v17  ;;  %1374 = vpow2.f32 %v318_v54  ;;  %v335_v32 = vadd.f32 %v1881_v9, %v334_v61  ;;  %v1940_v36 = vmul.f32 %v1608_v46, %v1734_v22  ;;  %v3211_v46 = vld [vmem:[#allocation11_spill] sm:$0xff]  ;;  %v3220_v54 = vld [vmem:[#allocation14_spill] sm:$0xff] }
  0x3d   :  { %3203 = vst [vmem:[#allocation49_spill] sm:$0xff] %v1899_v16  ;;  %v1936_v58 = vpop.eup %1364  ;;  %1376 = vpow2.f32 %v320_v38  ;;  %v330_v19 = vrot.slane %v329_v30, 2  ;;  %v346_v15 = vrot.slane %v1908_v1, 4  ;;  %v1947_v12 = vmul.f32 %v1617_v48, %v1737_v23  ;;  %v3222_v38 = vld [vmem:[#allocation15_spill] sm:$0xff] }
  0x3e   :  { %3204 = vst [vmem:[#allocation50_spill] sm:$0xff] %v1904_v5  ;;  %v1943_v31 = vpop.eup %1366  ;;  %1378 = vpow2.f32 %v322_v52  ;;  %v324_v45 = vmul.f32 1.442695, %v1911_v0  ;;  %v341_v37 = vadd.f32 %v1892_v57, %v340_v47  ;;  %v1955_v8 = vmul.f32 %v3211_v46, %v3210_v11 }
  0x3f   :  { %3205 = vst [vmem:[#allocation51_spill] sm:$0xff] %v1911_v0  ;;  %v1951_v20 = vpop.eup %1368  ;;  %v1959_v41 = vmul.f32 %v3214_v40, %v3213_v18  ;;  %v326_v43 = vmul.f32 1.442695, %v1924_v55  ;;  %v352_v48 = vrot.slane %v1915_v50, 4  ;;  %v1967_v3 = vmul.f32 %v3217_v44, %v3216_v24  ;;  %v3224_v40 = vld [vmem:[#allocation16_spill] sm:$0xff] }
  0x40   :  { %3206 = vst [vmem:[#allocation52_spill] sm:$0xff] %v1918_v49  ;;  %v1963_v42 = vpop.eup %1370  ;;  %v1971_v61 = vmul.f32 %v3220_v54, %v3219_v60  ;;  %v1975_v52 = vmul.f32 %v3222_v38, %v1851_v33  ;;  %v336_v47 = vrot.slane %v335_v32, 2  ;;  %v331_v0 = vadd.f32 %v330_v19, %v329_v30 }
  0x41   :  { %3207 = vst [vmem:[#allocation53_spill] sm:$0xff] %v1921_v27  ;;  %v1977_v46 = vpop.eup %1372  ;;  %v347_v63 = vadd.f32 %v1908_v1, %v346_v15  ;;  %v358_v44 = vrot.slane %v1926_v56, 4  ;;  %1380 = vpow2.f32 %v324_v45  ;;  %v342_v54 = vrot.slane %v341_v37, 2  ;;  %v3230_v45 = vld [vmem:[#allocation18_spill] sm:$0xff] }
  0x42   :  { %3208 = vst [vmem:[#allocation54_spill] sm:$0xff] %v1924_v55  ;;  %v1981_v55 = vmul.f32 %v3224_v40, %v1866_v28  ;;  %v1985_v21 = vpop.eup %1374  ;;  %v364_v35 = vrot.slane %v1936_v58, 4  ;;  %v370_v38 = vrot.slane %v1943_v31, 4  ;;  %v1993_v10 = vmul.f32 %v3227_v13, %v1875_v2 }
  0x43   :  { %3209 = vst [vmem:[#allocation55_spill] sm:$0xff] %v1929_v62  ;;  %v1989_v7 = vpop.eup %1376  ;;  %1382 = vpow2.f32 %v326_v43  ;;  %v353_v30 = vadd.f32 %v1915_v50, %v352_v48  ;;  %v376_v19 = vrot.slane %v1951_v20, 4  ;;  %v2001_v40 = vmul.f32 %v3230_v45, %v1895_v26  ;;  %v3232_v45 = vld [vmem:[#allocation19_spill] sm:$0xff] }
  0x44   :  { %3212 = vst [vmem:[#allocation11_spill] sm:$0xff] %v1955_v8  ;;  %v1997_v15 = vpop.eup %1378  ;;  %v337_v59 = vadd.f32 %v336_v47, %v335_v32  ;;  %v382_v25 = vrot.slane %v1963_v42, 4  ;;  %v388_v39 = vrot.slane %v1977_v46, 4  ;;  %v332_v51 = vrot.slane %v331_v0, 1 }
  0x45   :  { %3215 = vst [vmem:[#allocation12_spill] sm:$0xff] %v1959_v41  ;;  %v348_v6 = vrot.slane %v347_v63, 2  ;;  %v359_v13 = vadd.f32 %v1926_v56, %v358_v44  ;;  %v394_v43 = vrot.slane %v1985_v21, 4  ;;  %v343_v48 = vadd.f32 %v342_v54, %v341_v37  ;;  %v3235_v44 = vld [vmem:[#allocation20_spill] sm:$0xff] }
  0x46   :  { %3218 = vst [vmem:[#allocation13_spill] sm:$0xff] %v1967_v3  ;;  %v365_v34 = vadd.f32 %v1936_v58, %v364_v35  ;;  %v371_v4 = vadd.f32 %v1943_v31, %v370_v38  ;;  %v400_v14 = vrot.slane %v1989_v7, 4  ;;  %v2012_v32 = vmul.f32 %v3232_v45, %v1899_v16 }
  0x47   :  { %3221 = vst [vmem:[#allocation14_spill] sm:$0xff] %v1971_v61  ;;  %v354_v47 = vrot.slane %v353_v30, 2  ;;  %v2020_v37 = vmul.f32 %v3235_v44, %v1904_v5  ;;  %v338_v35 = vrot.slane %v337_v59, 1  ;;  %v383_v54 = vadd.f32 %v1963_v42, %v382_v25 }
  0x48   :  { %3223 = vst [vmem:[#allocation15_spill] sm:$0xff] %v1975_v52  ;;  %v389_v38 = vadd.f32 %v1977_v46, %v388_v39  ;;  %v2026_v45 = vadd.f32 %v332_v51, %v331_v0  ;;  %v360_v16 = vrot.slane %v359_v13, 2  ;;  %v344_v26 = vrot.slane %v343_v48, 1 }
  0x49   :  { %3225 = vst [vmem:[#allocation16_spill] sm:$0xff] %v1981_v55  ;;  %v2016_v55 = vpop.eup %1380  ;;  %v366_v2 = vrot.slane %v365_v34, 2  ;;  %v372_v61 = vrot.slane %v371_v4, 2  ;;  %v401_v28 = vadd.f32 %v1989_v7, %v400_v14  ;;  %v355_v44 = vadd.f32 %v354_v47, %v353_v30 }
  0x4a   :  { %3226 = vst [vmem:[#allocation56_spill] sm:$0xff] %v1989_v7  ;;  %v2024_v52 = vpop.eup %1382  ;;  %v412_v25 = vrot.slane %v2016_v55, 4  ;;  %v2032_v39 = vadd.f32 %v338_v35, %v337_v59  ;;  %v384_v3 = vrot.slane %v383_v54, 2  ;;  %v390_v51 = vrot.slane %v389_v38, 2 }
  0x4b   :  { %3228 = vst [vmem:[#allocation17_spill] sm:$0xff] %v1993_v10  ;;  %v406_v10 = vrot.slane %v1997_v15, 4  ;;  %v361_v0 = vadd.f32 %v360_v16, %v359_v13  ;;  %1384 = vrcp.f32 %v2026_v45  ;;  %v2036_v33 = vadd.f32 %v344_v26, %v343_v48  ;;  %v3241_v16 = vld [vmem:[#allocation21_spill] sm:$0xff] }
  0x4c   :  { %3229 = vst [vmem:[#allocation57_spill] sm:$0xff] %v1997_v15  ;;  %v367_v14 = vadd.f32 %v366_v2, %v365_v34  ;;  %v373_v30 = vadd.f32 %v372_v61, %v371_v4  ;;  %v402_v47 = vrot.slane %v401_v28, 2  ;;  %v356_v7 = vrot.slane %v355_v44, 1 }
  0x4d   :  { %3231 = vst [vmem:[#allocation18_spill] sm:$0xff] %v2001_v40  ;;  %v377_v40 = vadd.f32 %v1951_v20, %v376_v19  ;;  %v395_v19 = vadd.f32 %v1985_v21, %v394_v43  ;;  %v407_v5 = vadd.f32 %v1997_v15, %v406_v10  ;;  %v413_v59 = vadd.f32 %v2016_v55, %v412_v25 }
  0x4e   :  { %3233 = vst [vmem:[#allocation19_spill] sm:$0xff] %v2012_v32  ;;  %v349_v32 = vadd.f32 %v348_v6, %v347_v63  ;;  %v418_v6 = vrot.slane %v2024_v52, 4  ;;  %v385_v35 = vadd.f32 %v384_v3, %v383_v54  ;;  %v391_v41 = vadd.f32 %v390_v51, %v389_v38  ;;  %v3244_v3 = vld [vmem:[#allocation22_spill] sm:$0xff] }
  0x4f   :  { %3234 = vst [vmem:[#allocation58_spill] sm:$0xff] %v2016_v55  ;;  %v396_v43 = vrot.slane %v395_v19, 2  ;;  %v408_v15 = vrot.slane %v407_v5, 2  ;;  %1386 = vrcp.f32 %v2032_v39  ;;  %v2043_v13 = vmul.f32 %v3241_v16, %v1918_v49 }
  0x50   :  { %3236 = vst [vmem:[#allocation20_spill] sm:$0xff] %v2020_v37  ;;  %v378_v37 = vrot.slane %v377_v40, 2  ;;  %v350_v63 = vrot.slane %v349_v32, 1  ;;  %v419_v8 = vadd.f32 %v2024_v52, %v418_v6  ;;  %v362_v34 = vrot.slane %v361_v0, 1 }
  0x51   :  { %3237 = vst [vmem:[#allocation59_spill] sm:$0xff] %v2024_v52  ;;  %v397_v4 = vadd.f32 %v396_v43, %v395_v19  ;;  %v368_v2 = vrot.slane %v367_v14, 1  ;;  %v374_v61 = vrot.slane %v373_v30, 1  ;;  %1388 = vrcp.f32 %v2036_v33  ;;  %v2048_v48 = vpop.eup %1384  ;;  %v3246_v19 = vld [vmem:[#allocation23_spill] sm:$0xff] }
  0x52   :  { %3238 = vst [vmem:[#allocation60_spill] sm:$0xff] %v2026_v45  ;;  %v379_v10 = vadd.f32 %v378_v37, %v377_v40  ;;  %v2045_v26 = vadd.f32 %v350_v63, %v349_v32  ;;  %v403_v40 = vadd.f32 %v402_v47, %v401_v28  ;;  %v2052_v37 = vmul.f32 %v3244_v3, %v1921_v27 }
  0x53   :  { %3239 = vst [vmem:[#allocation61_spill] sm:$0xff] %v2032_v39  ;;  %v2054_v54 = vadd.f32 %v356_v7, %v355_v44  ;;  %v409_v38 = vadd.f32 %v408_v15, %v407_v5  ;;  %v414_v25 = vrot.slane %v413_v59, 2  ;;  %v386_v32 = vrot.slane %v385_v35, 1 }
  0x54   :  { %3240 = vst [vmem:[#allocation62_spill] sm:$0xff] %v2036_v33  ;;  %v380_v51 = vrot.slane %v379_v10, 1  ;;  %v392_v6 = vrot.slane %v391_v41, 1  ;;  %v420_v63 = vrot.slane %v419_v8, 2  ;;  %v2058_v43 = vmul.f32 %v3246_v19, %v1929_v62 }
  0x55   :  { %3242 = vst [vmem:[#allocation21_spill] sm:$0xff] %v2043_v13  ;;  %v2060_v28 = vadd.f32 %v362_v34, %v361_v0  ;;  %v398_v47 = vrot.slane %v397_v4, 1  ;;  %1390 = vrcp.f32 %v2045_v26  ;;  %v2063_v16 = vpop.eup %1386  ;;  %v2065_v3 = vadd.f32 %v368_v2, %v367_v14 }
  0x56   :  { %3243 = vst [vmem:[#allocation63_spill] sm:$0xff] %v2045_v26  ;;  %v2067_v7 = vadd.f32 %v374_v61, %v373_v30  ;;  %v404_v5 = vrot.slane %v403_v40, 1  ;;  %v425_v15 = vmul.f32 %v2048_v48, %v2026_v45  ;;  %v410_v44 = vrot.slane %v409_v38, 1 }
  0x57   :  { %3245 = vst [vmem:[#allocation22_spill] sm:$0xff] %v2052_v37  ;;  %v415_v37 = vadd.f32 %v414_v25, %v413_v59  ;;  %v440_v19 = vmul.f32 %v2063_v16, %v2032_v39  ;;  %1392 = vrcp.f32 %v2054_v54  ;;  %v2074_v0 = vpop.eup %1388  ;;  %v2076_v34 = vadd.f32 %v380_v51, %v379_v10 }
  0x58   :  { %3247 = vst [vmem:[#allocation23_spill] sm:$0xff] %v2058_v43  ;;  %v2078_v43 = vadd.f32 %v386_v32, %v385_v35  ;;  %v2080_v14 = vadd.f32 %v392_v6, %v391_v41  ;;  %v421_v30 = vadd.f32 %v420_v63, %v419_v8  ;;  %v2082_v2 = vadd.f32 %v398_v47, %v397_v4 }
  0x59   :  { %v433_v61 = vand.u32 2147483647, %v2026_v45  ;;  %v435_v59 = vand.u32 2147483648, %v2026_v45  ;;  %v455_v25 = vmul.f32 %v2074_v0, %v2036_v33  ;;  %v426_v13 = vsub.f32 1.0, %v425_v15 }
  0x5a   :  { %v441_v62 = vsub.f32 1.0, %v440_v19  ;;  %v448_v27 = vand.u32 2147483647, %v2032_v39  ;;  %1394 = vrcp.f32 %v2060_v28  ;;  %v2092_v41 = vadd.f32 %v404_v5, %v403_v40 }
  0x5b   :  { %v2090_v10 = vpop.eup %1390  ;;  %v2094_v8 = vadd.f32 %v410_v44, %v409_v38  ;;  %v416_v35 = vrot.slane %v415_v37, 1  ;;  %vm429_vm6 = vweird.f32 %v2026_v45  ;;  %v422_v4 = vrot.slane %v421_v30, 1 }
  0x5c   :  { %v450_v51 = vand.u32 2147483648, %v2032_v39  ;;  %v456_v32 = vsub.f32 1.0, %v455_v25  ;;  %v470_v6 = vmul.f32 %v2090_v10, %v2045_v26  ;;  %v436_v47 = vor.u32 1.1754944e-38, %v435_v59 }
  0x5d   :  { %3248 = vst [vmem:[#allocation64_spill] sm:$0xff] %v2094_v8  ;;  %v2100_v63 = vpop.eup %1392  ;;  %vm444_vm7 = vweird.f32 %v2032_v39  ;;  %vm459_vm8 = vweird.f32 %v2036_v33  ;;  %v463_v40 = vand.u32 2147483647, %v2036_v33  ;;  %v427_v38 = vmul.f32 %v2048_v48, %v426_v13 }
  0x5e   :  { %vm2106_vm9 = vcmp.eq.f32.partialorder %v433_v61, 8.507059e+37  ;;  %v442_v15 = vmul.f32 %v2063_v16, %v441_v62  ;;  %vm2111_vm10 = vcmp.eq.f32.partialorder %v448_v27, 8.507059e+37  ;;  %v471_v19 = vsub.f32 1.0, %v470_v6 }
  0x5f   :  { %v485_v59 = vmul.f32 %v2100_v63, %v2054_v54  ;;  %v2117_v25 = vadd.f32 %v416_v35, %v415_v37  ;;  %vm430_vm11 = vweird.f32 %v2048_v48  ;;  %v465_v13 = vand.u32 2147483648, %v2036_v33 }
  0x60   :  { %1396 = vrcp.f32 %v2065_v3  ;;  %v2122_v61 = vpop.eup %1394  ;;  %v2124_v52 = vadd.f32 %v422_v4, %v421_v30  ;;  %vm445_vm12 = vweird.f32 %v2063_v16  ;;  %v451_v27 = vor.u32 1.1754944e-38, %v450_v51  ;;  %vm2136_vm4 = vmor %vm429_vm6, %vm430_vm11 }
  0x61   :  { %3253 = vst [vmem:[#allocation65_spill] sm:$0xff] %v2117_v25  ;;  %v457_v62 = vmul.f32 %v2074_v0, %v456_v32  ;;  %vm460_vm13 = vweird.f32 %v2074_v0  ;;  %v478_v37 = vand.u32 2147483647, %v2045_v26  ;;  %v480_v35 = vand.u32 2147483648, %v2045_v26  ;;  %vm2144_vm14 = vmor %vm444_vm7, %vm445_vm12 }
  0x62   :  { %3254 = vst [vmem:[#allocation66_spill] sm:$0xff] %v2124_v52  ;;  %v500_v6 = vmul.f32 %v2122_v61, %v2060_v28  ;;  %v428_v49 = vadd.f32 %v2048_v48, %v427_v38  ;;  %v443_v4 = vadd.f32 %v2063_v16, %v442_v15  ;;  %v472_v51 = vmul.f32 %v2090_v10, %v471_v19  ;;  %vm2163_vm2 = vmor %vm459_vm8, %vm460_vm13 }
  0x63   :  { %v486_v32 = vsub.f32 1.0, %v485_v59  ;;  %vm2148_vm15 = vcmp.eq.f32.partialorder %v463_v40, 8.507059e+37  ;;  %v466_v38 = vor.u32 1.1754944e-38, %v465_v13  ;;  %v493_v45 = vand.u32 2147483647, %v2054_v54 }
  0x64   :  { %1398 = vrcp.f32 %v2067_v7  ;;  %v458_v15 = vadd.f32 %v2074_v0, %v457_v62  ;;  %vm474_vm0 = vweird.f32 %v2045_v26  ;;  %vm475_vm1 = vweird.f32 %v2090_v10 }
  0x65   :  { %v501_v19 = vsub.f32 1.0, %v500_v6  ;;  %vm2167_vm3 = vcmp.eq.f32.partialorder %v478_v37, 8.507059e+37  ;;  %v481_v62 = vor.u32 1.1754944e-38, %v480_v35  ;;  %vm489_vm5 = vweird.f32 %v2054_v54  ;;  %vm2181_vm6 = vmor %vm474_vm0, %vm475_vm1 }
  0x66   :  { %v2157_v59 = vpop.eup %1396  ;;  %v495_v26 = vand.u32 2147483648, %v2054_v54  ;;  %v432_v6 = vsel %vm2136_vm4, %v2048_v48, %v428_v49  ;;  %v447_v33 = vsel %vm2144_vm14, %v2063_v16, %v443_v4  ;;  %v473_v39 = vadd.f32 %v2090_v10, %v472_v51 }
  0x67   :  { %v487_v37 = vmul.f32 %v2100_v63, %v486_v32  ;;  %vm2185_vm7 = vcmp.eq.f32.partialorder %v493_v45, 8.507059e+37  ;;  %vm504_vm8 = vweird.f32 %v2060_v28  ;;  %v508_v49 = vand.u32 2147483647, %v2060_v28 }
  0x68   :  { %v515_v55 = vmul.f32 %v2157_v59, %v2065_v3  ;;  %v462_v48 = vsel %vm2163_vm2, %v2074_v0, %v458_v15  ;;  %vm490_vm11 = vweird.f32 %v2100_v63  ;;  %v502_v16 = vmul.f32 %v2122_v61, %v501_v19 }
  0x69   :  { %1400 = vrcp.f32 %v2076_v34  ;;  %v437_v30 = vsel %vm2106_vm9, %v436_v47, %v432_v6  ;;  %v452_v4 = vsel %vm2111_vm10, %v451_v27, %v447_v33  ;;  %v496_v51 = vor.u32 1.1754944e-38, %v495_v26  ;;  %vm2217_vm9 = vmor %vm489_vm5, %vm490_vm11 }
  0x6a   :  { %v2199_v45 = vpop.eup %1398  ;;  %v510_v32 = vand.u32 2147483648, %v2060_v28  ;;  %v477_v0 = vsel %vm2181_vm6, %v2090_v10, %v473_v39  ;;  %v488_v15 = vadd.f32 %v2100_v63, %v487_v37  ;;  %vm505_vm12 = vweird.f32 %v2122_v61 }
  0x6b   :  { %v530_v19 = vmul.f32 %v2199_v45, %v2067_v7  ;;  %v467_v47 = vsel %vm2148_vm15, %v466_v38, %v462_v48  ;;  %v516_v26 = vsub.f32 1.0, %v515_v55  ;;  %v523_v24 = vand.u32 2147483647, %v2065_v3  ;;  %vm2236_vm13 = vmor %vm504_vm8, %vm505_vm12 }
  0x6c   :  { %1402 = vrcp.f32 %v2078_v43  ;;  %v2224_v39 = vmul.f32 %v1872_v53, %v437_v30  ;;  %v503_v10 = vadd.f32 %v2122_v61, %v502_v16  ;;  %vm2227_vm10 = vcmp.eq.f32.partialorder %v508_v49, 8.507059e+37 }
  0x6d   :  { %v525_v60 = vand.u32 2147483648, %v2065_v3  ;;  %v482_v44 = vsel %vm2167_vm3, %v481_v62, %v477_v0  ;;  %v511_v38 = vor.u32 1.1754944e-38, %v510_v32  ;;  %vm519_vm4 = vweird.f32 %v2065_v3 }
  0x6e   :  { %1404 = vrcp.f32 %v2080_v14  ;;  %v2245_v40 = vmul.f32 %v1881_v9, %v452_v4  ;;  %v2248_v6 = vmul.f32 %v1892_v57, %v467_v47  ;;  %v492_v13 = vsel %vm2217_vm9, %v2100_v63, %v488_v15 }
  0x6f   :  { %v2242_v53 = vpop.eup %1400  ;;  %v531_v62 = vsub.f32 1.0, %v530_v19  ;;  %v517_v37 = vmul.f32 %v2157_v59, %v516_v26  ;;  %vm2254_vm14 = vcmp.eq.f32.partialorder %v523_v24, 8.507059e+37  ;;  %vm534_vm15 = vweird.f32 %v2067_v7 }
  0x70   :  { %v545_v9 = vmul.f32 %v2242_v53, %v2076_v34  ;;  %v2262_v55 = vmul.f32 %v1908_v1, %v482_v44  ;;  %v507_v57 = vsel %vm2236_vm13, %v2122_v61, %v503_v10  ;;  %v526_v63 = vor.u32 1.1754944e-38, %v525_v60 }
  0x71   :  { %v538_v48 = vand.u32 2147483647, %v2067_v7  ;;  %v497_v30 = vsel %vm2185_vm7, %v496_v51, %v492_v13  ;;  %vm520_vm0 = vweird.f32 %v2157_v59  ;;  %v540_v4 = vand.u32 2147483648, %v2067_v7 }
  0x72   :  { %3277 = vst [vmem:[#allocation67_spill] sm:$0xff] %v2262_v55  ;;  %v2268_v16 = vpop.eup %1402  ;;  %1406 = vrcp.f32 %v2082_v2  ;;  %v532_v1 = vmul.f32 %v2199_v45, %v531_v62  ;;  %v553_v32 = vand.u32 2147483647, %v2076_v34  ;;  %v555_v61 = vand.u32 2147483648, %v2076_v34  ;;  %vm2288_vm1 = vmor %vm519_vm4, %vm520_vm0 }
  0x73   :  { %v560_v0 = vmul.f32 %v2268_v16, %v2078_v43  ;;  %v512_v35 = vsel %vm2227_vm10, %v511_v38, %v507_v57  ;;  %v518_v51 = vadd.f32 %v2157_v59, %v517_v37  ;;  %v546_v19 = vsub.f32 1.0, %v545_v9 }
  0x74   :  { %v2280_v15 = vpop.eup %1404  ;;  %1408 = vrcp.f32 %v2092_v41  ;;  %vm535_vm2 = vweird.f32 %v2199_v45  ;;  %vm2293_vm3 = vcmp.eq.f32.partialorder %v538_v48, 8.507059e+37  ;;  %v2300_v10 = vmul.f32 %v1915_v50, %v497_v30 }
  0x75   :  { %v561_v26 = vsub.f32 1.0, %v560_v0  ;;  %v575_v24 = vmul.f32 %v2280_v15, %v2080_v14  ;;  %v541_v5 = vor.u32 1.1754944e-38, %v540_v4  ;;  %vm549_vm5 = vweird.f32 %v2076_v34  ;;  %vm2316_vm6 = vmor %vm534_vm15, %vm535_vm2 }
  0x76   :  { %3282 = vst [vmem:[#allocation68_spill] sm:$0xff] %v2300_v10  ;;  %v568_v60 = vand.u32 2147483647, %v2078_v43  ;;  %v2305_v44 = vmul.f32 %v1926_v56, %v512_v35  ;;  %v533_v27 = vadd.f32 %v2199_v45, %v532_v1  ;;  %1410 = vrcp.f32 %v2094_v8 }
  0x77   :  { %v576_v38 = vsub.f32 1.0, %v575_v24  ;;  %v522_v50 = vsel %vm2288_vm1, %v2157_v59, %v518_v51  ;;  %v547_v56 = vmul.f32 %v2242_v53, %v546_v19  ;;  %vm2321_vm7 = vcmp.eq.f32.partialorder %v553_v32, 8.507059e+37 }
  0x78   :  { %3283 = vst [vmem:[#allocation69_spill] sm:$0xff] %v2305_v44  ;;  %v2309_v13 = vpop.eup %1406  ;;  %v556_v9 = vor.u32 1.1754944e-38, %v555_v61  ;;  %vm564_vm8 = vweird.f32 %v2078_v43  ;;  %v562_v57 = vmul.f32 %v2268_v16, %v561_v26  ;;  %v570_v48 = vand.u32 2147483648, %v2078_v43 }
  0x79   :  { %vm579_vm11 = vweird.f32 %v2080_v14  ;;  %v590_v59 = vmul.f32 %v2309_v13, %v2082_v2  ;;  %vm550_vm12 = vweird.f32 %v2242_v53  ;;  %vm2334_vm9 = vcmp.eq.f32.partialorder %v568_v60, 8.507059e+37 }
  0x7a   :  { %v2331_v30 = vpop.eup %1408  ;;  %v583_v1 = vand.u32 2147483647, %v2080_v14  ;;  %v585_v32 = vand.u32 2147483648, %v2080_v14  ;;  %v527_v61 = vsel %vm2254_vm14, %v526_v63, %v522_v50  ;;  %v537_v0 = vsel %vm2316_vm6, %v2199_v45, %v533_v27  ;;  %vm2355_vm13 = vmor %vm549_vm5, %vm550_vm12 }
  0x7b   :  { %vm565_vm10 = vweird.f32 %v2268_v16  ;;  %v577_v35 = vmul.f32 %v2280_v15, %v576_v38  ;;  %v548_v51 = vadd.f32 %v2242_v53, %v547_v56  ;;  %v591_v19 = vsub.f32 1.0, %v590_v59 }
  0x7c   :  { %v605_v47 = vmul.f32 %v2331_v30, %v2092_v41  ;;  %1412 = vrcp.f32 %v2117_v25  ;;  %v2351_v26 = vpop.eup %1410  ;;  %v563_v45 = vadd.f32 %v2268_v16, %v562_v57  ;;  %v571_v63 = vor.u32 1.1754944e-38, %v570_v48  ;;  %vm2369_vm14 = vmor %vm564_vm8, %vm565_vm10 }
  0x7d   :  { %vm580_vm4 = vweird.f32 %v2280_v15  ;;  %v598_v24 = vand.u32 2147483647, %v2082_v2  ;;  %v2363_v60 = vmul.f32 %v1936_v58, %v527_v61  ;;  %v542_v27 = vsel %vm2293_vm3, %v541_v5, %v537_v0 }
  0x7e   :  { %vm2373_vm15 = vcmp.eq.f32.partialorder %v583_v1, 8.507059e+37  ;;  %v600_v62 = vand.u32 2147483648, %v2082_v2  ;;  %v578_v56 = vadd.f32 %v2280_v15, %v577_v35  ;;  %v586_v57 = vor.u32 1.1754944e-38, %v585_v32  ;;  %vm2387_vm1 = vmor %vm579_vm11, %vm580_vm4 }
  0x7f   :  { %3292 = vst [vmem:[#allocation70_spill] sm:$0xff] %v2363_v60  ;;  %vm594_vm0 = vweird.f32 %v2082_v2  ;;  %v620_v58 = vmul.f32 %v2351_v26, %v2094_v8  ;;  %v552_v33 = vsel %vm2355_vm13, %v2242_v53, %v548_v51  ;;  %v592_v48 = vmul.f32 %v2309_v13, %v591_v19 }
  0x80   :  { %v606_v59 = vsub.f32 1.0, %v605_v47  ;;  %1414 = vrcp.f32 %v2124_v52  ;;  %v2394_v1 = vmul.f32 %v1943_v31, %v542_v27  ;;  %v567_v32 = vsel %vm2369_vm14, %v2268_v16, %v563_v45 }
  0x81   :  { %vm2399_vm2 = vcmp.eq.f32.partialorder %v598_v24, 8.507059e+37  ;;  %v613_v61 = vand.u32 2147483647, %v2092_v41  ;;  %vm595_vm3 = vweird.f32 %v2309_v13  ;;  %v601_v35 = vor.u32 1.1754944e-38, %v600_v62 }
  0x82   :  { %3299 = vst [vmem:[#allocation71_spill] sm:$0xff] %v2394_v1  ;;  %v2404_v0 = vpop.eup %1412  ;;  %vm609_vm5 = vweird.f32 %v2092_v41  ;;  %v615_v31 = vand.u32 2147483648, %v2092_v41  ;;  %v557_v51 = vsel %vm2321_vm7, %v556_v9, %v552_v33  ;;  %v582_v16 = vsel %vm2387_vm1, %v2280_v15, %v578_v56  ;;  %vm2423_vm6 = vmor %vm594_vm0, %vm595_vm3 }
  0x83   :  { %v621_v19 = vsub.f32 1.0, %v620_v58  ;;  %v635_v47 = vmul.f32 %v2404_v0, %v2117_v25  ;;  %v572_v49 = vsel %vm2334_vm9, %v571_v63, %v567_v32  ;;  %v593_v45 = vadd.f32 %v2309_v13, %v592_v48 }
  0x84   :  { %v607_v24 = vmul.f32 %v2331_v30, %v606_v59  ;;  %v628_v27 = vand.u32 2147483647, %v2094_v8  ;;  %vm2427_vm7 = vcmp.eq.f32.partialorder %v613_v61, 8.507059e+37  ;;  %vm624_vm8 = vweird.f32 %v2094_v8 }
  0x85   :  { %v630_v9 = vand.u32 2147483648, %v2094_v8  ;;  %v636_v4 = vsub.f32 1.0, %v635_v47  ;;  %v2436_v38 = vmul.f32 %v1951_v20, %v557_v51  ;;  %v587_v62 = vsel %vm2373_vm15, %v586_v57, %v582_v16 }
  0x86   :  { %v2433_v63 = vpop.eup %1414  ;;  %vm610_vm11 = vweird.f32 %v2331_v30  ;;  %v616_v56 = vor.u32 1.1754944e-38, %v615_v31  ;;  %v2442_v58 = vmul.f32 %v1963_v42, %v572_v49  ;;  %v622_v33 = vmul.f32 %v2351_v26, %v621_v19 }
  0x87   :  { %3306 = vst [vmem:[#allocation72_spill] sm:$0xff] %v2436_v38  ;;  %vm625_vm12 = vweird.f32 %v2351_v26  ;;  %v650_v5 = vmul.f32 %v2433_v63, %v2124_v52  ;;  %v597_v20 = vsel %vm2423_vm6, %v2309_v13, %v593_v45  ;;  %v608_v50 = vadd.f32 %v2331_v30, %v607_v24  ;;  %vm2469_vm10 = vmor %vm609_vm5, %vm610_vm11 }
  0x88   :  { %3307 = vst [vmem:[#allocation73_spill] sm:$0xff] %v2442_v58  ;;  %vm2452_vm9 = vcmp.eq.f32.partialorder %v628_v27, 8.507059e+37  ;;  %v2458_v42 = vmul.f32 %v2224_v39, %v1720_v17  ;;  %v2462_v48 = vmul.f32 %v2245_v40, %v1734_v22  ;;  %v2465_v59 = vmul.f32 %v1977_v46, %v587_v62  ;;  %vm2493_vm15 = vmor %vm624_vm8, %vm625_vm12 }
  0x89   :  { %v631_v32 = vor.u32 1.1754944e-38, %v630_v9  ;;  %v637_v61 = vmul.f32 %v2404_v0, %v636_v4  ;;  %v651_v31 = vsub.f32 1.0, %v650_v5  ;;  %vm639_vm13 = vweird.f32 %v2117_v25 }
  0x8a   :  { %3310 = vst [vmem:[#allocation74_spill] sm:$0xff] %v2465_v59  ;;  %v643_v51 = vand.u32 2147483647, %v2117_v25  ;;  %v645_v16 = vand.u32 2147483648, %v2117_v25  ;;  %v2479_v46 = vmul.f32 %v2248_v6, %v1737_v23  ;;  %v602_v19 = vsel %vm2399_vm2, %v601_v35, %v597_v20 }
  0x8b   :  { %v623_v47 = vadd.f32 %v2351_v26, %v622_v33  ;;  %vm640_vm4 = vweird.f32 %v2404_v0  ;;  %vm654_vm14 = vweird.f32 %v2124_v52  ;;  %v612_v49 = vsel %vm2469_vm10, %v2331_v30, %v608_v50 }
  0x8c   :  { %v2499_v53 = vmul.f32 %v2262_v55, %v3210_v11  ;;  %v1196_v35 = vadd.f32 %v2458_v42, %v1933_v29  ;;  %v1197_v24 = vadd.f32 %v2462_v48, %v1940_v36  ;;  %v638_v30 = vadd.f32 %v2404_v0, %v637_v61  ;;  %vm2517_vm0 = vmor %vm639_vm13, %vm640_vm4  ;;  %v3320_v61 = vld [vmem:[#allocation29_spill] sm:$0xff] }
  0x8d   :  { %v652_v27 = vmul.f32 %v2433_v63, %v651_v31  ;;  %v658_v37 = vand.u32 2147483647, %v2124_v52  ;;  %v2510_v9 = vmul.f32 %v2300_v10, %v3213_v18  ;;  %v2513_v4 = vmul.f32 %v1985_v21, %v602_v19  ;;  %v3322_v19 = vld [vmem:[#allocation11_spill] sm:$0xff] }
  0x8e   :  { %vm2521_vm1 = vcmp.eq.f32.partialorder %v643_v51, 8.507059e+37  ;;  %v646_v5 = vor.u32 1.1754944e-38, %v645_v16  ;;  %v1198_v20 = vadd.f32 %v2479_v46, %v1947_v12  ;;  %v617_v50 = vsel %vm2427_vm7, %v616_v56, %v612_v49  ;;  %v3321_v51 = vld [vmem:[#allocation30_spill] sm:$0xff]  ;;  %v3323_v49 = vld [vmem:[#allocation12_spill] sm:$0xff] }
  0x8f   :  { %3315 = vst [vmem:[#allocation75_spill] sm:$0xff] %v2513_v4  ;;  %v627_v21 = vsel %vm2493_vm15, %v2351_v26, %v623_v47  ;;  %vm655_vm2 = vweird.f32 %v2433_v63  ;;  %v660_v13 = vand.u32 2147483648, %v2124_v52  ;;  %v2536_v31 = vmul.f32 %v2305_v44, %v3320_v61 }
  0x90   :  { %v2540_v16 = vmul.f32 %v2363_v60, %v3321_v51  ;;  %v1199_v15 = vadd.f32 %v2499_v53, %v3322_v19  ;;  %v1212_v56 = vadd.f32 %v1197_v24, %v1196_v35  ;;  %v642_v26 = vsel %vm2517_vm0, %v2404_v0, %v638_v30  ;;  %v3324_v24 = vld [vmem:[#allocation56_spill] sm:$0xff]  ;;  %vm2565_vm5 = vmor %vm654_vm14, %vm655_vm2 }
  0x91   :  { %v653_v47 = vadd.f32 %v2433_v63, %v652_v27  ;;  %v1200_v45 = vadd.f32 %v2510_v9, %v3323_v49  ;;  %vm969_vm3 = vcmask 1040384   ;;  %v2557_v55 = vmul.f32 %v3324_v24, %v617_v50  ;;  %v3343_v27 = vld [vmem:[#allocation50_spill] sm:$0xff] }
  0x92   :  { %v1213_v44 = vadd.f32 %v1212_v56, %v1198_v20  ;;  %v1107_v10 = vsel %vm969_vm3, %v1720_v17, 0.0  ;;  %v1108_v60 = vsel %vm969_vm3, %v1734_v22, 0.0  ;;  %v1110_v35 = vsel %vm969_vm3, %v1737_v23, 0.0  ;;  %v3330_v20 = vld [vmem:[#allocation38_spill] sm:$0xff]  ;;  %v3331_v56 = vld [vmem:[#allocation13_spill] sm:$0xff] }
  0x93   :  { %3325 = vst [vmem:[#allocation12_spill] sm:$0xff] %v2557_v55  ;;  %v632_v0 = vsel %vm2452_vm9, %v631_v32, %v627_v21  ;;  %vm2569_vm6 = vcmp.eq.f32.partialorder %v658_v37, 8.507059e+37  ;;  %v1109_v62 = vadd.f32 %v1108_v60, %v1107_v10  ;;  %v2575_v50 = vmul.f32 %v2394_v1, %v3330_v20  ;;  %v3332_v37 = vld [vmem:[#allocation42_spill] sm:$0xff] }
  0x94   :  { %v1201_v57 = vadd.f32 %v2536_v31, %v3331_v56  ;;  %v1214_v32 = vadd.f32 %v1213_v44, %v1199_v15  ;;  %v1112_v21 = vsel %vm969_vm3, %v3210_v11, 0.0  ;;  %v647_v24 = vsel %vm2521_vm1, %v646_v5, %v642_v26  ;;  %v3333_v1 = vld [vmem:[#allocation14_spill] sm:$0xff]  ;;  %v3334_v11 = vld [vmem:[#allocation57_spill] sm:$0xff]  ;;  %v3336_v5 = vld [vmem:[#allocation44_spill] sm:$0xff] }
  0x95   :  { %v661_v23 = vor.u32 1.1754944e-38, %v660_v13  ;;  %v2585_v22 = vmul.f32 %v2436_v38, %v3332_v37  ;;  %v1111_v10 = vadd.f32 %v1110_v35, %v1109_v62  ;;  %v657_v60 = vsel %vm2565_vm5, %v2433_v63, %v653_v47  ;;  %v3337_v26 = vld [vmem:[#allocation48_spill] sm:$0xff]  ;;  %v3338_v63 = vld [vmem:[#allocation58_spill] sm:$0xff]  ;;  %v3340_v62 = vld [vmem:[#allocation15_spill] sm:$0xff] }
  0x96   :  { %v1202_v17 = vadd.f32 %v2540_v16, %v3333_v1  ;;  %v1215_v44 = vadd.f32 %v1214_v32, %v1200_v45  ;;  %v1114_v15 = vsel %vm969_vm3, %v3213_v18, 0.0  ;;  %v2595_v33 = vmul.f32 %v3334_v11, %v632_v0 }
  0x97   :  { %v2599_v13 = vmul.f32 %v2442_v58, %v3336_v5  ;;  %v2603_v35 = vmul.f32 %v2465_v59, %v3337_v26  ;;  %v1113_v30 = vadd.f32 %v1112_v21, %v1111_v10  ;;  %v2606_v47 = vmul.f32 %v3338_v63, %v647_v24  ;;  %v3341_v10 = vld [vmem:[#allocation49_spill] sm:$0xff]  ;;  %v3342_v63 = vld [vmem:[#allocation16_spill] sm:$0xff] }
  0x98   :  { %3335 = vst [vmem:[#allocation56_spill] sm:$0xff] %v2595_v33  ;;  %v1203_v45 = vadd.f32 %v2575_v50, %v3340_v62  ;;  %v1216_v32 = vadd.f32 %v1215_v44, %v1201_v57  ;;  %v1116_v11 = vsel %vm969_vm3, %v3320_v61, 0.0  ;;  %v662_v0 = vsel %vm2569_vm6, %v661_v23, %v657_v60  ;;  %v3344_v60 = vld [vmem:[#allocation52_spill] sm:$0xff]  ;;  %v3347_v61 = vld [vmem:[#allocation17_spill] sm:$0xff] }
  0x99   :  { %3339 = vst [vmem:[#allocation13_spill] sm:$0xff] %v2606_v47  ;;  %v1115_v58 = vadd.f32 %v1114_v15, %v1113_v30  ;;  %v1159_v38 = vmul.f32 %v2458_v42, %v1933_v29  ;;  %v1160_v21 = vmul.f32 %v2462_v48, %v1940_v36  ;;  %v2620_v24 = vmul.f32 %v2513_v4, %v3341_v10  ;;  %v3345_v30 = vld [vmem:[#allocation59_spill] sm:$0xff] }
  0x9a   :  { %v1204_v57 = vadd.f32 %v2585_v22, %v3342_v63  ;;  %v1217_v44 = vadd.f32 %v1216_v32, %v1202_v17  ;;  %v1118_v59 = vsel %vm969_vm3, %v3321_v51, 0.0  ;;  %v2628_v23 = vmul.f32 %v2557_v55, %v3343_v27  ;;  %v3348_v55 = vld [vmem:[#allocation53_spill] sm:$0xff] }
  0x9b   :  { %v2632_v42 = vmul.f32 %v2595_v33, %v3344_v60  ;;  %v1117_v48 = vadd.f32 %v1116_v11, %v1115_v58  ;;  %v1161_v15 = vmul.f32 %v2479_v46, %v1947_v12  ;;  %v2637_v4 = vmul.f32 %v3345_v30, %v662_v0  ;;  %v3349_v46 = vld [vmem:[#allocation18_spill] sm:$0xff]  ;;  %v3350_v30 = vld [vmem:[#allocation19_spill] sm:$0xff] }
  0x9c   :  { %v1205_v17 = vadd.f32 %v2599_v13, %v3347_v61  ;;  %v1218_v32 = vadd.f32 %v1217_v44, %v1203_v45  ;;  %v1120_v51 = vsel %vm969_vm3, %v3330_v20, 0.0  ;;  %v2645_v18 = vmul.f32 %v2606_v47, %v3348_v55  ;;  %v3351_v44 = vld [vmem:[#allocation20_spill] sm:$0xff] }
  0x9d   :  { %3346 = vst [vmem:[#allocation14_spill] sm:$0xff] %v2637_v4  ;;  %v1119_v33 = vadd.f32 %v1118_v59, %v1117_v48  ;;  %v1162_v58 = vmul.f32 %v2499_v53, %v3322_v19  ;;  %v1175_v11 = vadd.f32 %v1160_v21, %v1159_v38  ;;  %v1206_v0 = vadd.f32 %v2603_v35, %v3349_v46  ;;  %v3352_v53 = vld [vmem:[#allocation55_spill] sm:$0xff]  ;;  %v3353_v21 = vld [vmem:[#allocation21_spill] sm:$0xff] }
  0x9e   :  { %v1207_v52 = vadd.f32 %v2620_v24, %v3350_v30  ;;  %v1219_v25 = vadd.f32 %v1218_v32, %v1204_v57  ;;  %v1122_v45 = vsel %vm969_vm3, %v3332_v37, 0.0  ;;  %v1208_v20 = vadd.f32 %v2628_v23, %v3351_v44 }
  0x9f   :  { %v1121_v47 = vadd.f32 %v1120_v51, %v1119_v33  ;;  %v1163_v59 = vmul.f32 %v2510_v9, %v3323_v49  ;;  %v1176_v48 = vadd.f32 %v1175_v11, %v1161_v15  ;;  %v2661_v38 = vmul.f32 %v2637_v4, %v3352_v53  ;;  %v3354_v15 = vld [vmem:[#allocation60_spill] sm:$0xff]  ;;  %v3355_v4 = vld [vmem:[#allocation61_spill] sm:$0xff] }
  0xa0   :  { %v1209_v19 = vadd.f32 %v2632_v42, %v3353_v21  ;;  %v1220_v8 = vadd.f32 %v1219_v25, %v1205_v17  ;;  %v1124_v57 = vsel %vm969_vm3, %v3336_v5, 0.0  ;;  %v1126_v37 = vsel %vm969_vm3, %v3337_v26, 0.0 }
  0xa1   :  { %v1123_v32 = vadd.f32 %v1122_v45, %v1121_v47  ;;  %v1164_v51 = vmul.f32 %v2536_v31, %v3331_v56  ;;  %v1177_v9 = vadd.f32 %v1176_v48, %v1162_v58  ;;  %1416 = vlog2.f32 %v3354_v15  ;;  %v3356_v58 = vld [vmem:[#allocation62_spill] sm:$0xff] }
  0xa2   :  { %v1221_v33 = vadd.f32 %v1220_v8, %v1206_v0  ;;  %v2674_v11 = vmul.f32 %v2224_v39, %v1933_v29  ;;  %v2678_v25 = vmul.f32 %v2245_v40, %v1940_v36  ;;  %v1165_v47 = vmul.f32 %v2540_v16, %v3333_v1  ;;  %v3358_v16 = vld [vmem:[#allocation22_spill] sm:$0xff] }
  0xa3   :  { %v1125_v17 = vadd.f32 %v1124_v57, %v1123_v32  ;;  %v1178_v45 = vadd.f32 %v1177_v9, %v1163_v59  ;;  %1418 = vlog2.f32 %v3355_v4  ;;  %v1128_v8 = vsel %vm969_vm3, %v3341_v10, 0.0  ;;  %v3357_v57 = vld [vmem:[#allocation63_spill] sm:$0xff] }
  0xa4   :  { %v1222_v31 = vadd.f32 %v1221_v33, %v1207_v52  ;;  %1420 = vlog2.f32 %v3356_v58  ;;  %v2688_v39 = vmul.f32 %v2248_v6, %v1947_v12  ;;  %v1166_v40 = vmul.f32 %v2575_v50, %v3340_v62 }
  0xa5   :  { %v1127_v0 = vadd.f32 %v1126_v37, %v1125_v17  ;;  %v1179_v48 = vadd.f32 %v1178_v45, %v1164_v51  ;;  %1422 = vlog2.f32 %v3357_v57  ;;  %v1210_v4 = vadd.f32 %v2645_v18, %v3358_v16  ;;  %v3359_v51 = vld [vmem:[#allocation23_spill] sm:$0xff] }
  0xa6   :  { %v1223_v52 = vadd.f32 %v1222_v31, %v1208_v20  ;;  %v1130_v59 = vsel %vm969_vm3, %v3343_v27, 0.0  ;;  %1424 = vlog2.f32 %v2054_v54  ;;  %v1167_v6 = vmul.f32 %v2585_v22, %v3342_v63 }
  0xa7   :  { %v1129_v32 = vadd.f32 %v1128_v8, %v1127_v0  ;;  %v1180_v37 = vadd.f32 %v1179_v48, %v1165_v47  ;;  %1426 = vlog2.f32 %v2060_v28  ;;  %v1417_v50 = vpop.eup %1416  ;;  %v1211_v9 = vadd.f32 %v2661_v38, %v3359_v51 }
  0xa8   :  { %v1224_v33 = vadd.f32 %v1223_v52, %v1209_v19  ;;  %v1132_v20 = vsel %vm969_vm3, %v3344_v60, 0.0  ;;  %v1168_v54 = vmul.f32 %v2599_v13, %v3347_v61  ;;  %v1134_v22 = vsel %vm969_vm3, %v3348_v55, 0.0 }
  0xa9   :  { %v1419_v15 = vpop.eup %1418  ;;  %v1131_v17 = vadd.f32 %v1130_v59, %v1129_v32  ;;  %v1181_v45 = vadd.f32 %v1180_v37, %v1166_v40  ;;  %1428 = vlog2.f32 %v2065_v3  ;;  %v1169_v19 = vmul.f32 %v2603_v35, %v3349_v46 }
  0xaa   :  { %v1421_v31 = vpop.eup %1420  ;;  %v1225_v8 = vadd.f32 %v1224_v33, %v1210_v4  ;;  %1430 = vlog2.f32 %v2067_v7  ;;  %v1136_v13 = vsel %vm969_vm3, %v3352_v53, 0.0  ;;  %v1170_v4 = vmul.f32 %v2620_v24, %v3350_v30  ;;  %v3377_v53 = vld [vmem:[#allocation47_spill] sm:$0xff] }
  0xab   :  { %v1423_v28 = vpop.eup %1422  ;;  %v1133_v47 = vadd.f32 %v1132_v20, %v1131_v17  ;;  %v1182_v58 = vadd.f32 %v1181_v45, %v1167_v6  ;;  %v665_v3 = vmul.f32 0.6931472, %v1417_v50  ;;  %v667_v59 = vmul.f32 0.6931472, %v1419_v15  ;;  %v3361_v17 = vld [vmem:[#allocation32_spill] sm:$0xff] }
  0xac   :  { %v1425_v0 = vpop.eup %1424  ;;  %v1226_v48 = vadd.f32 %v1225_v8, %v1211_v9  ;;  %v669_v32 = vmul.f32 0.6931472, %v1421_v31  ;;  %1432 = vlog2.f32 %v2076_v34  ;;  %v1171_v7 = vmul.f32 %v2628_v23, %v3351_v44  ;;  %v3360_v34 = vld [vmem:[#allocation31_spill] sm:$0xff] }
  0xad   :  { %v1427_v40 = vpop.eup %1426  ;;  %v1135_v57 = vadd.f32 %v1134_v22, %v1133_v47  ;;  %v1183_v52 = vadd.f32 %v1182_v58, %v1168_v54  ;;  %1434 = vlog2.f32 %v2078_v43  ;;  %v671_v9 = vmul.f32 0.6931472, %v1423_v28  ;;  %v3362_v54 = vld [vmem:[#allocation33_spill] sm:$0xff]  ;;  %v3363_v22 = vld [vmem:[#allocation64_spill] sm:$0xff]  ;;  %v3364_v47 = vld [vmem:[#allocation34_spill] sm:$0xff] }
  0xae   :  { %1227 = vadd.xlane.f32.xlu0 %v1226_v48  ;;  %v673_v33 = vmul.f32 0.6931472, %v1425_v0  ;;  %v675_v20 = vmul.f32 0.6931472, %v1427_v40  ;;  %1436 = vlog2.f32 %v2080_v14  ;;  %v1172_v50 = vmul.f32 %v2632_v42, %v3353_v21 }
  0xaf   :  { %v1137_v35 = vadd.f32 %v1136_v13, %v1135_v57  ;;  %v1184_v6 = vadd.f32 %v1183_v52, %v1169_v19  ;;  %v1429_v37 = vpop.eup %1428  ;;  %1438 = vlog2.f32 %v2082_v2  ;;  %v696_v23 = vsub.f32 %v3360_v34, %v665_v3  ;;  %v3365_v2 = vld [vmem:[#allocation35_spill] sm:$0xff]  ;;  %v3367_v57 = vld [vmem:[#allocation65_spill] sm:$0xff] }
  0xb0   :  { %v1431_v24 = vpop.eup %1430  ;;  %1440 = vlog2.f32 %v2092_v41  ;;  %v697_v43 = vsub.f32 %v3361_v17, %v667_v59  ;;  %v698_v45 = vsub.f32 %v3362_v54, %v669_v32  ;;  %v1173_v31 = vmul.f32 %v2645_v18, %v3358_v16  ;;  %v3366_v41 = vld [vmem:[#allocation36_spill] sm:$0xff] }
  0xb1   :  { %1138 = vadd.xlane.f32.xlu1 %v1137_v35  ;;  %v1185_v15 = vadd.f32 %v1184_v6, %v1170_v4  ;;  %v677_v8 = vmul.f32 0.6931472, %v1429_v37  ;;  %1442 = vlog2.f32 %v3363_v22  ;;  %v679_v42 = vmul.f32 0.6931472, %v1431_v24  ;;  %v3368_v4 = vld [vmem:[#allocation66_spill] sm:$0xff] }
  0xb2   :  { %v1433_v28 = vpop.eup %1432  ;;  %v699_v19 = vsub.f32 %v3364_v47, %v671_v9  ;;  %v700_v58 = vsub.f32 %v3365_v2, %v673_v33  ;;  %v701_v0 = vsub.f32 %v3366_v41, %v675_v20  ;;  %v1174_v13 = vmul.f32 %v2661_v38, %v3359_v51  ;;  %v3370_v9 = vld [vmem:[#allocation39_spill] sm:$0xff] }
  0xb3   :  { %v1186_v14 = vadd.f32 %v1185_v15, %v1171_v7  ;;  %v1435_v48 = vpop.eup %1434  ;;  %1444 = vlog2.f32 %v3367_v57  ;;  %v824_v52 = vmul.f32 %v696_v23, %v1933_v29  ;;  %v825_v3 = vmul.f32 %v697_v43, %v1940_v36  ;;  %v3369_v7 = vld [vmem:[#allocation37_spill] sm:$0xff]  ;;  %v3371_v38 = vld [vmem:[#allocation11_spill] sm:$0xff] }
  0xb4   :  { %v1437_v18 = vpop.eup %1436  ;;  %1446 = vlog2.f32 %v3368_v4  ;;  %v826_v59 = vmul.f32 %v698_v45, %v1947_v12  ;;  %v702_v6 = vsub.f32 %v3369_v7, %v677_v8  ;;  %v703_v33 = vsub.f32 %v3370_v9, %v679_v42  ;;  %v3374_v4 = vld [vmem:[#allocation43_spill] sm:$0xff] }
  0xb5   :  { %v1187_v40 = vadd.f32 %v1186_v14, %v1172_v50  ;;  %v1439_v32 = vpop.eup %1438  ;;  %v827_v20 = vmul.f32 %v699_v19, %v3371_v38  ;;  %v828_v24 = vmul.f32 %v700_v58, %v3323_v49  ;;  %v829_v50 = vmul.f32 %v701_v0, %v3331_v56  ;;  %v3372_v58 = vld [vmem:[#allocation40_spill] sm:$0xff] }
  0xb6   :  { %v1441_v37 = vpop.eup %1440  ;;  %v681_v29 = vmul.f32 0.6931472, %v1433_v28  ;;  %v840_v23 = vrot.slane %v824_v52, 4  ;;  %v846_v36 = vrot.slane %v825_v3, 4  ;;  %v852_v17 = vrot.slane %v826_v59, 4 }
  0xb7   :  { %v1188_v35 = vadd.f32 %v1187_v40, %v1173_v31  ;;  %v1443_v15 = vpop.eup %1442  ;;  %v683_v43 = vmul.f32 0.6931472, %v1435_v48  ;;  %v685_v54 = vmul.f32 0.6931472, %v1437_v18  ;;  %v830_v45 = vmul.f32 %v702_v6, %v3333_v1  ;;  %v3373_v48 = vld [vmem:[#allocation41_spill] sm:$0xff] }
  0xb8   :  { %v831_v14 = vmul.f32 %v703_v33, %v3340_v62  ;;  %v858_v8 = vrot.slane %v827_v20, 4  ;;  %v864_v22 = vrot.slane %v828_v24, 4  ;;  %v870_v42 = vrot.slane %v829_v50, 4  ;;  %v3375_v62 = vld [vmem:[#allocation45_spill] sm:$0xff] }
  0xb9   :  { %v1189_v34 = vadd.f32 %v1188_v35, %v1174_v13  ;;  %v1445_v12 = vpop.eup %1444  ;;  %v687_v47 = vmul.f32 0.6931472, %v1439_v32  ;;  %v689_v19 = vmul.f32 0.6931472, %v1441_v37  ;;  %v691_v2 = vmul.f32 0.6931472, %v1443_v15 }
  0xba   :  { %v1447_v31 = vpop.eup %1446  ;;  %v704_v28 = vsub.f32 %v3372_v58, %v681_v29  ;;  %v693_v41 = vmul.f32 0.6931472, %v1445_v12  ;;  %v841_v0 = vadd.f32 %v840_v23, %v824_v52  ;;  %v847_v13 = vadd.f32 %v846_v36, %v825_v3  ;;  %v3376_v37 = vld [vmem:[#allocation46_spill] sm:$0xff]  ;;  %v3378_v3 = vld [vmem:[#allocation51_spill] sm:$0xff] }
  0xbb   :  { %1190 = vadd.xlane.f32.xlu0 %v1189_v34  ;;  %v853_v40 = vadd.f32 %v852_v17, %v826_v59  ;;  %v695_v57 = vmul.f32 0.6931472, %v1447_v31  ;;  %v705_v18 = vsub.f32 %v3373_v48, %v683_v43  ;;  %v706_v35 = vsub.f32 %v3374_v4, %v685_v54  ;;  %v3379_v12 = vld [vmem:[#allocation54_spill] sm:$0xff] }
  0xbc   :  { %v876_v7 = vrot.slane %v830_v45, 4  ;;  %v859_v6 = vadd.f32 %v858_v8, %v827_v20  ;;  %v865_v9 = vadd.f32 %v864_v22, %v828_v24  ;;  %v871_v33 = vadd.f32 %v870_v42, %v829_v50 }
  0xbd   :  { %v882_v34 = vrot.slane %v831_v14, 4  ;;  %v707_v32 = vsub.f32 %v3375_v62, %v687_v47  ;;  %v708_v15 = vsub.f32 %v3376_v37, %v689_v19  ;;  %v709_v29 = vsub.f32 %v3377_v53, %v691_v2 }
  0xbe   :  { %v832_v52 = vmul.f32 %v704_v28, %v3342_v63  ;;  %v710_v59 = vsub.f32 %v3378_v3, %v693_v41  ;;  %v842_v23 = vrot.slane %v841_v0, 2  ;;  %v848_v36 = vrot.slane %v847_v13, 2 }
  0xbf   :  { %v854_v17 = vrot.slane %v853_v40, 2  ;;  %v711_v43 = vsub.f32 %v3379_v12, %v695_v57  ;;  %v833_v20 = vmul.f32 %v705_v18, %v3347_v61  ;;  %v834_v24 = vmul.f32 %v706_v35, %v3349_v46 }
  0xc0   :  { %v877_v50 = vadd.f32 %v876_v7, %v830_v45  ;;  %v860_v54 = vrot.slane %v859_v6, 2  ;;  %v866_v62 = vrot.slane %v865_v9, 2  ;;  %v872_v31 = vrot.slane %v871_v33, 2 }
  0xc1   :  { %v883_v8 = vadd.f32 %v882_v34, %v831_v14  ;;  %v835_v53 = vmul.f32 %v707_v32, %v3350_v30  ;;  %v836_v22 = vmul.f32 %v708_v15, %v3351_v44  ;;  %v837_v42 = vmul.f32 %v709_v29, %v3353_v21 }
  0xc2   :  { %v888_v47 = vrot.slane %v832_v52, 4  ;;  %v838_v19 = vmul.f32 %v710_v59, %v3358_v16  ;;  %v843_v2 = vadd.f32 %v842_v23, %v841_v0  ;;  %v849_v58 = vadd.f32 %v848_v36, %v847_v13 }
  0xc3   :  { %v855_v28 = vadd.f32 %v854_v17, %v853_v40  ;;  %v839_v41 = vmul.f32 %v711_v43, %v3359_v51  ;;  %v878_v57 = vrot.slane %v877_v50, 2  ;;  %v894_v45 = vrot.slane %v833_v20, 4 }
  0xc4   :  { %v900_v48 = vrot.slane %v834_v24, 4  ;;  %v861_v18 = vadd.f32 %v860_v54, %v859_v6  ;;  %v867_v4 = vadd.f32 %v866_v62, %v865_v9  ;;  %v873_v14 = vadd.f32 %v872_v31, %v871_v33 }
  0xc5   :  { %v884_v35 = vrot.slane %v883_v8, 2  ;;  %v889_v7 = vadd.f32 %v888_v47, %v832_v52  ;;  %v906_v34 = vrot.slane %v835_v53, 4  ;;  %v912_v32 = vrot.slane %v836_v22, 4 }
  0xc6   :  { %v918_v37 = vrot.slane %v837_v42, 4  ;;  %v844_v15 = vrot.slane %v843_v2, 1  ;;  %v850_v29 = vrot.slane %v849_v58, 1  ;;  %v856_v3 = vrot.slane %v855_v28, 1 }
  0xc7   :  { %v924_v59 = vrot.slane %v838_v19, 4  ;;  %v879_v0 = vadd.f32 %v878_v57, %v877_v50  ;;  %v895_v13 = vadd.f32 %v894_v45, %v833_v20  ;;  %v901_v40 = vadd.f32 %v900_v48, %v834_v24 }
  0xc8   :  { %v930_v23 = vrot.slane %v839_v41, 4  ;;  %v862_v36 = vrot.slane %v861_v18, 1  ;;  %v868_v17 = vrot.slane %v867_v4, 1  ;;  %v874_v12 = vrot.slane %v873_v14, 1 }
  0xc9   :  { %v885_v43 = vadd.f32 %v884_v35, %v883_v8  ;;  %v890_v6 = vrot.slane %v889_v7, 2  ;;  %v907_v9 = vadd.f32 %v906_v34, %v835_v53  ;;  %v913_v33 = vadd.f32 %v912_v32, %v836_v22  ;;  %v3380_v32 = vld [vmem:[#allocation24_spill] sm:$0xff] }
  0xca   :  { %v919_v54 = vadd.f32 %v918_v37, %v837_v42  ;;  %v2765_v52 = vadd.f32 %v844_v15, %v843_v2  ;;  %v2767_v62 = vadd.f32 %v850_v29, %v849_v58  ;;  %v2769_v31 = vadd.f32 %v856_v3, %v855_v28  ;;  %v3381_v37 = vld [vmem:[#allocation25_spill] sm:$0xff]  ;;  %v3382_v29 = vld [vmem:[#allocation26_spill] sm:$0xff] }
  0xcb   :  { %v925_v47 = vadd.f32 %v924_v59, %v838_v19  ;;  %v880_v51 = vrot.slane %v879_v0, 1  ;;  %v896_v50 = vrot.slane %v895_v13, 2  ;;  %v902_v20 = vrot.slane %v901_v40, 2 }
  0xcc   :  { %v931_v24 = vadd.f32 %v930_v23, %v839_v41  ;;  %v2771_v57 = vadd.f32 %v862_v36, %v861_v18  ;;  %v2773_v45 = vadd.f32 %v868_v17, %v867_v4  ;;  %v2775_v8 = vadd.f32 %v874_v12, %v873_v14  ;;  %v3383_v17 = vld [vmem:[#allocation27_spill] sm:$0xff] }
  0xcd   :  { %v886_v53 = vrot.slane %v885_v43, 1  ;;  %v891_v22 = vadd.f32 %v890_v6, %v889_v7  ;;  %v908_v42 = vrot.slane %v907_v9, 2  ;;  %v914_v2 = vrot.slane %v913_v33, 2 }
  0xce   :  { %v920_v48 = vrot.slane %v919_v54, 2  ;;  %v926_v58 = vrot.slane %v925_v47, 2  ;;  %v3093_v28 = vsub.f32 0.0, %v2765_v52  ;;  %v3092_v19 = vsub.f32 0.0, %v2767_v62 }
  0xcf   :  { %v3096_v35 = vsub.f32 0.0, %v2769_v31  ;;  %v2780_v34 = vadd.f32 %v880_v51, %v879_v0  ;;  %v897_v41 = vadd.f32 %v896_v50, %v895_v13  ;;  %v903_v18 = vadd.f32 %v902_v20, %v901_v40 }
  0xd0   :  { %v932_v4 = vrot.slane %v931_v24, 2  ;;  %v3095_v14 = vsub.f32 0.0, %v2771_v57  ;;  %v953_v7 = vmul.f32 %v3093_v28, %v3380_v32  ;;  %v954_v15 = vmul.f32 %v3092_v19, %v3381_v37  ;;  %v3384_v28 = vld [vmem:[#allocation28_spill] sm:$0xff] }
  0xd1   :  { %v955_v3 = vmul.f32 %v3096_v35, %v3382_v29  ;;  %v2792_v59 = vadd.f32 %v886_v53, %v885_v43  ;;  %v892_v51 = vrot.slane %v891_v22, 1  ;;  %v909_v0 = vadd.f32 %v908_v42, %v907_v9 }
  0xd2   :  { %v915_v13 = vadd.f32 %v914_v2, %v913_v33  ;;  %v921_v40 = vadd.f32 %v920_v48, %v919_v54  ;;  %v927_v23 = vadd.f32 %v926_v58, %v925_v47  ;;  %v3094_v36 = vsub.f32 0.0, %v2773_v45  ;;  %v3385_v58 = vld [vmem:[#allocation29_spill] sm:$0xff] }
  0xd3   :  { %v956_v12 = vmul.f32 %v3095_v14, %v3383_v17  ;;  %v898_v6 = vrot.slane %v897_v41, 1  ;;  %v904_v50 = vrot.slane %v903_v18, 1  ;;  %v933_v20 = vadd.f32 %v932_v4, %v931_v24 }
  0xd4   :  { %v3097_v19 = vsub.f32 0.0, %v2775_v8  ;;  %v957_v43 = vmul.f32 %v3094_v36, %v3384_v28  ;;  %v970_v9 = vsel %vm969_vm3, %v953_v7, 0.0  ;;  %v971_v33 = vsel %vm969_vm3, %v954_v15, 0.0 }
  0xd5   :  { %v973_v54 = vsel %vm969_vm3, %v955_v3, 0.0  ;;  %v2805_v47 = vadd.f32 %v892_v51, %v891_v22  ;;  %v910_v53 = vrot.slane %v909_v0, 1  ;;  %v916_v42 = vrot.slane %v915_v13, 1  ;;  %v3386_v51 = vld [vmem:[#allocation30_spill] sm:$0xff] }
  0xd6   :  { %v972_v2 = vadd.f32 %v971_v33, %v970_v9  ;;  %v922_v48 = vrot.slane %v921_v40, 1  ;;  %v3098_v24 = vsub.f32 0.0, %v2780_v34  ;;  %v958_v4 = vmul.f32 %v3097_v19, %v3385_v58 }
  0xd7   :  { %v975_v36 = vsel %vm969_vm3, %v956_v12, 0.0  ;;  %v2812_v14 = vadd.f32 %v898_v6, %v897_v41  ;;  %v928_v7 = vrot.slane %v927_v23, 1  ;;  %v934_v15 = vrot.slane %v933_v20, 1 }
  0xd8   :  { %v974_v35 = vadd.f32 %v973_v54, %v972_v2  ;;  %v2814_v3 = vadd.f32 %v904_v50, %v903_v18  ;;  %v3100_v22 = vsub.f32 0.0, %v2792_v59  ;;  %v959_v9 = vmul.f32 %v3098_v24, %v3386_v51  ;;  %v3390_v54 = vld [vmem:[#allocation38_spill] sm:$0xff] }
  0xd9   :  { %v977_v33 = vsel %vm969_vm3, %v957_v43, 0.0  ;;  %v2821_v28 = vadd.f32 %v910_v53, %v909_v0  ;;  %v2823_v19 = vadd.f32 %v916_v42, %v915_v13  ;;  %v2825_v41 = vadd.f32 %v922_v48, %v921_v40 }
  0xda   :  { %v976_v12 = vadd.f32 %v975_v36, %v974_v35  ;;  %v3099_v6 = vsub.f32 0.0, %v2805_v47  ;;  %v960_v18 = vmul.f32 %v3100_v22, %v3390_v54  ;;  %v979_v50 = vsel %vm969_vm3, %v958_v4, 0.0  ;;  %v3393_v35 = vld [vmem:[#allocation42_spill] sm:$0xff] }
  0xdb   :  { %3387 = vst [vmem:[#allocation57_spill] sm:$0xff] %v2821_v28  ;;  %v2832_v2 = vadd.f32 %v928_v7, %v927_v23  ;;  %v2834_v24 = vadd.f32 %v934_v15, %v933_v20  ;;  %v3101_v0 = vsub.f32 0.0, %v2812_v14  ;;  %v3102_v13 = vsub.f32 0.0, %v2814_v3  ;;  %v3394_v23 = vld [vmem:[#allocation67_spill] sm:$0xff] }
  0xdc   :  { %3388 = vst [vmem:[#allocation58_spill] sm:$0xff] %v2823_v19  ;;  %v978_v43 = vadd.f32 %v977_v33, %v976_v12  ;;  %v961_v40 = vmul.f32 %v3099_v6, %v3393_v35  ;;  %v981_v36 = vsel %vm969_vm3, %v959_v9, 0.0  ;;  %v3106_v53 = vsub.f32 0.0, %v2821_v28  ;;  %v3395_v33 = vld [vmem:[#allocation68_spill] sm:$0xff] }
  0xdd   :  { %3389 = vst [vmem:[#allocation16_spill] sm:$0xff] %v2825_v41  ;;  %v3105_v42 = vsub.f32 0.0, %v2823_v19  ;;  %v715_v20 = vmul.f32 %v3394_v23, %v3371_v38  ;;  %v962_v7 = vmul.f32 %v3101_v0, %v3336_v5  ;;  %v983_v15 = vsel %vm969_vm3, %v960_v18, 0.0  ;;  %v3396_v18 = vld [vmem:[#allocation69_spill] sm:$0xff] }
  0xde   :  { %3391 = vst [vmem:[#allocation59_spill] sm:$0xff] %v2832_v2  ;;  %v980_v48 = vadd.f32 %v979_v50, %v978_v43  ;;  %v716_v12 = vmul.f32 %v3395_v33, %v3323_v49  ;;  %v728_v6 = vrot.slane %v2674_v11, 4  ;;  %v734_v22 = vrot.slane %v2678_v25, 4 }
  0xdf   :  { %3392 = vst [vmem:[#allocation17_spill] sm:$0xff] %v2834_v24  ;;  %v740_v50 = vrot.slane %v2688_v39, 4  ;;  %v963_v43 = vmul.f32 %v3102_v13, %v3337_v26  ;;  %v985_v23 = vsel %vm969_vm3, %v961_v40, 0.0  ;;  %v717_v0 = vmul.f32 %v3396_v18, %v3331_v56  ;;  %v3397_v13 = vld [vmem:[#allocation70_spill] sm:$0xff] }
  0xe0   :  { %v982_v9 = vadd.f32 %v981_v36, %v980_v48  ;;  %v964_v36 = vmul.f32 %v3106_v53, %v3341_v10  ;;  %v746_v33 = vrot.slane %v715_v20, 4  ;;  %v965_v38 = vmul.f32 %v3105_v42, %v3343_v27 }
  0xe1   :  { %v987_v4 = vsel %vm969_vm3, %v962_v7, 0.0  ;;  %v718_v40 = vmul.f32 %v3397_v13, %v3333_v1  ;;  %v752_v26 = vrot.slane %v716_v12, 4  ;;  %v729_v56 = vadd.f32 %v728_v6, %v2674_v11  ;;  %v3400_v1 = vld [vmem:[#allocation55_spill] sm:$0xff] }
  0xe2   :  { %v984_v48 = vadd.f32 %v983_v15, %v982_v9  ;;  %v735_v18 = vadd.f32 %v734_v22, %v2678_v25  ;;  %v741_v49 = vadd.f32 %v740_v50, %v2688_v39  ;;  %v3398_v15 = vsub.f32 0.0, %v2825_v41  ;;  %v3402_v6 = vld [vmem:[#allocation15_spill] sm:$0xff] }
  0xe3   :  { %v3399_v42 = vsub.f32 0.0, %v2832_v2  ;;  %v989_v7 = vsel %vm969_vm3, %v963_v43, 0.0  ;;  %v758_v27 = vrot.slane %v717_v0, 4  ;;  %v3401_v13 = vsub.f32 0.0, %v2834_v24  ;;  %v3403_v25 = vld [vmem:[#allocation71_spill] sm:$0xff] }
  0xe4   :  { %v986_v5 = vadd.f32 %v985_v23, %v984_v48  ;;  %v966_v9 = vmul.f32 %v3398_v15, %v3344_v60  ;;  %v719_v22 = vmul.f32 %v3403_v25, %v3402_v6  ;;  %v747_v39 = vadd.f32 %v746_v33, %v715_v20  ;;  %v3404_v48 = vld [vmem:[#allocation72_spill] sm:$0xff]  ;;  %v3405_v20 = vld [vmem:[#allocation73_spill] sm:$0xff] }
  0xe5   :  { %v967_v53 = vmul.f32 %v3399_v42, %v3348_v55  ;;  %v968_v23 = vmul.f32 %v3401_v13, %v3400_v1  ;;  %v991_v50 = vsel %vm969_vm3, %v964_v36, 0.0  ;;  %v720_v15 = vmul.f32 %v3404_v48, %v3342_v63 }
  0xe6   :  { %v988_v11 = vadd.f32 %v987_v4, %v986_v5  ;;  %v753_v60 = vadd.f32 %v752_v26, %v716_v12  ;;  %v764_v2 = vrot.slane %v718_v40, 4  ;;  %v730_v55 = vrot.slane %v729_v56, 2  ;;  %v3406_v26 = vld [vmem:[#allocation74_spill] sm:$0xff] }
  0xe7   :  { %v736_v43 = vrot.slane %v735_v18, 2  ;;  %v742_v10 = vrot.slane %v741_v49, 2  ;;  %v993_v41 = vsel %vm969_vm3, %v965_v38, 0.0  ;;  %v995_v13 = vsel %vm969_vm3, %v966_v9, 0.0 }
  0xe8   :  { %v990_v42 = vadd.f32 %v989_v7, %v988_v11  ;;  %v997_v5 = vsel %vm969_vm3, %v967_v53, 0.0  ;;  %v759_v4 = vadd.f32 %v758_v27, %v717_v0  ;;  %v721_v36 = vmul.f32 %v3405_v20, %v3347_v61  ;;  %v3407_v27 = vld [vmem:[#allocation75_spill] sm:$0xff]  ;;  %v3408_v53 = vld [vmem:[#allocation12_spill] sm:$0xff] }
  0xe9   :  { %v748_v33 = vrot.slane %v747_v39, 2  ;;  %v770_v25 = vrot.slane %v719_v22, 4  ;;  %v722_v63 = vmul.f32 %v3406_v26, %v3349_v46  ;;  %v754_v12 = vrot.slane %v753_v60, 2 }
  0xea   :  { %v992_v6 = vadd.f32 %v991_v50, %v990_v42  ;;  %v765_v7 = vadd.f32 %v764_v2, %v718_v40  ;;  %v776_v11 = vrot.slane %v720_v15, 4  ;;  %v731_v1 = vadd.f32 %v730_v55, %v729_v56 }
  0xeb   :  { %v737_v38 = vadd.f32 %v736_v43, %v735_v18  ;;  %v743_v24 = vadd.f32 %v742_v10, %v741_v49  ;;  %v999_v9 = vsel %vm969_vm3, %v968_v23, 0.0  ;;  %v723_v0 = vmul.f32 %v3407_v27, %v3350_v30  ;;  %v3409_v18 = vld [vmem:[#allocation56_spill] sm:$0xff] }
  0xec   :  { %v994_v48 = vadd.f32 %v993_v41, %v992_v6  ;;  %v724_v61 = vmul.f32 %v3408_v53, %v3351_v44  ;;  %v760_v50 = vrot.slane %v759_v4, 2  ;;  %v749_v20 = vadd.f32 %v748_v33, %v747_v39  ;;  %v3411_v53 = vld [vmem:[#allocation23_spill] sm:$0xff] }
  0xed   :  { %v771_v19 = vadd.f32 %v770_v25, %v719_v22  ;;  %v782_v46 = vrot.slane %v721_v36, 4  ;;  %v755_v26 = vadd.f32 %v754_v12, %v753_v60  ;;  %v766_v2 = vrot.slane %v765_v7, 2  ;;  %v3410_v22 = vld [vmem:[#allocation13_spill] sm:$0xff] }
  0xee   :  { %v996_v42 = vadd.f32 %v995_v13, %v994_v48  ;;  %v777_v40 = vadd.f32 %v776_v11, %v720_v15  ;;  %v788_v41 = vrot.slane %v722_v63, 4  ;;  %v732_v56 = vrot.slane %v731_v1, 1 }
  0xef   :  { %v738_v10 = vrot.slane %v737_v38, 1  ;;  %v744_v49 = vrot.slane %v743_v24, 1  ;;  %v725_v23 = vmul.f32 %v3409_v18, %v3353_v21  ;;  %v761_v30 = vadd.f32 %v760_v50, %v759_v4  ;;  %v3412_v21 = vld [vmem:[#allocation14_spill] sm:$0xff] }
  0xf0   :  { %v998_v55 = vadd.f32 %v997_v5, %v996_v42  ;;  %v794_v43 = vrot.slane %v723_v0, 4  ;;  %v800_v6 = vrot.slane %v724_v61, 4  ;;  %v750_v27 = vrot.slane %v749_v20, 1 }
  0xf1   :  { %v772_v13 = vrot.slane %v771_v19, 2  ;;  %v783_v39 = vadd.f32 %v782_v46, %v721_v36  ;;  %v726_v60 = vmul.f32 %v3410_v22, %v3358_v16  ;;  %v767_v33 = vadd.f32 %v766_v2, %v765_v7 }
  0xf2   :  { %v1000_v44 = vadd.f32 %v999_v9, %v998_v55  ;;  %v778_v15 = vrot.slane %v777_v40, 2  ;;  %v789_v25 = vadd.f32 %v788_v41, %v722_v63  ;;  %v733_v5 = vadd.f32 %v732_v56, %v731_v1 }
  0xf3   :  { %v739_v12 = vadd.f32 %v738_v10, %v737_v38  ;;  %v745_v11 = vadd.f32 %v744_v49, %v743_v24  ;;  %v756_v48 = vrot.slane %v755_v26, 1  ;;  %v727_v4 = vmul.f32 %v3412_v21, %v3411_v53 }
  0xf4   :  { %1001 = vadd.xlane.f32.xlu1 %v1000_v44  ;;  %v795_v50 = vadd.f32 %v794_v43, %v723_v0  ;;  %v801_v42 = vadd.f32 %v800_v6, %v724_v61  ;;  %v806_v9 = vrot.slane %v725_v23, 4  ;;  %v751_v55 = vadd.f32 %v750_v27, %v749_v20 }
  0xf5   :  { %v762_v18 = vrot.slane %v761_v30, 1  ;;  %v773_v36 = vadd.f32 %v772_v13, %v771_v19  ;;  %v784_v46 = vrot.slane %v783_v39, 2  ;;  %v768_v28 = vrot.slane %v767_v33, 1 }
  0xf6   :  { %v779_v16 = vadd.f32 %v778_v15, %v777_v40  ;;  %v790_v7 = vrot.slane %v789_v25, 2  ;;  %v812_v2 = vrot.slane %v726_v60, 4  ;;  %v757_v63 = vadd.f32 %v756_v48, %v755_v26 }
  0xf7   :  { %v1006_v41 = vsub.f32 1.0, %v733_v5  ;;  %v1007_v1 = vsub.f32 1.0, %v739_v12  ;;  %v1008_v38 = vsub.f32 1.0, %v745_v11  ;;  %v796_v24 = vrot.slane %v795_v50, 2 }
  0xf8   :  { %v802_v56 = vrot.slane %v801_v42, 2  ;;  %v807_v10 = vadd.f32 %v806_v9, %v725_v23  ;;  %v818_v49 = vrot.slane %v727_v4, 4  ;;  %v763_v44 = vadd.f32 %v762_v18, %v761_v30 }
  0xf9   :  { %v774_v0 = vrot.slane %v773_v36, 1  ;;  %v785_v61 = vadd.f32 %v784_v46, %v783_v39  ;;  %v1009_v43 = vsub.f32 1.0, %v751_v55  ;;  %v769_v20 = vadd.f32 %v768_v28, %v767_v33 }
  0xfa   :  { %v780_v6 = vrot.slane %v779_v16, 1  ;;  %v791_v19 = vadd.f32 %v790_v7, %v789_v25  ;;  %v813_v27 = vadd.f32 %v812_v2, %v726_v60  ;;  %v1010_v13 = vsub.f32 1.0, %v757_v63 }
  0xfb   :  { %v1023_v40 = vmul.f32 %v1006_v41, %v1006_v41  ;;  %v1024_v22 = vmul.f32 %v1007_v1, %v1007_v1  ;;  %v1025_v15 = vmul.f32 %v1008_v38, %v1008_v38  ;;  %v797_v26 = vadd.f32 %v796_v24, %v795_v50 }
  0xfc   :  { %v803_v5 = vadd.f32 %v802_v56, %v801_v42  ;;  %v808_v12 = vrot.slane %v807_v10, 2  ;;  %v819_v11 = vadd.f32 %v818_v49, %v727_v4  ;;  %v775_v48 = vadd.f32 %v774_v0, %v773_v36 }
  0xfd   :  { %v786_v53 = vrot.slane %v785_v61, 1  ;;  %v1011_v23 = vsub.f32 1.0, %v763_v44  ;;  %v1026_v21 = vmul.f32 %v1009_v43, %v1009_v43  ;;  %v781_v30 = vadd.f32 %v780_v6, %v779_v16 }
  0xfe   :  { %v792_v9 = vrot.slane %v791_v19, 1  ;;  %v814_v39 = vrot.slane %v813_v27, 2  ;;  %v1012_v55 = vsub.f32 1.0, %v769_v20  ;;  %v1027_v28 = vmul.f32 %v1010_v13, %v1010_v13 }
  0xff   :  { %v3413_v33 = vsub.f32 0.0, %v2765_v52  ;;  %v3414_v25 = vsub.f32 0.0, %v2767_v62  ;;  %v3415_v50 = vsub.f32 0.0, %v2769_v31  ;;  %v798_v46 = vrot.slane %v797_v26, 1 }
 0x100   :  { %v804_v4 = vrot.slane %v803_v5, 1  ;;  %v809_v36 = vadd.f32 %v808_v12, %v807_v10  ;;  %v820_v7 = vrot.slane %v819_v11, 2  ;;  %v787_v2 = vadd.f32 %v786_v53, %v785_v61 }
 0x101   :  { %v1039_v60 = vmul.f32 %v1023_v40, %v3413_v33  ;;  %v1040_v18 = vmul.f32 %v1024_v22, %v3414_v25  ;;  %v1041_v42 = vmul.f32 %v1025_v15, %v3415_v50  ;;  %v1013_v63 = vsub.f32 1.0, %v775_v48 }
 0x102   :  { %v1028_v16 = vmul.f32 %v1011_v23, %v1011_v23  ;;  %v3416_v41 = vsub.f32 0.0, %v2771_v57  ;;  %v793_v38 = vadd.f32 %v792_v9, %v791_v19  ;;  %v815_v24 = vadd.f32 %v814_v39, %v813_v27 }
 0x103   :  { %v1014_v52 = vsub.f32 1.0, %v781_v30  ;;  %v1029_v56 = vmul.f32 %v1012_v55, %v1012_v55  ;;  %v3417_v62 = vsub.f32 0.0, %v2773_v45  ;;  %v1055_v31 = vmul.f32 %v1039_v60, %v3380_v32 }
 0x104   :  { %v1042_v1 = vmul.f32 %v1026_v21, %v3416_v41  ;;  %v1056_v44 = vmul.f32 %v1040_v18, %v3381_v37  ;;  %v1057_v10 = vmul.f32 %v1041_v42, %v3382_v29  ;;  %v799_v0 = vadd.f32 %v798_v46, %v797_v26  ;;  %v3420_v37 = vld [vmem:[#allocation28_spill] sm:$0xff] }
 0x105   :  { %v1043_v49 = vmul.f32 %v1027_v28, %v3417_v62  ;;  %v805_v61 = vadd.f32 %v804_v4, %v803_v5  ;;  %v810_v43 = vrot.slane %v809_v36, 1  ;;  %v821_v20 = vadd.f32 %v820_v7, %v819_v11 }
 0x106   :  { %v1015_v6 = vsub.f32 1.0, %v787_v2  ;;  %v1030_v57 = vmul.f32 %v1013_v63, %v1013_v63  ;;  %v3418_v19 = vsub.f32 0.0, %v2775_v8  ;;  %v1058_v13 = vmul.f32 %v1042_v1, %v3383_v17 }
 0x107   :  { %v816_v40 = vrot.slane %v815_v24, 1  ;;  %v1016_v45 = vsub.f32 1.0, %v793_v38  ;;  %v1031_v22 = vmul.f32 %v1014_v52, %v1014_v52  ;;  %v3419_v32 = vsub.f32 0.0, %v2780_v34 }
 0x108   :  { %v1044_v27 = vmul.f32 %v1028_v16, %v3418_v19  ;;  %v1059_v12 = vmul.f32 %v1043_v49, %v3420_v37  ;;  %v1071_v29 = vsel %vm969_vm3, %v1055_v31, 0.0  ;;  %v1072_v26 = vsel %vm969_vm3, %v1056_v44, 0.0  ;;  %v3427_v49 = vld [vmem:[#allocation44_spill] sm:$0xff] }
 0x109   :  { %v1045_v15 = vmul.f32 %v1029_v56, %v3419_v32  ;;  %v1074_v5 = vsel %vm969_vm3, %v1057_v10, 0.0  ;;  %v811_v11 = vadd.f32 %v810_v43, %v809_v36  ;;  %v822_v48 = vrot.slane %v821_v20, 1  ;;  %v3425_v56 = vld [vmem:[#allocation57_spill] sm:$0xff]  ;;  %v3430_v43 = vld [vmem:[#allocation48_spill] sm:$0xff] }
 0x10a   :  { %v1017_v8 = vsub.f32 1.0, %v799_v0  ;;  %v1073_v53 = vadd.f32 %v1072_v26, %v1071_v29  ;;  %v1032_v23 = vmul.f32 %v1015_v6, %v1015_v6  ;;  %v3421_v17 = vsub.f32 0.0, %v2792_v59  ;;  %v3428_v0 = vld [vmem:[#allocation58_spill] sm:$0xff]  ;;  %v3431_v19 = vld [vmem:[#allocation16_spill] sm:$0xff] }
 0x10b   :  { %v1060_v30 = vmul.f32 %v1044_v27, %v3385_v58  ;;  %v1076_v34 = vsel %vm969_vm3, %v1058_v13, 0.0  ;;  %v1018_v9 = vsub.f32 1.0, %v805_v61  ;;  %v1033_v39 = vmul.f32 %v1016_v45, %v1016_v45  ;;  %v3436_v29 = vld [vmem:[#allocation50_spill] sm:$0xff] }
 0x10c   :  { %v1046_v21 = vmul.f32 %v1030_v57, %v3421_v17  ;;  %v1075_v55 = vadd.f32 %v1074_v5, %v1073_v53  ;;  %v817_v28 = vadd.f32 %v816_v40, %v815_v24  ;;  %v3422_v33 = vsub.f32 0.0, %v2805_v47  ;;  %v3433_v40 = vld [vmem:[#allocation49_spill] sm:$0xff] }
 0x10d   :  { %v1061_v25 = vmul.f32 %v1045_v15, %v3386_v51  ;;  %v1078_v18 = vsel %vm969_vm3, %v1059_v12, 0.0  ;;  %v1019_v50 = vsub.f32 1.0, %v811_v11  ;;  %v1034_v42 = vmul.f32 %v1017_v8, %v1017_v8  ;;  %v3434_v15 = vld [vmem:[#allocation59_spill] sm:$0xff] }
 0x10e   :  { %v1047_v60 = vmul.f32 %v1031_v22, %v3422_v33  ;;  %v1077_v46 = vadd.f32 %v1076_v34, %v1075_v55  ;;  %v823_v59 = vadd.f32 %v822_v48, %v821_v20  ;;  %v3423_v4 = vsub.f32 0.0, %v2812_v14  ;;  %v3437_v48 = vld [vmem:[#allocation17_spill] sm:$0xff] }
 0x10f   :  { %v1062_v36 = vmul.f32 %v1046_v21, %v3390_v54  ;;  %v1080_v7 = vsel %vm969_vm3, %v1060_v30, 0.0  ;;  %v1035_v2 = vmul.f32 %v1018_v9, %v1018_v9  ;;  %v1020_v16 = vsub.f32 1.0, %v817_v28  ;;  %v3440_v34 = vld [vmem:[#allocation53_spill] sm:$0xff]  ;;  %v3441_v28 = vld [vmem:[#allocation55_spill] sm:$0xff] }
 0x110   :  { %v1048_v58 = vmul.f32 %v1032_v23, %v3423_v4  ;;  %v1079_v63 = vadd.f32 %v1078_v18, %v1077_v46  ;;  %v3424_v47 = vsub.f32 0.0, %v2814_v3  ;;  %v1063_v51 = vmul.f32 %v1047_v60, %v3393_v35  ;;  %v3439_v23 = vld [vmem:[#allocation52_spill] sm:$0xff] }
 0x111   :  { %v1082_v1 = vsel %vm969_vm3, %v1061_v25, 0.0  ;;  %v1036_v38 = vmul.f32 %v1019_v50, %v1019_v50  ;;  %v1021_v52 = vsub.f32 1.0, %v823_v59  ;;  %v3426_v14 = vsub.f32 0.0, %v3425_v56 }
 0x112   :  { %v1049_v41 = vmul.f32 %v1033_v39, %v3424_v47  ;;  %v1081_v24 = vadd.f32 %v1080_v7, %v1079_v63  ;;  %v1064_v54 = vmul.f32 %v1048_v58, %v3427_v49  ;;  %v1084_v31 = vsel %vm969_vm3, %v1062_v36, 0.0 }
 0x113   :  { %v1050_v62 = vmul.f32 %v1034_v42, %v3426_v14  ;;  %v1037_v10 = vmul.f32 %v1020_v16, %v1020_v16  ;;  %v3429_v61 = vsub.f32 0.0, %v3428_v0  ;;  %v1086_v35 = vsel %vm969_vm3, %v1063_v51, 0.0 }
 0x114   :  { %v1083_v44 = vadd.f32 %v1082_v1, %v1081_v24  ;;  %v1065_v20 = vmul.f32 %v1049_v41, %v3430_v43  ;;  %v1038_v57 = vmul.f32 %v1021_v52, %v1021_v52  ;;  %v3432_v27 = vsub.f32 0.0, %v3431_v19 }
 0x115   :  { %v1051_v3 = vmul.f32 %v1035_v2, %v3429_v61  ;;  %v1066_v45 = vmul.f32 %v1050_v62, %v3433_v40  ;;  %v1088_v22 = vsel %vm969_vm3, %v1064_v54, 0.0  ;;  %v3435_v37 = vsub.f32 0.0, %v3434_v15 }
 0x116   :  { %v1085_v6 = vadd.f32 %v1084_v31, %v1083_v44  ;;  %v1052_v13 = vmul.f32 %v1036_v38, %v3432_v27  ;;  %v1090_v5 = vsel %vm969_vm3, %v1065_v20, 0.0  ;;  %v3438_v8 = vsub.f32 0.0, %v3437_v48 }
 0x117   :  { %v1053_v12 = vmul.f32 %v1037_v10, %v3435_v37  ;;  %v1067_v26 = vmul.f32 %v1051_v3, %v3436_v29  ;;  %v1092_v21 = vsel %vm969_vm3, %v1066_v45, 0.0  ;;  %vm20_vm7 = vcmask 7168   ;;  %v3443_v45 = vld [vmem:[#allocation10_spill] sm:$0xff] }
 0x118   :  { %v1087_v32 = vadd.f32 %v1086_v35, %v1085_v6  ;;  %v1054_v53 = vmul.f32 %v1038_v57, %v3438_v8  ;;  %v1068_v17 = vmul.f32 %v1052_v13, %v3439_v23  ;;  %v3442_v4 = vmov 0.0  }
 0x119   :  { %v1069_v9 = vmul.f32 %v1053_v12, %v3440_v34  ;;  %v1094_v39 = vsel %vm969_vm3, %v1067_v26, 0.0  ;;  %21 = vst.msk [vmem:[#allocation5] sm:$0xff] %vm20_vm7, %v3442_v4  ;;  %vm16_vm8 = vcmask 0   ;;  %v1469_v27 = vmov 5.0  }
 0x11a   :  { %v1089_v11 = vadd.f32 %v1088_v22, %v1087_v32  ;;  %v1070_v33 = vmul.f32 %v1054_v53, %v3441_v28  ;;  %v1096_v60 = vsel %vm969_vm3, %v1068_v17, 0.0  ;;  %22 = vst.msk [vmem:[#allocation6] sm:$0xff] %vm20_vm7, %v3442_v4  ;;  %vm3444_vm13 = vcmp.lt.s32.totalorder %v3443_v45, 5 }
 0x11b   :  { %v1098_v18 = vsel %vm969_vm3, %v1069_v9, 0.0  ;;  %17 = vst.msk [vmem:[#allocation2] sm:$0x1] %vm16_vm8, %v3442_v4 }
 0x11c   :  { %v1091_v30 = vadd.f32 %v1090_v5, %v1089_v11  ;;  %v1100_v42 = vsel %vm969_vm3, %v1070_v33, 0.0  ;;  %18 = vst.msk [vmem:[#allocation3] sm:$0x1] %vm16_vm8, %v3442_v4 }
 0x11d   :  { %19 = vst.msk [vmem:[#allocation4] sm:$0x1] %vm16_vm8, %v3442_v4 }
 0x11e   :  { %v1093_v55 = vadd.f32 %v1092_v21, %v1091_v30 }
 0x120   :  { %v1095_v25 = vadd.f32 %v1094_v39, %v1093_v55  ;;  %v1158_v1 = vld [vmem:[#allocation5] sm:$0xff] }
 0x121   :  { %v1228_v58 = vpop.xlane.xlu0 %1227  ;;  %v1195_v36 = vld [vmem:[#allocation6] sm:$0xff] }
 0x122   :  { %v1097_v50 = vadd.f32 %v1096_v60, %v1095_v25  ;;  %v1229_v7 = vadd.f32 %v1228_v58, %v1195_v36  ;;  %v936_v49 = vld [vmem:[#allocation2] sm:$0x1] }
 0x123   :  { %v1022_v39 = vld [vmem:[#allocation3] sm:$0x1] }
 0x124   :  { %v1099_v46 = vadd.f32 %v1098_v18, %v1097_v50  ;;  %1230 = vst.msk [vmem:[#allocation6] sm:$0xff] %vm20_vm7, %v1229_v7  ;;  %v1139_v2 = vpop.xlane.xlu1 %1138  ;;  %v1106_v63 = vld [vmem:[#allocation4] sm:$0x1] }
 0x125   :  { %v1140_v16 = vadd.f32 %v1139_v2, %v1106_v63 }
 0x126   :  { %v1101_v59 = vadd.f32 %v1100_v42, %v1099_v46 }
 0x127   :  { %1141 = vst.msk [vmem:[#allocation4] sm:$0x1] %vm16_vm8, %v1140_v16 }
 0x128   :  { %1102 = vadd.xlane.f32.xlu2 %v1101_v59 }
 0x12b   :  { %v1257_v47 = vld [vmem:[#allocation6] sm:$0xff] }
 0x12c   :  { %v1258_v41 = vadd.f32 1e-07, %v1257_v47 }
 0x12e   :  { %v1191_v51 = vpop.xlane.xlu0 %1190  ;;  %1448 = vrcp.f32 %v1258_v41  ;;  %v1234_v14 = vld [vmem:[#allocation4] sm:$0x1]  ;;  %v1270_v10 = vand.u32 2147483648, %v1258_v41  ;;  %v1268_v3 = vand.u32 2147483647, %v1258_v41  ;;  %vm1264_vm12 = vweird.f32 %v1258_v41 }
 0x12f   :  { %v1192_v38 = vadd.f32 %v1191_v51, %v1158_v1  ;;  %v1235_v0 = vmax.f32 %v1234_v14, 1.0 }
 0x130   :  { %v1271_v35 = vor.u32 1.1754944e-38, %v1270_v10  ;;  %vm1269_vm10 = vcmp.eq.f32.partialorder %v1268_v3, 8.507059e+37 }
 0x131   :  { %1194 = vst.msk [vmem:[#allocation5] sm:$0xff] %vm20_vm7, %v1192_v38  ;;  %1450 = vrcp.f32 %v1235_v0  ;;  %vm1242_vm4 = vweird.f32 %v1235_v0  ;;  %v1248_v17 = vand.u32 2147483648, %v1235_v0  ;;  %v1246_v30 = vand.u32 2147483647, %v1235_v0 }
 0x132   :  { %1452 = vrcp.f32 %v1469_v27 }
 0x133   :  { %v1249_v55 = vor.u32 1.1754944e-38, %v1248_v17  ;;  %vm1247_vm1 = vcmp.eq.f32.partialorder %v1246_v30, 8.507059e+37 }
 0x134   :  { %v1449_v24 = vpop.eup %1448 }
 0x135   :  { %v1260_v52 = vmul.f32 %v1449_v24, %v1258_v41  ;;  %vm1265_vm11 = vweird.f32 %v1449_v24 }
 0x136   :  { %vm1266_vm9 = vmor %vm1264_vm12, %vm1265_vm11 }
 0x137   :  { %v1261_v62 = vsub.f32 1.0, %v1260_v52  ;;  %v1451_v40 = vpop.eup %1450 }
 0x138   :  { %v1254_v31 = vld [vmem:[#allocation5] sm:$0xff]  ;;  %v1453_v15 = vpop.eup %1452  ;;  %v1238_v12 = vmul.f32 %v1451_v40, %v1235_v0  ;;  %vm1243_vm14 = vweird.f32 %v1451_v40 }
 0x139   :  { %v1262_v44 = vmul.f32 %v1449_v24, %v1261_v62  ;;  %v1255_v61 = vmul.f32 2.0, %v1254_v31  ;;  %v1284_v26 = vmul.f32 5.0, %v1453_v15  ;;  %vm1244_vm15 = vmor %vm1242_vm4, %vm1243_vm14  ;;  %vm1288_vm0 = vweird.f32 %v1453_v15 }
 0x13a   :  { %v1239_v5 = vsub.f32 1.0, %v1238_v12 }
 0x13b   :  { %v1256_v43 = vadd.f32 1e-07, %v1255_v61  ;;  %v1263_v20 = vadd.f32 %v1449_v24, %v1262_v44  ;;  %v1285_v48 = vsub.f32 1.0, %v1284_v26 }
 0x13c   :  { %v1240_v8 = vmul.f32 %v1451_v40, %v1239_v5 }
 0x13d   :  { %v1267_v6 = vsel %vm1266_vm9, %v1449_v24, %v1263_v20  ;;  %v1286_v23 = vmul.f32 %v1453_v15, %v1285_v48 }
 0x13e   :  { %v1272_v57 = vsel %vm1269_vm10, %v1271_v35, %v1267_v6  ;;  %v1241_v21 = vadd.f32 %v1451_v40, %v1240_v8 }
 0x13f   :  { %v1273_v19 = vmul.f32 %v1272_v57, %v1256_v43  ;;  %v1287_v9 = vadd.f32 %v1453_v15, %v1286_v23 }
 0x140   :  { %v1245_v28 = vsel %vm1244_vm15, %v1451_v40, %v1241_v21 }
 0x141   :  { %v1274_v13 = vsub.f32 1.0, %v1273_v19  ;;  %v1289_v25 = vsel %vm1288_vm0, %v1453_v15, %v1287_v9  ;;  %v1250_v42 = vsel %vm1247_vm1, %v1249_v55, %v1245_v28 }
 0x143   :  { %v1275_v22 = vsel %vm3444_vm13, %v1274_v13, 0.0 }
 0x144   :  { %v1276_v32 = vsel %vm20_vm7, %v1275_v22, 0.0 }
 0x145   :  { %v1277_v37 = vrot.slane %v1276_v32, 4 }
 0x147   :  { %v1278_v29 = vadd.f32 %v1277_v37, %v1276_v32 }
 0x149   :  { %v1279_v11 = vrot.slane %v1278_v29, 2 }
 0x14b   :  { %v1280_v53 = vadd.f32 %v1279_v11, %v1278_v29 }
 0x14d   :  { %v1281_v34 = vrot.slane %v1280_v53, 1 }
 0x14f   :  { %v1282_v33 = vadd.f32 %v1281_v34, %v1280_v53 }
 0x151   :  { %v1290_v46 = vmul.f32 %v1289_v25, %v1282_v33 }
 0x153   :  { %v1292_v4 = vmul.f32 0.3, %v1290_v46 }
 0x167   :  { %v1002_v56 = vpop.xlane.xlu1 %1001 }
 0x168   :  { %v1003_v54 = vadd.f32 %v1002_v56, %v936_v49 }
 0x16a   :  { %1005 = vst.msk [vmem:[#allocation2] sm:$0x1] %vm16_vm8, %v1003_v54 }
 0x171   :  { %v1236_v50 = vld [vmem:[#allocation2] sm:$0x1] }
 0x172   :  { %v1251_v59 = vmul.f32 %v1250_v42, %v1236_v50 }
 0x174   :  { %v1291_v58 = vmul.f32 0.5, %v1251_v59 }
 0x176   :  { %v1293_v2 = vadd.f32 %v1292_v4, %v1291_v58 }
 0x19b   :  { %v1103_v60 = vpop.xlane.xlu2 %1102 }
 0x19c   :  { %v1104_v18 = vadd.f32 %v1103_v60, %v1022_v39 }
 0x19e   :  { %1105 = vst.msk [vmem:[#allocation3] sm:$0x1] %vm16_vm8, %v1104_v18 }
 0x1a5   :  { %v1252_v36 = vld [vmem:[#allocation3] sm:$0x1] }
 0x1a6   :  { %v1253_v7 = vmul.f32 %v1252_v36, %v1250_v42 }
 0x1a8   :  { %v1294_v63 = vmul.f32 0.2, %v1253_v7 }
 0x1aa   :  { %v1295_v16 = vadd.f32 %v1294_v63, %v1293_v2 }
 0x1ac   :  { %1341 = vpush %v1295_v16 }
 0x1ad   :  { %1343 = vpush %v1251_v59 }
 0x1ae   :  { %1345 = vpush %v1290_v46 }
 0x1af   :  { %1347 = vpush %v1253_v7 }
 0x1dd   :  { %s1342_s17 = spop %1341 }
 0x1de   :  { %1298 = sst [smem:[#allocation7]] %s1342_s17  ;;  %s1344_s18 = spop %1343 }
 0x1df   :  { %1301 = sst [smem:[#allocation7 + $0x1]] %s1344_s18  ;;  %s1346_s19 = spop %1345 }
 0x1e0   :  { %1304 = sst [smem:[#allocation7 + $0x2]] %s1346_s19  ;;  %s1348_s20 = spop %1347 }
 0x1e1   :  { %1307 = sst [smem:[#allocation7 + $0x3]] %s1348_s20 }
 0x1e2   :  { %1316 = dma.smem_to_vmem %s1470_s21, 16, %s1314_s16, [#allocation8]  }
 0x1e3   :  { %1466 = dma.done.wait [#allocation8], 16  }
 0x1e4   :  { %1467 = vsyncadd [#allocation8], 4294967280 }
 0x1e5   :  { %1321 = sfence }
 0x1e6   :  { %1322 = vsyncpa [#allocation8], 1 }

</bundles_post_ra>
